<compile_context>
chip_gen: v7x
topology: tpu7x:2x2x1
jax: 0.10.0
libtpu: 0.0.40
codegen_flags: <defaults>
</compile_context>

<pallas_src>
import math
import functools

import jax
import jax.numpy as jnp
from jax import lax
from jax.experimental import pallas as pl
from jax.experimental.pallas import tpu as pltpu


def _layer_norm(x, gamma, beta, eps=1e-5):
    mu = jnp.mean(x, axis=-1, keepdims=True)
    var = jnp.mean((x - mu) ** 2, axis=-1, keepdims=True)
    return (x - mu) * lax.rsqrt(var + eps) * gamma + beta


def _gelu_exact(x):
    # torch.nn.functional.gelu default (erf-based, exact)
    return 0.5 * x * (1.0 + lax.erf(x * (1.0 / math.sqrt(2.0))))


def transformer_block_kernel(
    x_ref,
    ln1g_ref, ln1b_ref,
    wqkv_ref, wproj_ref, bproj_ref,
    ln2g_ref, ln2b_ref,
    w1_ref, b1_ref, w2_ref, b2_ref,
    o_ref,
    k_scr, v_scr, q_scr, attn_scr,
    *, num_heads, head_dim, block_q, ffn_chunk, compute_dtype, approx_reciprocal,
):
    C = num_heads * head_dim
    H = num_heads
    tq = block_q
    cdt = compute_dtype
    qi = pl.program_id(1)

    # ---- LayerNorm 1 + fused QKV projection for this q-tile only ----
    xt = x_ref[0]                                                   # (tq, C) f32
    h1 = _layer_norm(xt, ln1g_ref[0], ln1b_ref[0]).astype(cdt)
    # Q columns of wqkv are pre-scaled by head_dim**-0.5 on the host.
    qkv = jnp.dot(h1, wqkv_ref[...],
                  preferred_element_type=jnp.float32)               # (tq, 3C)

    # Append this tile's K/V rows into persistent head-major scratch (plain,
    # 128-lane-aligned column-slice stores; no in-kernel reshape/transpose).
    # NOTE: relies on the q axis being iterated sequentially within a batch
    # element (it is marked "arbitrary"); do NOT mark it "parallel".
    row0 = pl.multiple_of(qi * tq, tq)
    for hh in range(H):
        lo = hh * head_dim
        q_scr[hh] = qkv[:, lo:lo + head_dim].astype(cdt)
        k_scr[hh, pl.ds(row0, tq), :] = qkv[:, C + lo:C + lo + head_dim].astype(cdt)
        v_scr[hh, pl.ds(row0, tq), :] = qkv[:, 2 * C + lo:2 * C + lo + head_dim].astype(cdt)

    q_h = q_scr[...]                                                # (H, tq, Dh)

    # ---- flash-style causal attention over the prefix (k-chunks of size tq) --
    def accumulate(kc, m, l, acc, masked):
        off = pl.multiple_of(kc * tq, tq)
        k_c = k_scr[:, pl.ds(off, tq), :]                           # (H, tq, Dh)
        v_c = v_scr[:, pl.ds(off, tq), :]
        s = jnp.einsum("hqd,hkd->hqk", q_h, k_c,
                       preferred_element_type=jnp.float32)          # (H, tq, tq)
        if masked:  # diagonal chunk: in-kernel triangular additive bias
            r = lax.broadcasted_iota(jnp.int32, (1, tq, tq), 1)
            c = lax.broadcasted_iota(jnp.int32, (1, tq, tq), 2)
            s = s + jnp.where(r >= c, 0.0, -1e30)
        m_new = jnp.maximum(m, jnp.max(s, axis=-1, keepdims=True))
        alpha = jnp.exp(m - m_new)
        p = jnp.exp(s - m_new)
        l_new = alpha * l + jnp.sum(p, axis=-1, keepdims=True)
        acc_new = alpha * acc + jnp.einsum("hqk,hkd->hqd", p.astype(cdt), v_c,
                                           preferred_element_type=jnp.float32)
        return m_new, l_new, acc_new

    m0 = jnp.full((H, tq, 1), -1e30, jnp.float32)
    l0 = jnp.zeros((H, tq, 1), jnp.float32)
    a0 = jnp.zeros((H, tq, head_dim), jnp.float32)

    def body(kc, carry):
        m, l, acc = carry
        return accumulate(kc, m, l, acc, masked=False)

    # Off-diagonal (fully unmasked) chunks: kc in [0, qi).
    m, l, acc = lax.fori_loop(0, qi, body, (m0, l0, a0))
    # Diagonal chunk (kc == qi) with the triangular mask.
    m, l, acc = accumulate(qi, m, l, acc, masked=True)

    # Normalize AFTER PV: (H, tq, Dh) pass instead of (H, tq, T).
    if approx_reciprocal:
        o = acc * pl.reciprocal(l, approx=True)                     # EUP slot
    else:
        o = acc / l

    for hh in range(H):
        attn_scr[:, hh * head_dim:(hh + 1) * head_dim] = o[hh].astype(cdt)

    attn = jnp.dot(attn_scr[...], wproj_ref[...],
                   preferred_element_type=jnp.float32) + bproj_ref[0]
    x1 = xt + attn                                                  # residual 1

    # ---- LayerNorm 2 + FFN (inner dim processed in ffn_chunk column chunks) --
    h2 = _layer_norm(x1, ln2g_ref[0], ln2b_ref[0]).astype(cdt)
    F = w1_ref.shape[1]
    n_chunks = F // ffn_chunk

    def ffn_body(ci, acc_ffn):
        lo = pl.multiple_of(ci * ffn_chunk, ffn_chunk)
        f = (jnp.dot(h2, w1_ref[:, pl.ds(lo, ffn_chunk)],
                     preferred_element_type=jnp.float32)
             + b1_ref[:, pl.ds(lo, ffn_chunk)])
        f = _gelu_exact(f)
        return acc_ffn + jnp.dot(f.astype(cdt), w2_ref[pl.ds(lo, ffn_chunk), :],
                                 preferred_element_type=jnp.float32)

    ffn = lax.fori_loop(0, n_chunks, ffn_body,
                        jnp.zeros((tq, C), jnp.float32), unroll=True)
    ffn = ffn + b2_ref[0]

    o_ref[0] = x1 + ffn                                             # residual 2


def _device_kind():
    try:
        return jax.devices()[0].device_kind.lower()
    except Exception:
        return ""


def _vmem_cap_bytes():
    kind = _device_kind()
    if ("v5" in kind) or ("v6" in kind):
        return 100 * 2 ** 20          # 128 MiB physical VMEM: raise the cap
    return 48 * 2 ** 20               # v7x / unknown: 64 MiB physical, headroom


def _default_block_q(T):
    kind = _device_kind()
    if "v5" in kind:
        return min(T, 128)            # 128x128 MXU
    return min(T, 256)                # v6e/v7x: 2x256^2 MXU


def transformer_block(x, params, *, num_heads, block_q=None, ffn_chunk=None,
                      compute_dtype=jnp.bfloat16, approx_reciprocal=True):
    B, T, C = x.shape
    assert C % num_heads == 0
    head_dim = C // num_heads
    F = params["w1"].shape[1]
    if block_q is None:
        block_q = _default_block_q(T)
    assert T % block_q == 0, "T must be divisible by block_q"
    nq = T // block_q
    if ffn_chunk is None:
        ffn_chunk = min(F, 512)
    assert F % ffn_chunk == 0, "ffn_dim must be divisible by ffn_chunk"
    cdt = compute_dtype
    itemsize = jnp.dtype(cdt).itemsize
    scale = head_dim ** (-0.5)

    x = x.astype(jnp.float32)
    # Fold the 1/sqrt(head_dim) attention scale into the Q columns of Wqkv
    # (one-time host-side rescale); weights in compute dtype, biases/LN in f32.
    wqkv_f32 = params["wqkv"].astype(jnp.float32)
    wqkv = jnp.concatenate([wqkv_f32[:, :C] * scale, wqkv_f32[:, C:]],
                           axis=1).astype(cdt)
    wproj = params["wproj"].astype(cdt)
    w1 = params["w1"].astype(cdt)
    w2 = params["w2"].astype(cdt)
    ln1g = params["ln1_g"].astype(jnp.float32)
    ln1b = params["ln1_b"].astype(jnp.float32)
    ln2g = params["ln2_g"].astype(jnp.float32)
    ln2b = params["ln2_b"].astype(jnp.float32)
    bproj = params["bproj"].astype(jnp.float32)
    b1 = params["b1"].astype(jnp.float32)
    b2 = params["b2"].astype(jnp.float32)

    kernel = functools.partial(
        transformer_block_kernel,
        num_heads=num_heads, head_dim=head_dim, block_q=block_q,
        ffn_chunk=ffn_chunk, compute_dtype=cdt,
        approx_reciprocal=approx_reciprocal,
    )

    # Advisory cost estimate (x read once, output written once, weights once;
    # causal attention ~halves the score/PV flops).
    weight_bytes = (wqkv.size + wproj.size + w1.size + w2.size) * itemsize
    cost = pl.CostEstimate(
        flops=2 * B * T * C * (4 * C + 2 * F) + 2 * B * T * T * C,
        transcendentals=B * num_heads * T * T // 2 + B * T * F,   # exp + erf
        bytes_accessed=2 * B * T * C * 4 + weight_bytes,
    )

    # VMEM plan: double-buffered x/out tiles, weights (constant-index blocks
    # are fetched once but still double-buffered by the pipeline), persistent
    # K/V/Q/attn scratch and the largest live f32 intermediates, 2x headroom,
    # capped per generation.
    # TODO(synk): on v7x with C>=2048 / F>=8192 the bf16 weights exceed the
    # 64 MiB VMEM; stream W1/W2 via a reduction grid axis (or a separate FFN
    # pallas_call) instead of keeping them resident.
    small_param_bytes = (9 * C + F) * 4
    act_bytes = 2 * 2 * block_q * C * 4
    scratch_bytes = (2 * num_heads * T * head_dim
                     + num_heads * block_q * head_dim
                     + block_q * C) * itemsize
    inter_bytes = (3 * block_q * C
                   + 2 * num_heads * block_q * block_q
                   + num_heads * block_q * (head_dim + 2)
                   + 2 * block_q * ffn_chunk
                   + 6 * block_q * C) * 4
    vmem_need = (2 * weight_bytes + 2 * small_param_bytes + act_bytes
                 + scratch_bytes + inter_bytes)
    vmem_limit = int(min(_vmem_cap_bytes(), max(32 * 2 ** 20, 2 * vmem_need)))

    # Weight blocks use a constant index_map, so the pipeline only DMAs them
    # once per call.
    # TODO(synk): request single-buffered residency (pl.Buffered(1)) for the
    # weight BlockSpecs once confirmed supported on the target jax/Mosaic
    # version (no silent try/except fallback).
    wspec = lambda shp: pl.BlockSpec(shp, lambda b, q: (0, 0))
    grid_spec = pltpu.PrefetchScalarGridSpec(
        num_scalar_prefetch=0,
        grid=(B, nq),
        in_specs=[
            pl.BlockSpec((1, block_q, C), lambda b, q: (b, q, 0)),  # x (q-tile)
            wspec((1, C)), wspec((1, C)),                           # ln1 g/b
            wspec((C, 3 * C)),                                      # Wqkv
            wspec((C, C)), wspec((1, C)),                           # Wproj, bproj
            wspec((1, C)), wspec((1, C)),                           # ln2 g/b
            wspec((C, F)), wspec((1, F)),                           # W1, b1
            wspec((F, C)), wspec((1, C)),                           # W2, b2
        ],
        out_specs=pl.BlockSpec((1, block_q, C), lambda b, q: (b, q, 0)),
        scratch_shapes=[
            pltpu.VMEM((num_heads, T, head_dim), cdt),        # K (head-major)
            pltpu.VMEM((num_heads, T, head_dim), cdt),        # V (head-major)
            pltpu.VMEM((num_heads, block_q, head_dim), cdt),  # Q (head-major)
            pltpu.VMEM((block_q, C), cdt),                    # attn head gather
        ],
    )

    fn = pl.pallas_call(
        kernel,
        out_shape=jax.ShapeDtypeStruct((B, T, C), jnp.float32),
        grid_spec=grid_spec,
        compiler_params=pltpu.CompilerParams(
            # Batch feeds megacore; the q axis carries the K/V scratch and the
            # causal prefix, so it must stay "arbitrary" (sequential).
            # TODO(synk): for B == 1 on v7x, split the K/V projection into its
            # own kernel so the q axis can be sharded across the two cores.
            dimension_semantics=("parallel", "arbitrary"),
            vmem_limit_bytes=vmem_limit,
        ),
        cost_estimate=cost,
    )
    return fn(x, ln1g, ln1b, wqkv, wproj, bproj, ln2g, ln2b, w1, b1, w2, b2)


def reference_block(x, params, *, num_heads):
    """Pure-JAX reference matching the PyTorch module (dropout = identity)."""
    B, T, C = x.shape
    head_dim = C // num_heads
    scale = head_dim ** (-0.5)
    mask = jnp.tril(jnp.ones((T, T), jnp.float32))

    def ln(v, g, b):
        mu = jnp.mean(v, axis=-1, keepdims=True)
        var = jnp.mean((v - mu) ** 2, axis=-1, keepdims=True)
        return (v - mu) / jnp.sqrt(var + 1e-5) * g + b

    h = ln(x, params["ln1_g"][0], params["ln1_b"][0])
    qkv = h @ params["wqkv"]                                 # (B,T,3C)
    qkv = qkv.reshape(B, T, 3, num_heads, head_dim).transpose(2, 0, 3, 1, 4)
    q, k, v = qkv[0], qkv[1], qkv[2]                         # (B,H,T,Dh)
    s = jnp.einsum("bhtd,bhsd->bhts", q, k) * scale
    s = jnp.where(mask[None, None] == 0.0, -jnp.inf, s)
    p = jax.nn.softmax(s, axis=-1)
    o = jnp.einsum("bhts,bhsd->bhtd", p, v)
    o = o.transpose(0, 2, 1, 3).reshape(B, T, C)
    attn = o @ params["wproj"] + params["bproj"][0]
    x1 = x + attn

    h2 = ln(x1, params["ln2_g"][0], params["ln2_b"][0])
    f = h2 @ params["w1"] + params["b1"][0]
    f = 0.5 * f * (1.0 + jax.lax.erf(f / math.sqrt(2.0)))
    f = f @ params["w2"] + params["b2"][0]
    return x1 + f


def init_params(key, embed_dim, ffn_dim):
    ks = jax.random.split(key, 6)
    s = 0.05
    return {
        "ln1_g": jnp.ones((1, embed_dim), jnp.float32),
        "ln1_b": jnp.zeros((1, embed_dim), jnp.float32),
        "wqkv": s * jax.random.normal(ks[0], (embed_dim, 3 * embed_dim), jnp.float32),
        "wproj": s * jax.random.normal(ks[1], (embed_dim, embed_dim), jnp.float32),
        "bproj": s * jax.random.normal(ks[2], (1, embed_dim), jnp.float32),
        "ln2_g": jnp.ones((1, embed_dim), jnp.float32),
        "ln2_b": jnp.zeros((1, embed_dim), jnp.float32),
        "w1": s * jax.random.normal(ks[3], (embed_dim, ffn_dim), jnp.float32),
        "b1": s * jax.random.normal(ks[4], (1, ffn_dim), jnp.float32),
        "w2": s * jax.random.normal(ks[5], (ffn_dim, embed_dim), jnp.float32),
        "b2": jnp.zeros((1, embed_dim), jnp.float32),
    }


if __name__ == "__main__":
    # Hardware-aligned small demo: head_dim = 128 (full lane), C and F
    # multiples of 128; two q-tiles per batch exercise the incremental K/V
    # scratch fill, the off-diagonal flash loop and the masked diagonal chunk;
    # B = 2 exercises the per-batch scratch refresh / megacore split.
    B, T, C = 2, 32, 256
    num_heads = 2
    ffn_dim = 512

    key = jax.random.PRNGKey(0)
    kx, kp = jax.random.split(key)
    x = jax.random.normal(kx, (B, T, C), jnp.float32)
    params = init_params(kp, C, ffn_dim)

    ref = reference_block(x, params, num_heads=num_heads)

    # 1) f32 compute path with exact reciprocal: tight numerical check.
    out_f32 = transformer_block(
        x, params, num_heads=num_heads, block_q=16, ffn_chunk=256,
        compute_dtype=jnp.float32, approx_reciprocal=False)
    out_f32 = jax.block_until_ready(out_f32)
    assert out_f32.shape == (B, T, C)
    err = float(jnp.max(jnp.abs(out_f32 - ref)))
    assert jnp.allclose(out_f32, ref, atol=1e-3, rtol=1e-3), f"f32 max abs err {err}"

    # 2) performance path: bf16 MXU operands (f32 accumulation) + approx
    #    reciprocal on the post-PV normalization.
    out_bf16 = transformer_block(
        x, params, num_heads=num_heads, block_q=16, ffn_chunk=256,
        compute_dtype=jnp.bfloat16, approx_reciprocal=True)
    out_bf16 = jax.block_until_ready(out_bf16)
    err = float(jnp.max(jnp.abs(out_bf16 - ref)))
    assert jnp.allclose(out_bf16, ref, atol=7e-2, rtol=7e-2), f"bf16 max abs err {err}"

    print("KERNEL_OK")
</pallas_src>

<mosaic_0001>
module attributes {stable_mosaic.version = 11 : i64} {
  func.func @transformer_block_kernel(%arg0: i32, %arg1: i32, %arg2: memref<1x16x256xf32, #tpu.memory_space<vmem>>, %arg3: memref<1x256xf32, #tpu.memory_space<vmem>>, %arg4: memref<1x256xf32, #tpu.memory_space<vmem>>, %arg5: memref<256x768xf32, #tpu.memory_space<vmem>>, %arg6: memref<256x256xf32, #tpu.memory_space<vmem>>, %arg7: memref<1x256xf32, #tpu.memory_space<vmem>>, %arg8: memref<1x256xf32, #tpu.memory_space<vmem>>, %arg9: memref<1x256xf32, #tpu.memory_space<vmem>>, %arg10: memref<256x512xf32, #tpu.memory_space<vmem>>, %arg11: memref<1x512xf32, #tpu.memory_space<vmem>>, %arg12: memref<512x256xf32, #tpu.memory_space<vmem>>, %arg13: memref<1x256xf32, #tpu.memory_space<vmem>>, %arg14: memref<1x16x256xf32, #tpu.memory_space<vmem>>, %arg15: memref<2x32x128xf32, #tpu.memory_space<vmem>>, %arg16: memref<2x32x128xf32, #tpu.memory_space<vmem>>, %arg17: memref<2x16x128xf32, #tpu.memory_space<vmem>>, %arg18: memref<16x256xf32, #tpu.memory_space<vmem>>) attributes {dimension_semantics = [#tpu.dimension_semantics<parallel>, #tpu.dimension_semantics<arbitrary>], iteration_bounds = array<i64: 2, 2>, scalar_prefetch = 0 : i64, scratch_operands = 4 : i64, tpu.core_type = #tpu.core_type<tc>, window_params = [{transform_indices = @transform_0, window_bounds = array<i64: 1, 16, 256>}, {pipeline_mode = #tpu.pipeline_mode<synchronous>, transform_indices = @transform_1, window_bounds = array<i64: 1, 256>}, {pipeline_mode = #tpu.pipeline_mode<synchronous>, transform_indices = @transform_2, window_bounds = array<i64: 1, 256>}, {pipeline_mode = #tpu.pipeline_mode<synchronous>, transform_indices = @transform_3, window_bounds = array<i64: 256, 768>}, {pipeline_mode = #tpu.pipeline_mode<synchronous>, transform_indices = @transform_4, window_bounds = array<i64: 256, 256>}, {pipeline_mode = #tpu.pipeline_mode<synchronous>, transform_indices = @transform_5, window_bounds = array<i64: 1, 256>}, {pipeline_mode = #tpu.pipeline_mode<synchronous>, transform_indices = @transform_6, window_bounds = array<i64: 1, 256>}, {pipeline_mode = #tpu.pipeline_mode<synchronous>, transform_indices = @transform_7, window_bounds = array<i64: 1, 256>}, {pipeline_mode = #tpu.pipeline_mode<synchronous>, transform_indices = @transform_8, window_bounds = array<i64: 256, 512>}, {pipeline_mode = #tpu.pipeline_mode<synchronous>, transform_indices = @transform_9, window_bounds = array<i64: 1, 512>}, {pipeline_mode = #tpu.pipeline_mode<synchronous>, transform_indices = @transform_10, window_bounds = array<i64: 512, 256>}, {pipeline_mode = #tpu.pipeline_mode<synchronous>, transform_indices = @transform_11, window_bounds = array<i64: 1, 256>}, {transform_indices = @transform_12, window_bounds = array<i64: 1, 16, 256>}]} {
    %c0 = arith.constant 0 : index
    %c0_0 = arith.constant 0 : index
    %c0_1 = arith.constant 0 : index
    %0 = vector.load %arg2[%c0, %c0_0, %c0_1] : memref<1x16x256xf32, #tpu.memory_space<vmem>>, vector<1x16x256xf32>
    %1 = vector.shape_cast %0 : vector<1x16x256xf32> to vector<16x256xf32>
    %c0_2 = arith.constant 0 : index
    %c0_3 = arith.constant 0 : index
    %2 = vector.load %arg3[%c0_2, %c0_3] : memref<1x256xf32, #tpu.memory_space<vmem>>, vector<1x256xf32>
    %3 = vector.shape_cast %2 : vector<1x256xf32> to vector<256xf32>
    %c0_4 = arith.constant 0 : index
    %c0_5 = arith.constant 0 : index
    %4 = vector.load %arg4[%c0_4, %c0_5] : memref<1x256xf32, #tpu.memory_space<vmem>>, vector<1x256xf32>
    %5 = vector.shape_cast %4 : vector<1x256xf32> to vector<256xf32>
    %cst = arith.constant dense<0.000000e+00> : vector<16xf32>
    %6 = vector.multi_reduction <add>, %1, %cst [1] : vector<16x256xf32> to vector<16xf32>
    %7 = vector.shape_cast %6 : vector<16xf32> to vector<16x1xf32>
    %cst_6 = arith.constant 2.560000e+02 : f32
    %8 = vector.broadcast %cst_6 : f32 to vector<16x1xf32>
    %9 = arith.divf %7, %8 : vector<16x1xf32>
    %10 = vector.broadcast %9 : vector<16x1xf32> to vector<16x256xf32>
    %11 = arith.subf %1, %10 : vector<16x256xf32>
    %12 = arith.mulf %11, %11 : vector<16x256xf32>
    %cst_7 = arith.constant dense<0.000000e+00> : vector<16xf32>
    %13 = vector.multi_reduction <add>, %12, %cst_7 [1] : vector<16x256xf32> to vector<16xf32>
    %14 = vector.shape_cast %13 : vector<16xf32> to vector<16x1xf32>
    %cst_8 = arith.constant 2.560000e+02 : f32
    %15 = vector.broadcast %cst_8 : f32 to vector<16x1xf32>
    %16 = arith.divf %14, %15 : vector<16x1xf32>
    %17 = vector.broadcast %9 : vector<16x1xf32> to vector<16x256xf32>
    %18 = arith.subf %1, %17 : vector<16x256xf32>
    %cst_9 = arith.constant 9.99999974E-6 : f32
    %19 = vector.broadcast %cst_9 : f32 to vector<16x1xf32>
    %20 = arith.addf %16, %19 : vector<16x1xf32>
    %21 = math.rsqrt %20 : vector<16x1xf32>
    %22 = vector.broadcast %21 : vector<16x1xf32> to vector<16x256xf32>
    %23 = arith.mulf %18, %22 : vector<16x256xf32>
    %24 = vector.shape_cast %3 : vector<256xf32> to vector<1x256xf32>
    %25 = vector.broadcast %24 : vector<1x256xf32> to vector<16x256xf32>
    %26 = arith.mulf %23, %25 : vector<16x256xf32>
    %27 = vector.shape_cast %5 : vector<256xf32> to vector<1x256xf32>
    %28 = vector.broadcast %27 : vector<1x256xf32> to vector<16x256xf32>
    %29 = arith.addf %26, %28 : vector<16x256xf32>
    %c0_10 = arith.constant 0 : index
    %c0_11 = arith.constant 0 : index
    %30 = vector.load %arg5[%c0_10, %c0_11] : memref<256x768xf32, #tpu.memory_space<vmem>>, vector<256x768xf32>
    %cst_12 = arith.constant dense<0.000000e+00> : vector<16x768xf32>
    %31 = tpu.matmul %29, %30, %cst_12 {dimension_numbers = #tpu.dot_dimension_numbers<[1], [0], [0], [1], [0, 0, 1, 1], [], []>} : vector<16x256xf32>, vector<256x768xf32>, vector<16x768xf32> -> vector<16x768xf32>
    %c16_i32 = arith.constant 16 : i32
    %32 = arith.muli %arg1, %c16_i32 : i32
    %33 = tpu.assume_multiple %32, 16 : i32
    %34 = vector.extract_strided_slice %31 {offsets = [0, 0], sizes = [16, 128], strides = [1, 1]} : vector<16x768xf32> to vector<16x128xf32>
    %c0_13 = arith.constant 0 : index
    %c0_14 = arith.constant 0 : index
    %c0_15 = arith.constant 0 : index
    %35 = vector.load %arg17[%c0_13, %c0_14, %c0_15] : memref<2x16x128xf32, #tpu.memory_space<vmem>>, vector<1x16x128xf32>
    %36 = vector.shape_cast %35 : vector<1x16x128xf32> to vector<16x128xf32>
    %37 = vector.shape_cast %34 : vector<16x128xf32> to vector<1x16x128xf32>
    tpu.vector_store %arg17[%c0_13, %c0_14, %c0_15], %37 {strides = array<i32>} : memref<2x16x128xf32, #tpu.memory_space<vmem>>, vector<1x16x128xf32>,
    %38 = vector.extract_strided_slice %31 {offsets = [0, 256], sizes = [16, 128], strides = [1, 1]} : vector<16x768xf32> to vector<16x128xf32>
    %c0_16 = arith.constant 0 : index
    %39 = arith.index_cast %33 : i32 to index
    %c0_17 = arith.constant 0 : index
    %40 = vector.load %arg15[%c0_16, %39, %c0_17] : memref<2x32x128xf32, #tpu.memory_space<vmem>>, vector<1x16x128xf32>
    %41 = vector.shape_cast %40 : vector<1x16x128xf32> to vector<16x128xf32>
    %42 = vector.shape_cast %38 : vector<16x128xf32> to vector<1x16x128xf32>
    tpu.vector_store %arg15[%c0_16, %39, %c0_17], %42 {strides = array<i32>} : memref<2x32x128xf32, #tpu.memory_space<vmem>>, vector<1x16x128xf32>,
    %43 = vector.extract_strided_slice %31 {offsets = [0, 512], sizes = [16, 128], strides = [1, 1]} : vector<16x768xf32> to vector<16x128xf32>
    %c0_18 = arith.constant 0 : index
    %44 = arith.index_cast %33 : i32 to index
    %c0_19 = arith.constant 0 : index
    %45 = vector.load %arg16[%c0_18, %44, %c0_19] : memref<2x32x128xf32, #tpu.memory_space<vmem>>, vector<1x16x128xf32>
    %46 = vector.shape_cast %45 : vector<1x16x128xf32> to vector<16x128xf32>
    %47 = vector.shape_cast %43 : vector<16x128xf32> to vector<1x16x128xf32>
    tpu.vector_store %arg16[%c0_18, %44, %c0_19], %47 {strides = array<i32>} : memref<2x32x128xf32, #tpu.memory_space<vmem>>, vector<1x16x128xf32>,
    %48 = vector.extract_strided_slice %31 {offsets = [0, 128], sizes = [16, 128], strides = [1, 1]} : vector<16x768xf32> to vector<16x128xf32>
    %c1 = arith.constant 1 : index
    %c0_20 = arith.constant 0 : index
    %c0_21 = arith.constant 0 : index
    %49 = vector.load %arg17[%c1, %c0_20, %c0_21] : memref<2x16x128xf32, #tpu.memory_space<vmem>>, vector<1x16x128xf32>
    %50 = vector.shape_cast %49 : vector<1x16x128xf32> to vector<16x128xf32>
    %51 = vector.shape_cast %48 : vector<16x128xf32> to vector<1x16x128xf32>
    tpu.vector_store %arg17[%c1, %c0_20, %c0_21], %51 {strides = array<i32>} : memref<2x16x128xf32, #tpu.memory_space<vmem>>, vector<1x16x128xf32>,
    %52 = vector.extract_strided_slice %31 {offsets = [0, 384], sizes = [16, 128], strides = [1, 1]} : vector<16x768xf32> to vector<16x128xf32>
    %c1_22 = arith.constant 1 : index
    %53 = arith.index_cast %33 : i32 to index
    %c0_23 = arith.constant 0 : index
    %54 = vector.load %arg15[%c1_22, %53, %c0_23] : memref<2x32x128xf32, #tpu.memory_space<vmem>>, vector<1x16x128xf32>
    %55 = vector.shape_cast %54 : vector<1x16x128xf32> to vector<16x128xf32>
    %56 = vector.shape_cast %52 : vector<16x128xf32> to vector<1x16x128xf32>
    tpu.vector_store %arg15[%c1_22, %53, %c0_23], %56 {strides = array<i32>} : memref<2x32x128xf32, #tpu.memory_space<vmem>>, vector<1x16x128xf32>,
    %57 = vector.extract_strided_slice %31 {offsets = [0, 640], sizes = [16, 128], strides = [1, 1]} : vector<16x768xf32> to vector<16x128xf32>
    %c1_24 = arith.constant 1 : index
    %58 = arith.index_cast %33 : i32 to index
    %c0_25 = arith.constant 0 : index
    %59 = vector.load %arg16[%c1_24, %58, %c0_25] : memref<2x32x128xf32, #tpu.memory_space<vmem>>, vector<1x16x128xf32>
    %60 = vector.shape_cast %59 : vector<1x16x128xf32> to vector<16x128xf32>
    %61 = vector.shape_cast %57 : vector<16x128xf32> to vector<1x16x128xf32>
    tpu.vector_store %arg16[%c1_24, %58, %c0_25], %61 {strides = array<i32>} : memref<2x32x128xf32, #tpu.memory_space<vmem>>, vector<1x16x128xf32>,
    %c0_26 = arith.constant 0 : index
    %c0_27 = arith.constant 0 : index
    %c0_28 = arith.constant 0 : index
    %62 = vector.load %arg17[%c0_26, %c0_27, %c0_28] : memref<2x16x128xf32, #tpu.memory_space<vmem>>, vector<2x16x128xf32>
    %cst_29 = arith.constant -1.000000e+30 : f32
    %63 = vector.broadcast %cst_29 : f32 to vector<2x16x1xf32>
    %cst_30 = arith.constant 0.000000e+00 : f32
    %64 = vector.broadcast %cst_30 : f32 to vector<2x16x1xf32>
    %cst_31 = arith.constant 0.000000e+00 : f32
    %65 = vector.broadcast %cst_31 : f32 to vector<2x16x128xf32>
    %c0_i32 = arith.constant 0 : i32
    %66 = arith.subi %arg1, %c0_i32 : i32
    %67 = arith.addi %c0_i32, %66 : i32
    %c1_i32 = arith.constant 1 : i32
    %68:3 = scf.for %arg19 = %c0_i32 to %67 step %c1_i32 iter_args(%arg20 = %63, %arg21 = %64, %arg22 = %65) -> (vector<2x16x1xf32>, vector<2x16x1xf32>, vector<2x16x128xf32>)  : i32 {
      %c16_i32_87 = arith.constant 16 : i32
      %197 = arith.muli %arg19, %c16_i32_87 : i32
      %198 = tpu.assume_multiple %197, 16 : i32
      %c0_88 = arith.constant 0 : index
      %199 = arith.index_cast %198 : i32 to index
      %c0_89 = arith.constant 0 : index
      %200 = vector.load %arg15[%c0_88, %199, %c0_89] : memref<2x32x128xf32, #tpu.memory_space<vmem>>, vector<2x16x128xf32>
      %c0_90 = arith.constant 0 : index
      %201 = arith.index_cast %198 : i32 to index
      %c0_91 = arith.constant 0 : index
      %202 = vector.load %arg16[%c0_90, %201, %c0_91] : memref<2x32x128xf32, #tpu.memory_space<vmem>>, vector<2x16x128xf32>
      "tpu.trace_start"() <{level = 10 : i32, message = "hqd,hkd->hqk"}> : () -> ()
      %cst_92 = arith.constant dense<0.000000e+00> : vector<2x16x16xf32>
      %203 = tpu.matmul %62, %200, %cst_92 {dimension_numbers = #tpu.dot_dimension_numbers<[2], [2], [1], [1], [0, 0, 0, 1, 1, 1], [0], [0]>} : vector<2x16x128xf32>, vector<2x16x128xf32>, vector<2x16x16xf32> -> vector<2x16x16xf32>
      "tpu.trace_stop"() : () -> ()
      %cst_93 = arith.constant dense<0xFF800000> : vector<2x16xf32>
      %204 = vector.multi_reduction <maximumf>, %203, %cst_93 [2] : vector<2x16x16xf32> to vector<2x16xf32>
      %205 = vector.shape_cast %204 : vector<2x16xf32> to vector<2x16x1xf32>
      %206 = arith.maximumf %arg20, %205 : vector<2x16x1xf32>
      %207 = arith.subf %arg20, %206 : vector<2x16x1xf32>
      %208 = math.exp %207 : vector<2x16x1xf32>
      %209 = vector.broadcast %206 : vector<2x16x1xf32> to vector<2x16x16xf32>
      %210 = arith.subf %203, %209 : vector<2x16x16xf32>
      %211 = math.exp %210 : vector<2x16x16xf32>
      %212 = arith.mulf %208, %arg21 : vector<2x16x1xf32>
      %cst_94 = arith.constant dense<0.000000e+00> : vector<2x16xf32>
      %213 = vector.multi_reduction <add>, %211, %cst_94 [2] : vector<2x16x16xf32> to vector<2x16xf32>
      %214 = vector.shape_cast %213 : vector<2x16xf32> to vector<2x16x1xf32>
      %215 = arith.addf %212, %214 : vector<2x16x1xf32>
      %216 = vector.broadcast %208 : vector<2x16x1xf32> to vector<2x16x128xf32>
      %217 = arith.mulf %216, %arg22 : vector<2x16x128xf32>
      "tpu.trace_start"() <{level = 10 : i32, message = "hqk,hkd->hqd"}> : () -> ()
      %cst_95 = arith.constant dense<0.000000e+00> : vector<2x16x128xf32>
      %218 = tpu.matmul %211, %202, %cst_95 {dimension_numbers = #tpu.dot_dimension_numbers<[2], [1], [1], [2], [0, 0, 0, 1, 1, 2], [0], [0]>} : vector<2x16x16xf32>, vector<2x16x128xf32>, vector<2x16x128xf32> -> vector<2x16x128xf32>
      "tpu.trace_stop"() : () -> ()
      %219 = arith.addf %217, %218 : vector<2x16x128xf32>
      scf.yield %206, %215, %219 : vector<2x16x1xf32>, vector<2x16x1xf32>, vector<2x16x128xf32>
    }
    %c16_i32_32 = arith.constant 16 : i32
    %69 = arith.muli %arg1, %c16_i32_32 : i32
    %70 = tpu.assume_multiple %69, 16 : i32
    %c0_33 = arith.constant 0 : index
    %71 = arith.index_cast %70 : i32 to index
    %c0_34 = arith.constant 0 : index
    %72 = vector.load %arg15[%c0_33, %71, %c0_34] : memref<2x32x128xf32, #tpu.memory_space<vmem>>, vector<2x16x128xf32>
    %c0_35 = arith.constant 0 : index
    %73 = arith.index_cast %70 : i32 to index
    %c0_36 = arith.constant 0 : index
    %74 = vector.load %arg16[%c0_35, %73, %c0_36] : memref<2x32x128xf32, #tpu.memory_space<vmem>>, vector<2x16x128xf32>
    "tpu.trace_start"() <{level = 10 : i32, message = "hqd,hkd->hqk"}> : () -> ()
    %cst_37 = arith.constant dense<0.000000e+00> : vector<2x16x16xf32>
    %75 = tpu.matmul %62, %72, %cst_37 {dimension_numbers = #tpu.dot_dimension_numbers<[2], [2], [1], [1], [0, 0, 0, 1, 1, 1], [0], [0]>} : vector<2x16x128xf32>, vector<2x16x128xf32>, vector<2x16x16xf32> -> vector<2x16x16xf32>
    "tpu.trace_stop"() : () -> ()
    %76 = tpu.iota {dimensions = array<i32: 1>} : vector<1x16x16xi32>
    %77 = tpu.iota {dimensions = array<i32: 2>} : vector<1x16x16xi32>
    %78 = arith.cmpi sge, %76, %77 : vector<1x16x16xi32>
    %cst_38 = arith.constant 0.000000e+00 : f32
    %cst_39 = arith.constant -1.000000e+30 : f32
    %79 = vector.broadcast %cst_38 : f32 to vector<1x16x16xf32>
    %80 = vector.broadcast %cst_39 : f32 to vector<1x16x16xf32>
    %81 = arith.select %78, %79, %80 : vector<1x16x16xi1>, vector<1x16x16xf32>
    %82 = vector.broadcast %81 : vector<1x16x16xf32> to vector<2x16x16xf32>
    %83 = arith.addf %75, %82 : vector<2x16x16xf32>
    %cst_40 = arith.constant dense<0xFF800000> : vector<2x16xf32>
    %84 = vector.multi_reduction <maximumf>, %83, %cst_40 [2] : vector<2x16x16xf32> to vector<2x16xf32>
    %85 = vector.shape_cast %84 : vector<2x16xf32> to vector<2x16x1xf32>
    %86 = arith.maximumf %68#0, %85 : vector<2x16x1xf32>
    %87 = arith.subf %68#0, %86 : vector<2x16x1xf32>
    %88 = math.exp %87 : vector<2x16x1xf32>
    %89 = vector.broadcast %86 : vector<2x16x1xf32> to vector<2x16x16xf32>
    %90 = arith.subf %83, %89 : vector<2x16x16xf32>
    %91 = math.exp %90 : vector<2x16x16xf32>
    %92 = arith.mulf %88, %68#1 : vector<2x16x1xf32>
    %cst_41 = arith.constant dense<0.000000e+00> : vector<2x16xf32>
    %93 = vector.multi_reduction <add>, %91, %cst_41 [2] : vector<2x16x16xf32> to vector<2x16xf32>
    %94 = vector.shape_cast %93 : vector<2x16xf32> to vector<2x16x1xf32>
    %95 = arith.addf %92, %94 : vector<2x16x1xf32>
    %96 = vector.broadcast %88 : vector<2x16x1xf32> to vector<2x16x128xf32>
    %97 = arith.mulf %96, %68#2 : vector<2x16x128xf32>
    "tpu.trace_start"() <{level = 10 : i32, message = "hqk,hkd->hqd"}> : () -> ()
    %cst_42 = arith.constant dense<0.000000e+00> : vector<2x16x128xf32>
    %98 = tpu.matmul %91, %74, %cst_42 {dimension_numbers = #tpu.dot_dimension_numbers<[2], [1], [1], [2], [0, 0, 0, 1, 1, 2], [0], [0]>} : vector<2x16x16xf32>, vector<2x16x128xf32>, vector<2x16x128xf32> -> vector<2x16x128xf32>
    "tpu.trace_stop"() : () -> ()
    %99 = arith.addf %97, %98 : vector<2x16x128xf32>
    %100 = vector.broadcast %95 : vector<2x16x1xf32> to vector<2x16x128xf32>
    %101 = arith.divf %99, %100 : vector<2x16x128xf32>
    %102 = vector.extract_strided_slice %101 {offsets = [0, 0, 0], sizes = [1, 16, 128], strides = [1, 1, 1]} : vector<2x16x128xf32> to vector<1x16x128xf32>
    %103 = vector.shape_cast %102 : vector<1x16x128xf32> to vector<16x128xf32>
    %c0_43 = arith.constant 0 : index
    %c0_44 = arith.constant 0 : index
    %104 = vector.load %arg18[%c0_43, %c0_44] : memref<16x256xf32, #tpu.memory_space<vmem>>, vector<16x128xf32>
    tpu.vector_store %arg18[%c0_43, %c0_44], %103 {strides = array<i32>} : memref<16x256xf32, #tpu.memory_space<vmem>>, vector<16x128xf32>,
    %105 = vector.extract_strided_slice %101 {offsets = [1, 0, 0], sizes = [1, 16, 128], strides = [1, 1, 1]} : vector<2x16x128xf32> to vector<1x16x128xf32>
    %106 = vector.shape_cast %105 : vector<1x16x128xf32> to vector<16x128xf32>
    %c0_45 = arith.constant 0 : index
    %c128 = arith.constant 128 : index
    %107 = vector.load %arg18[%c0_45, %c128] : memref<16x256xf32, #tpu.memory_space<vmem>>, vector<16x128xf32>
    tpu.vector_store %arg18[%c0_45, %c128], %106 {strides = array<i32>} : memref<16x256xf32, #tpu.memory_space<vmem>>, vector<16x128xf32>,
    %c0_46 = arith.constant 0 : index
    %c0_47 = arith.constant 0 : index
    %108 = vector.load %arg18[%c0_46, %c0_47] : memref<16x256xf32, #tpu.memory_space<vmem>>, vector<16x256xf32>
    %c0_48 = arith.constant 0 : index
    %c0_49 = arith.constant 0 : index
    %109 = vector.load %arg6[%c0_48, %c0_49] : memref<256x256xf32, #tpu.memory_space<vmem>>, vector<256x256xf32>
    %cst_50 = arith.constant dense<0.000000e+00> : vector<16x256xf32>
    %110 = tpu.matmul %108, %109, %cst_50 {dimension_numbers = #tpu.dot_dimension_numbers<[1], [0], [0], [1], [0, 0, 1, 1], [], []>} : vector<16x256xf32>, vector<256x256xf32>, vector<16x256xf32> -> vector<16x256xf32>
    %c0_51 = arith.constant 0 : index
    %c0_52 = arith.constant 0 : index
    %111 = vector.load %arg7[%c0_51, %c0_52] : memref<1x256xf32, #tpu.memory_space<vmem>>, vector<1x256xf32>
    %112 = vector.shape_cast %111 : vector<1x256xf32> to vector<256xf32>
    %113 = vector.shape_cast %112 : vector<256xf32> to vector<1x256xf32>
    %114 = vector.broadcast %113 : vector<1x256xf32> to vector<16x256xf32>
    %115 = arith.addf %110, %114 : vector<16x256xf32>
    %116 = arith.addf %1, %115 : vector<16x256xf32>
    %c0_53 = arith.constant 0 : index
    %c0_54 = arith.constant 0 : index
    %117 = vector.load %arg8[%c0_53, %c0_54] : memref<1x256xf32, #tpu.memory_space<vmem>>, vector<1x256xf32>
    %118 = vector.shape_cast %117 : vector<1x256xf32> to vector<256xf32>
    %c0_55 = arith.constant 0 : index
    %c0_56 = arith.constant 0 : index
    %119 = vector.load %arg9[%c0_55, %c0_56] : memref<1x256xf32, #tpu.memory_space<vmem>>, vector<1x256xf32>
    %120 = vector.shape_cast %119 : vector<1x256xf32> to vector<256xf32>
    %cst_57 = arith.constant dense<0.000000e+00> : vector<16xf32>
    %121 = vector.multi_reduction <add>, %116, %cst_57 [1] : vector<16x256xf32> to vector<16xf32>
    %122 = vector.shape_cast %121 : vector<16xf32> to vector<16x1xf32>
    %cst_58 = arith.constant 2.560000e+02 : f32
    %123 = vector.broadcast %cst_58 : f32 to vector<16x1xf32>
    %124 = arith.divf %122, %123 : vector<16x1xf32>
    %125 = vector.broadcast %124 : vector<16x1xf32> to vector<16x256xf32>
    %126 = arith.subf %116, %125 : vector<16x256xf32>
    %127 = arith.mulf %126, %126 : vector<16x256xf32>
    %cst_59 = arith.constant dense<0.000000e+00> : vector<16xf32>
    %128 = vector.multi_reduction <add>, %127, %cst_59 [1] : vector<16x256xf32> to vector<16xf32>
    %129 = vector.shape_cast %128 : vector<16xf32> to vector<16x1xf32>
    %cst_60 = arith.constant 2.560000e+02 : f32
    %130 = vector.broadcast %cst_60 : f32 to vector<16x1xf32>
    %131 = arith.divf %129, %130 : vector<16x1xf32>
    %132 = vector.broadcast %124 : vector<16x1xf32> to vector<16x256xf32>
    %133 = arith.subf %116, %132 : vector<16x256xf32>
    %cst_61 = arith.constant 9.99999974E-6 : f32
    %134 = vector.broadcast %cst_61 : f32 to vector<16x1xf32>
    %135 = arith.addf %131, %134 : vector<16x1xf32>
    %136 = math.rsqrt %135 : vector<16x1xf32>
    %137 = vector.broadcast %136 : vector<16x1xf32> to vector<16x256xf32>
    %138 = arith.mulf %133, %137 : vector<16x256xf32>
    %139 = vector.shape_cast %118 : vector<256xf32> to vector<1x256xf32>
    %140 = vector.broadcast %139 : vector<1x256xf32> to vector<16x256xf32>
    %141 = arith.mulf %138, %140 : vector<16x256xf32>
    %142 = vector.shape_cast %120 : vector<256xf32> to vector<1x256xf32>
    %143 = vector.broadcast %142 : vector<1x256xf32> to vector<16x256xf32>
    %144 = arith.addf %141, %143 : vector<16x256xf32>
    %cst_62 = arith.constant 0.000000e+00 : f32
    %145 = vector.broadcast %cst_62 : f32 to vector<16x256xf32>
    %c0_i32_63 = arith.constant 0 : i32
    %c256_i32 = arith.constant 256 : i32
    %146 = arith.muli %c0_i32_63, %c256_i32 : i32
    %147 = tpu.assume_multiple %146, 256 : i32
    %c0_64 = arith.constant 0 : index
    %148 = arith.index_cast %147 : i32 to index
    %149 = vector.load %arg10[%c0_64, %148] : memref<256x512xf32, #tpu.memory_space<vmem>>, vector<256x256xf32>
    %cst_65 = arith.constant dense<0.000000e+00> : vector<16x256xf32>
    %150 = tpu.matmul %144, %149, %cst_65 {dimension_numbers = #tpu.dot_dimension_numbers<[1], [0], [0], [1], [0, 0, 1, 1], [], []>} : vector<16x256xf32>, vector<256x256xf32>, vector<16x256xf32> -> vector<16x256xf32>
    %c0_66 = arith.constant 0 : index
    %151 = arith.index_cast %147 : i32 to index
    %152 = vector.load %arg11[%c0_66, %151] : memref<1x512xf32, #tpu.memory_space<vmem>>, vector<1x256xf32>
    %153 = vector.broadcast %152 : vector<1x256xf32> to vector<16x256xf32>
    %154 = arith.addf %150, %153 : vector<16x256xf32>
    %cst_67 = arith.constant 5.000000e-01 : f32
    %155 = vector.broadcast %cst_67 : f32 to vector<16x256xf32>
    %156 = arith.mulf %155, %154 : vector<16x256xf32>
    %cst_68 = arith.constant 0.707106769 : f32
    %157 = vector.broadcast %cst_68 : f32 to vector<16x256xf32>
    %158 = arith.mulf %154, %157 : vector<16x256xf32>
    %159 = math.erf %158 : vector<16x256xf32>
    %cst_69 = arith.constant 1.000000e+00 : f32
    %160 = vector.broadcast %cst_69 : f32 to vector<16x256xf32>
    %161 = arith.addf %160, %159 : vector<16x256xf32>
    %162 = arith.mulf %156, %161 : vector<16x256xf32>
    %163 = arith.index_cast %147 : i32 to index
    %c0_70 = arith.constant 0 : index
    %164 = vector.load %arg12[%163, %c0_70] : memref<512x256xf32, #tpu.memory_space<vmem>>, vector<256x256xf32>
    %cst_71 = arith.constant dense<0.000000e+00> : vector<16x256xf32>
    %165 = tpu.matmul %162, %164, %cst_71 {dimension_numbers = #tpu.dot_dimension_numbers<[1], [0], [0], [1], [0, 0, 1, 1], [], []>} : vector<16x256xf32>, vector<256x256xf32>, vector<16x256xf32> -> vector<16x256xf32>
    %166 = arith.addf %145, %165 : vector<16x256xf32>
    %c1_i32_72 = arith.constant 1 : i32
    %c256_i32_73 = arith.constant 256 : i32
    %167 = arith.muli %c1_i32_72, %c256_i32_73 : i32
    %168 = tpu.assume_multiple %167, 256 : i32
    %c0_74 = arith.constant 0 : index
    %169 = arith.index_cast %168 : i32 to index
    %170 = vector.load %arg10[%c0_74, %169] : memref<256x512xf32, #tpu.memory_space<vmem>>, vector<256x256xf32>
    %cst_75 = arith.constant dense<0.000000e+00> : vector<16x256xf32>
    %171 = tpu.matmul %144, %170, %cst_75 {dimension_numbers = #tpu.dot_dimension_numbers<[1], [0], [0], [1], [0, 0, 1, 1], [], []>} : vector<16x256xf32>, vector<256x256xf32>, vector<16x256xf32> -> vector<16x256xf32>
    %c0_76 = arith.constant 0 : index
    %172 = arith.index_cast %168 : i32 to index
    %173 = vector.load %arg11[%c0_76, %172] : memref<1x512xf32, #tpu.memory_space<vmem>>, vector<1x256xf32>
    %174 = vector.broadcast %173 : vector<1x256xf32> to vector<16x256xf32>
    %175 = arith.addf %171, %174 : vector<16x256xf32>
    %cst_77 = arith.constant 5.000000e-01 : f32
    %176 = vector.broadcast %cst_77 : f32 to vector<16x256xf32>
    %177 = arith.mulf %176, %175 : vector<16x256xf32>
    %cst_78 = arith.constant 0.707106769 : f32
    %178 = vector.broadcast %cst_78 : f32 to vector<16x256xf32>
    %179 = arith.mulf %175, %178 : vector<16x256xf32>
    %180 = math.erf %179 : vector<16x256xf32>
    %cst_79 = arith.constant 1.000000e+00 : f32
    %181 = vector.broadcast %cst_79 : f32 to vector<16x256xf32>
    %182 = arith.addf %181, %180 : vector<16x256xf32>
    %183 = arith.mulf %177, %182 : vector<16x256xf32>
    %184 = arith.index_cast %168 : i32 to index
    %c0_80 = arith.constant 0 : index
    %185 = vector.load %arg12[%184, %c0_80] : memref<512x256xf32, #tpu.memory_space<vmem>>, vector<256x256xf32>
    %cst_81 = arith.constant dense<0.000000e+00> : vector<16x256xf32>
    %186 = tpu.matmul %183, %185, %cst_81 {dimension_numbers = #tpu.dot_dimension_numbers<[1], [0], [0], [1], [0, 0, 1, 1], [], []>} : vector<16x256xf32>, vector<256x256xf32>, vector<16x256xf32> -> vector<16x256xf32>
    %187 = arith.addf %166, %186 : vector<16x256xf32>
    %c2_i32 = arith.constant 2 : i32
    %c0_82 = arith.constant 0 : index
    %c0_83 = arith.constant 0 : index
    %188 = vector.load %arg13[%c0_82, %c0_83] : memref<1x256xf32, #tpu.memory_space<vmem>>, vector<1x256xf32>
    %189 = vector.shape_cast %188 : vector<1x256xf32> to vector<256xf32>
    %190 = vector.shape_cast %189 : vector<256xf32> to vector<1x256xf32>
    %191 = vector.broadcast %190 : vector<1x256xf32> to vector<16x256xf32>
    %192 = arith.addf %187, %191 : vector<16x256xf32>
    %193 = arith.addf %116, %192 : vector<16x256xf32>
    %c0_84 = arith.constant 0 : index
    %c0_85 = arith.constant 0 : index
    %c0_86 = arith.constant 0 : index
    %194 = vector.load %arg14[%c0_84, %c0_85, %c0_86] : memref<1x16x256xf32, #tpu.memory_space<vmem>>, vector<1x16x256xf32>
    %195 = vector.shape_cast %194 : vector<1x16x256xf32> to vector<16x256xf32>
    %196 = vector.shape_cast %193 : vector<16x256xf32> to vector<1x16x256xf32>
    tpu.vector_store %arg14[%c0_84, %c0_85, %c0_86], %196 {strides = array<i32>} : memref<1x16x256xf32, #tpu.memory_space<vmem>>, vector<1x16x256xf32>,
    return
  }
  func.func @transform_0(%arg0: i32, %arg1: i32) -> (i32, i32, i32) {
    %c0_i32 = arith.constant 0 : i32
    %c0_i32_0 = arith.constant 0 : i32
    return %arg0, %arg1, %c0_i32 : i32, i32, i32
  }
  func.func @transform_1(%arg0: i32, %arg1: i32) -> (i32, i32) {
    %c0_i32 = arith.constant 0 : i32
    %c0_i32_0 = arith.constant 0 : i32
    %c0_i32_1 = arith.constant 0 : i32
    return %c0_i32, %c0_i32_0 : i32, i32
  }
  func.func @transform_2(%arg0: i32, %arg1: i32) -> (i32, i32) {
    %c0_i32 = arith.constant 0 : i32
    %c0_i32_0 = arith.constant 0 : i32
    %c0_i32_1 = arith.constant 0 : i32
    return %c0_i32, %c0_i32_0 : i32, i32
  }
  func.func @transform_3(%arg0: i32, %arg1: i32) -> (i32, i32) {
    %c0_i32 = arith.constant 0 : i32
    %c0_i32_0 = arith.constant 0 : i32
    %c0_i32_1 = arith.constant 0 : i32
    return %c0_i32, %c0_i32_0 : i32, i32
  }
  func.func @transform_4(%arg0: i32, %arg1: i32) -> (i32, i32) {
    %c0_i32 = arith.constant 0 : i32
    %c0_i32_0 = arith.constant 0 : i32
    %c0_i32_1 = arith.constant 0 : i32
    return %c0_i32, %c0_i32_0 : i32, i32
  }
  func.func @transform_5(%arg0: i32, %arg1: i32) -> (i32, i32) {
    %c0_i32 = arith.constant 0 : i32
    %c0_i32_0 = arith.constant 0 : i32
    %c0_i32_1 = arith.constant 0 : i32
    return %c0_i32, %c0_i32_0 : i32, i32
  }
  func.func @transform_6(%arg0: i32, %arg1: i32) -> (i32, i32) {
    %c0_i32 = arith.constant 0 : i32
    %c0_i32_0 = arith.constant 0 : i32
    %c0_i32_1 = arith.constant 0 : i32
    return %c0_i32, %c0_i32_0 : i32, i32
  }
  func.func @transform_7(%arg0: i32, %arg1: i32) -> (i32, i32) {
    %c0_i32 = arith.constant 0 : i32
    %c0_i32_0 = arith.constant 0 : i32
    %c0_i32_1 = arith.constant 0 : i32
    return %c0_i32, %c0_i32_0 : i32, i32
  }
  func.func @transform_8(%arg0: i32, %arg1: i32) -> (i32, i32) {
    %c0_i32 = arith.constant 0 : i32
    %c0_i32_0 = arith.constant 0 : i32
    %c0_i32_1 = arith.constant 0 : i32
    return %c0_i32, %c0_i32_0 : i32, i32
  }
  func.func @transform_9(%arg0: i32, %arg1: i32) -> (i32, i32) {
    %c0_i32 = arith.constant 0 : i32
    %c0_i32_0 = arith.constant 0 : i32
    %c0_i32_1 = arith.constant 0 : i32
    return %c0_i32, %c0_i32_0 : i32, i32
  }
  func.func @transform_10(%arg0: i32, %arg1: i32) -> (i32, i32) {
    %c0_i32 = arith.constant 0 : i32
    %c0_i32_0 = arith.constant 0 : i32
    %c0_i32_1 = arith.constant 0 : i32
    return %c0_i32, %c0_i32_0 : i32, i32
  }
  func.func @transform_11(%arg0: i32, %arg1: i32) -> (i32, i32) {
    %c0_i32 = arith.constant 0 : i32
    %c0_i32_0 = arith.constant 0 : i32
    %c0_i32_1 = arith.constant 0 : i32
    return %c0_i32, %c0_i32_0 : i32, i32
  }
  func.func @transform_12(%arg0: i32, %arg1: i32) -> (i32, i32, i32) {
    %c0_i32 = arith.constant 0 : i32
    %c0_i32_0 = arith.constant 0 : i32
    return %arg0, %arg1, %c0_i32 : i32, i32, i32
  }
}

</mosaic_0001>

<bundles_post_ra>
// kernel: tpu_custom_call.1
= control target key start
LH: loop header
LB: loop body
LE: loop exit
PB: predicated region body
PF: predicated region fallthrough
CT: control target
= control target key end

     0   :  { %s5468_s0 = inlined_call_operand.hbm [shape: f32[2,32,256], index: 0, kind: input, shape index: {}]   ;;  %s5469_s1 = inlined_call_operand.vmem [shape: f32[1,256], index: 1, kind: input, shape index: {}]   ;;  %s5470_s2 = inlined_call_operand.hbm [shape: f32[1,256], index: 2, kind: input, shape index: {}]   ;;  %s5471_s3 = inlined_call_operand.hbm [shape: f32[256,768], index: 3, kind: input, shape index: {}]   ;;  %s5472_s4 = inlined_call_operand.hbm [shape: f32[256,256], index: 4, kind: input, shape index: {}]   ;;  %s5473_s5 = inlined_call_operand.vmem [shape: f32[1,256], index: 5, kind: input, shape index: {}]   ;;  %s5474_s6 = inlined_call_operand.vmem [shape: f32[1,256], index: 6, kind: input, shape index: {}]   ;;  %s5475_s7 = inlined_call_operand.vmem [shape: f32[1,256], index: 7, kind: input, shape index: {}]   ;;  %s5476_s8 = inlined_call_operand.hbm [shape: f32[256,512], index: 8, kind: input, shape index: {}]   ;;  %s5477_s9 = inlined_call_operand.vmem [shape: f32[1,512], index: 9, kind: input, shape index: {}]   ;;  %s5478_s10 = inlined_call_operand.hbm [shape: f32[512,256], index: 10, kind: input, shape index: {}]   ;;  %s5479_s11 = inlined_call_operand.vmem [shape: f32[1,256], index: 11, kind: input, shape index: {}]   ;;  %s5480_s12 = inlined_call_operand.hbm [shape: f32[2,32,256], index: 12, kind: output, shape index: {}]  }
   0x1   :  { %5495 = sst [smem:[#allocation27_spill]] %s5470_s2 }
   0x2   :  { %5496 = sst [smem:[#allocation28_spill]] %s5471_s3 }
   0x3   :  { %5497 = sst [smem:[#allocation29_spill]] %s5472_s4 }
   0x4   :  { %5498 = sst [smem:[#allocation30_spill]] %s5474_s6 }
   0x5   :  { %5499 = sst [smem:[#allocation31_spill]] %s5475_s7 }
   0x6   :  { %5500 = sst [smem:[#allocation32_spill]] %s5476_s8 }
   0x7   :  { %5501 = sst [smem:[#allocation33_spill]] %s5477_s9 }
   0x8   :  { %5502 = sst [smem:[#allocation34_spill]] %s5478_s10 }
   0x9   :  { %5503 = sst [smem:[#allocation35_spill]] %s5479_s11 }
   0xa   :  { %5504 = sst [smem:[#allocation36_spill]] %s5480_s12 }
   0xb   :  { %17 = vsyncpa [#allocation7], 0 }
   0xc   :  { %19 = vsyncpa [#allocation7 + $0x1], 0 }
   0xd   :  { %20 = vsyncpa [#allocation10], 0 }
   0xe   :  { %21 = vsyncpa [#allocation13], 0 }
   0xf   :  { %22 = vsyncpa [#allocation16], 0 }
  0x10   :  { %23 = vsyncpa [#allocation8], 0 }
  0x11   :  { %25 = vsyncpa [#allocation8 + $0x1], 0  ;;  %s4637_s21 = smov 0   ;;  %s4639_s22 = smov 0  }
  0x12   :  { %s4641_s23 = smov 0   ;;  %s4643_s24 = smov 0  }
  0x13   :  { %s4645_s25 = smov 0   ;;  %s4647_s26 = smov 0  }
  0x14   :  { %s4649_s27 = smov 0   ;;  %s4651_s28 = smov 0  }
  0x15 LB: > { %5505 = sst [smem:[#allocation23_spill]] %s4426_s21  ;;  %s5481_s29 = sadd.s32 4294967295, %s4454_s28   ;;  %s4454_s28 = sphi %s4651_s28, %s31_s28   ;;  %s4450_s27 = sphi %s4649_s27, %s5571_s27   ;;  %s4446_s26 = sphi %s4647_s26, %s5570_s26   ;;  %s4442_s25 = sphi %s4645_s25, %s5569_s25   ;;  %s4438_s24 = sphi %s4643_s24, %s5568_s24   ;;  %s4434_s23 = sphi %s4641_s23, %s5567_s23   ;;  %s4430_s22 = sphi %s4639_s22, %s5566_s22   ;;  %s4426_s21 = sphi %s4637_s21, %s5565_s21  }
  0x16   : > { %5506 = sst [smem:[#allocation24_spill]] %s4442_s25  ;;  %p2957_p0 = scmp.ge.s32.totalorder %s4454_s28, 1 }
  0x17   : > { %p4681_p1 = scmp.eq.s32.totalorder %s5481_s29, 0  ;;  %p335_p2 = scmp.lt.s32.totalorder %s4454_s28, 5 }
  0x18   : > { %s4556_s14 = smov [#allocation9]   ;;  %s4557_s16 = smov [#allocation12]  }
  0x19   : > { %s5507_s30 = scalar_select %p4681_p1, 1, 0 }
  0x1a   : > { %p4686_p3 = pnand %p2957_p0, %p335_p2  ;;  %s351_s15 = sshll.u32 %s4556_s14, 4  ;;  %s352_s15 = int_to_ptr.vmem [resolvable:$true] %s351_s15 }
  0x1b   : > { %s374_s17 = sshll.u32 %s4557_s16, 4  ;;  %s4558_s19 = smov [#allocation11]   ;;  %s4698_s17 = int_to_ptr.vmem [resolvable:$true] %s374_s17 }
  0x1c   : > { %s5508_s13 = scalar_select %p4686_p3, 1, 0 }
  0x1d   : > { %p3696_p4 = pneg %p4686_p3  ;;  %s4700_s20 = sshll.u32 %s4558_s19, 4  ;;  %s362_s20 = int_to_ptr.vmem [resolvable:$true] %s4700_s20 }
  0x1e   : > { %s5510_s2 = sld [smem:[#allocation27_spill]] }
  0x1f   : > { %p4694_p5 = pnand %p3696_p4, %p4681_p1 }
  0x21   : > { %p4710_p7 = pneg %p4694_p5 }
  0x24   : > { %s4074_s14 = scalar_lea.hbm %s5510_s2, 32 }
  0x25   : > { %p4075_p6 = scmp.ne.s32.totalorder %s5510_s2, %s4074_s14  ;;  %p4081_p10 = scmp.lt.u32.totalorder %s4074_s14, %s5510_s2 }
  0x27   : > { %p4077_p8 = pnand %p4710_p7, %p4075_p6 }
  0x29   : > { %p4078_p9 = pneg %p4077_p8 }
  0x2b   : > { %p4083_p11 = pnand %p4081_p10, %p4078_p9 }
  0x2d   : > { %4086 = shalt.err (!%p4083_p11)
}
  0x2e   : > { %s4087_s12 = scalar_lea.vmem %s352_s15, 32  ;;  %p4095_p2 = scmp.lt.s32.totalorder %s352_s15, %s352_s15 }
  0x2f   : > { %p4088_p12 = scmp.ne.s32.totalorder %s352_s15, %s4087_s12  ;;  %p4096_p4 = scmp.lt.s32.totalorder %s4087_s12, %s4087_s12 }
  0x31   : > { %p4090_p13 = pnand %p4088_p12, %p4710_p7  ;;  %p4097_p3 = por %p4096_p4, %p4095_p2 }
  0x33   : > { %p4091_p0 = pneg %p4090_p13 }
  0x35   : > { %p4098_p1 = pnand %p4097_p3, %p4091_p0 }
  0x37   : > { %4101 = shalt.err (!%p4098_p1)
}
  0x38   : > { %3699 = dma.hbm_to_vmem [thread:$0]  (!%p4694_p5), %s5510_s2, 32, %s352_s15, [#allocation10]  }
  0x39   : > { %s5512_s4 = sld [smem:[#allocation29_spill]] }
  0x3f   : > { %s4102_s14 = scalar_lea.hbm %s5512_s4, 8192 }
  0x40   : > { %p4103_p6 = scmp.ne.s32.totalorder %s5512_s4, %s4102_s14  ;;  %p4109_p1 = scmp.lt.u32.totalorder %s4102_s14, %s5512_s4 }
  0x42   : > { %p4105_p8 = pnand %p4103_p6, %p4710_p7 }
  0x44   : > { %p4106_p9 = pneg %p4105_p8 }
  0x46   : > { %p4111_p3 = pnand %p4109_p1, %p4106_p9 }
  0x48   : > { %4114 = shalt.err (!%p4111_p3)
}
  0x49   : > { %s4115_s15 = scalar_lea.vmem %s4698_s17, 8192  ;;  %p4123_p13 = scmp.lt.s32.totalorder %s4698_s17, %s4698_s17 }
  0x4a   : > { %p4116_p10 = scmp.ne.s32.totalorder %s4698_s17, %s4115_s15  ;;  %p4124_p0 = scmp.lt.s32.totalorder %s4115_s15, %s4115_s15 }
  0x4c   : > { %p4118_p11 = pnand %p4116_p10, %p4710_p7  ;;  %p4125_p2 = por %p4124_p0, %p4123_p13 }
  0x4e   : > { %p4119_p12 = pneg %p4118_p11 }
  0x50   : > { %p4126_p4 = pnand %p4125_p2, %p4119_p12 }
  0x52   : > { %4129 = shalt.err (!%p4126_p4)
}
  0x53   : > { %s5487_s7 = smov 256   ;;  %s5489_s6 = smov 16  }
  0x54   : > { %3705 = dma.hbm_to_vmem [thread:$0]  (!%p4694_p5), %s5512_s4, 8192, %s4698_s17, [#allocation13], %s5487_s7, %s5487_s7, %s5489_s6  }
  0x55   : > { %s5513_s3 = sld [smem:[#allocation28_spill]] }
  0x5b   : > { %s4130_s14 = scalar_lea.hbm %s5513_s3, 24576 }
  0x5c   : > { %p4131_p6 = scmp.ne.s32.totalorder %s5513_s3, %s4130_s14  ;;  %p4137_p1 = scmp.lt.u32.totalorder %s4130_s14, %s5513_s3 }
  0x5e   : > { %p4133_p8 = pnand %p4131_p6, %p4710_p7 }
  0x60   : > { %p4134_p9 = pneg %p4133_p8 }
  0x62   : > { %p4139_p3 = pnand %p4137_p1, %p4134_p9 }
  0x64   : > { %4142 = shalt.err (!%p4139_p3)
}
  0x65   : > { %s4143_s11 = scalar_lea.vmem %s362_s20, 24576  ;;  %p4151_p13 = scmp.lt.s32.totalorder %s362_s20, %s362_s20 }
  0x66   : > { %p4144_p10 = scmp.ne.s32.totalorder %s362_s20, %s4143_s11  ;;  %p4152_p0 = scmp.lt.s32.totalorder %s4143_s11, %s4143_s11 }
  0x68   : > { %p4146_p11 = pnand %p4144_p10, %p4710_p7  ;;  %p4153_p2 = por %p4152_p0, %p4151_p13 }
  0x6a   : > { %p4147_p12 = pneg %p4146_p11 }
  0x6c   : > { %p4154_p4 = pnand %p4153_p2, %p4147_p12 }
  0x6e   : > { %4157 = shalt.err (!%p4154_p4)
}
  0x6f   : > { %s4561_s17 = smov 768   ;;  %s4562_s25 = smov 48  }
  0x70   : > { %3702 = dma.hbm_to_vmem [thread:$0]  (!%p4694_p5), %s5513_s3, 24576, %s362_s20, [#allocation10], %s4561_s17, %s4561_s17, %s4562_s25  }
  0x71   : > { %s4563_s29 = smov [#allocation14]   ;;  %s5514_s8 = sld [smem:[#allocation32_spill]] }
  0x72   : > { %s396_s14 = sshll.u32 %s4563_s29, 4  ;;  %s397_s14 = int_to_ptr.vmem [resolvable:$true] %s396_s14 }
  0x77   : > { %s4158_s15 = scalar_lea.hbm %s5514_s8, 16384 }
  0x78   : > { %p4159_p6 = scmp.ne.s32.totalorder %s5514_s8, %s4158_s15  ;;  %p4165_p1 = scmp.lt.u32.totalorder %s4158_s15, %s5514_s8 }
  0x7a   : > { %p4161_p8 = pnand %p4159_p6, %p4710_p7 }
  0x7c   : > { %p4162_p9 = pneg %p4161_p8 }
  0x7e   : > { %p4167_p3 = pnand %p4165_p1, %p4162_p9 }
  0x80   : > { %4170 = shalt.err (!%p4167_p3)
}
  0x81   : > { %s4171_s20 = scalar_lea.vmem %s397_s14, 16384  ;;  %p4179_p13 = scmp.lt.s32.totalorder %s397_s14, %s397_s14 }
  0x82   : > { %p4172_p10 = scmp.ne.s32.totalorder %s397_s14, %s4171_s20  ;;  %p4180_p0 = scmp.lt.s32.totalorder %s4171_s20, %s4171_s20 }
  0x84   : > { %p4174_p11 = pnand %p4172_p10, %p4710_p7  ;;  %p4181_p2 = por %p4180_p0, %p4179_p13 }
  0x86   : > { %p4175_p12 = pneg %p4174_p11 }
  0x88   : > { %p4182_p4 = pnand %p4181_p2, %p4175_p12 }
  0x8a   : > { %4185 = shalt.err (!%p4182_p4)
}
  0x8b   : > { %s4564_s7 = smov 512   ;;  %s4565_s17 = smov 32  }
  0x8c   : > { %3708 = dma.hbm_to_vmem [thread:$0]  (!%p4694_p5), %s5514_s8, 16384, %s397_s14, [#allocation13], %s4564_s7, %s4564_s7, %s4565_s17  }
  0x8d   : > { %s4566_s25 = smov [#allocation15]   ;;  %s5515_s10 = sld [smem:[#allocation34_spill]] }
  0x8e   : > { %s412_s2 = sshll.u32 %s4566_s25, 4  ;;  %s413_s2 = int_to_ptr.vmem [resolvable:$true] %s412_s2 }
  0x93   : > { %s4186_s19 = scalar_lea.hbm %s5515_s10, 16384 }
  0x94   : > { %p4187_p6 = scmp.ne.s32.totalorder %s5515_s10, %s4186_s19  ;;  %p4193_p1 = scmp.lt.u32.totalorder %s4186_s19, %s5515_s10 }
  0x96   : > { %p4189_p8 = pnand %p4187_p6, %p4710_p7 }
  0x98   : > { %p4190_p9 = pneg %p4189_p8 }
  0x9a   : > { %p4195_p3 = pnand %p4193_p1, %p4190_p9 }
  0x9c   : > { %4198 = shalt.err (!%p4195_p3)
}
  0x9d   : > { %s4199_s14 = scalar_lea.vmem %s413_s2, 16384  ;;  %p4207_p13 = scmp.lt.s32.totalorder %s413_s2, %s413_s2 }
  0x9e   : > { %p4200_p10 = scmp.ne.s32.totalorder %s413_s2, %s4199_s14  ;;  %p4208_p0 = scmp.lt.s32.totalorder %s4199_s14, %s4199_s14 }
  0xa0   : > { %p4202_p11 = pnand %p4200_p10, %p4710_p7  ;;  %p4209_p2 = por %p4208_p0, %p4207_p13 }
  0xa2   : > { %p4203_p12 = pneg %p4202_p11 }
  0xa4   : > { %p4210_p4 = pnand %p4209_p2, %p4203_p12 }
  0xa6   : > { %4213 = shalt.err (!%p4210_p4)
}
  0xa7   : > { %s5516_s7 = smov 16   ;;  %s5517_s17 = smov 256  }
  0xa8   : > { %3711 = dma.hbm_to_vmem [thread:$0]  (!%p4694_p5), %s5515_s10, 16384, %s413_s2, [#allocation16], %s5517_s17, %s5517_s17, %s5516_s7  }
  0xa9   : > { %s2956_s18 = sadd.s32 4294967294, %s4454_s28   ;;  %s40_s16 = sadd.s32 1, %s4446_s26 }
  0xaa   : > { %s43_s25 = sadd.s32 1, %s4450_s27  ;;  %p41_p7 = scmp.ge.s32.totalorder %s40_s16, 2 }
  0xab   : > { %s52_s9 = sadd.s32 1, %s4434_s23  ;;  %p59_p6 = scmp.ne.s32.totalorder %s4434_s23, %s4430_s22 }
  0xac   : > { %p60_p8 = scmp.eq.s32.totalorder %s4454_s28, 0  ;;  %s5573_s16 = smov (%p41_p7, %s40_s16), 0 }
  0xad   : > { %5518 = sst [smem:[#allocation25_spill]] %s5573_s16  ;;  %s5575_s25 = smov (!%p41_p7, %s43_s25), %s4450_s27 }
  0xae   : > { %s48_s29 = ssub.s32 %s4446_s26, %s5573_s16  ;;  %p4822_p9 = por %p60_p8, %p59_p6 }
  0xaf   : > { %p45_p5 = scmp.ge.s32.totalorder %s5575_s25, 2  ;;  %p65_p1 = scmp.ne.s32.totalorder %s4430_s22, %s4426_s21 }
  0xb0   : > { %s5520_s2 = sadd.s32 4294967295, %s4454_s28   ;;  %p328_p10 = scmp.eq.s32.totalorder %s2956_s18, 3 }
  0xb1   : > { %p322_p3 = scmp.eq.s32.totalorder %s5520_s2, 3  ;;  %s5577_s25 = smov (%p45_p5, %s5575_s25), 0 }
  0xb2   : > { %5521 = sst [smem:[#allocation26_spill]] %s5577_s25  ;;  %p5522_p11 = scmp.ne.s32.totalorder %s5507_s30, 0 }
  0xb3   : > { %p4838_p13 = por %p322_p3, %p59_p6  ;;  %s47_s11 = ssub.s32 %s4450_s27, %s5577_s25 }
  0xb4   : > { %p4834_p12 = por %p5522_p11, %p65_p1  ;;  %p4844_p0 = por %p328_p10, %p65_p1 }
  0xb5   : > { %s5524_s15 = scalar_select %p4838_p13, 1, 0 }
  0xb6   : > { %s5525_s20 = scalar_select %p4844_p0, 1, 0 }
  0xb7   : > { %s49_s14 = sor.u32 %s48_s29, %s47_s11  ;;  %p3725_p2 = scmp.lt.s32.totalorder %s4454_s28, 4 }
  0xb8   : > { %p50_p4 = scmp.eq.s32.totalorder %s49_s14, 0  ;;  %s429_s4 = sand.u32 1, %s4434_s23  }
  0xb9   : > { %s2964_s6 = sshll.u32 %s429_s4, 5  ;;  %s3002_s2 = sshll.u32 %s4446_s26, 2 }
  0xba   : > { %s4851_s18 = scalar_select %p50_p4, %s4434_s23, %s52_s9  }
  0xbb   : > { %s2967_s3 = sshll.u32 %s4450_s27, 3  ;;  %s433_s8 = scalar_lea.vmem [#allocation6], %s2964_s6 }
  0xbc   : > { %s443_s10 = sshll.u32 %s433_s8, 4  ;;  %s440_s16 = sadd.s32 %s3002_s2, %s2967_s3  ;;  %s4855_s10 = int_to_ptr.vmem [resolvable:$true] %s443_s10 }
  0xbd   : > { %s2968_s21 = sshll.u32 %s440_s16, 7  ;;  %p4859_p7 = pnand %p3725_p2, %p4822_p9 }
  0xbe   : > { %s4866_s9 = scalar_lea.hbm %s5468_s0, %s2968_s21  ;;  %s4868_s3 = scalar_lea.sflag [#allocation7], %s429_s4 }
  0xbf   : > { %s4214_s8 = scalar_lea.hbm %s4866_s9, 512  ;;  %p4216_p8 = pneg %p4859_p7 }
  0xc0   : > { %p4215_p6 = scmp.ne.s32.totalorder %s4866_s9, %s4214_s8  ;;  %s4219_s14 = scalar_lea.hbm %s5468_s0, 2048 }
  0xc1   : > { %p4220_p1 = scmp.lt.u32.totalorder %s4866_s9, %s5468_s0  ;;  %p4221_p3 = scmp.lt.u32.totalorder %s4219_s14, %s4214_s8 }
  0xc2   : > { %p4217_p9 = pnand %p4216_p8, %p4215_p6  ;;  %p4223_p11 = scmp.lt.u32.totalorder %s4214_s8, %s4866_s9 }
  0xc3   : > { %p4222_p10 = por %p4221_p3, %p4220_p1 }
  0xc4   : > { %p4218_p5 = pneg %p4217_p9 }
  0xc5   : > { %p4224_p2 = por %p4223_p11, %p4222_p10 }
  0xc7   : > { %p4225_p4 = pnand %p4224_p2, %p4218_p5 }
  0xc9   : > { %4228 = shalt.err (!%p4225_p4)
}
  0xca   : > { %s4229_s4 = scalar_lea.vmem %s4855_s10, 512  ;;  %s4567_s2 = smov [#allocation6]  }
  0xcb   : > { %p4230_p6 = scmp.ne.s32.totalorder %s4855_s10, %s4229_s4  ;;  %s4234_s29 = sshll.u32 %s4567_s2, 4  ;;  %s4235_s29 = int_to_ptr.vmem [resolvable:$false] %s4234_s29 }
  0xcc   : > { %s4236_s11 = scalar_lea.vmem %s4235_s29, 1024  ;;  %p4237_p13 = scmp.lt.s32.totalorder %s4855_s10, %s4235_s29 }
  0xcd   : > { %p4232_p9 = pnand %p4230_p6, %p4216_p8  ;;  %p4238_p1 = scmp.lt.s32.totalorder %s4236_s11, %s4229_s4 }
  0xcf   : > { %p4233_p0 = pneg %p4232_p9  ;;  %p4239_p3 = por %p4238_p1, %p4237_p13 }
  0xd1   : > { %p4240_p10 = pnand %p4239_p3, %p4233_p0 }
  0xd3   : > { %4243 = shalt.err (!%p4240_p10)
}
  0xd4   : > { %3715 = dma.hbm_to_vmem [thread:$0]  (!%p4859_p7), %s4866_s9, 512, %s4855_s10, %s4868_s3, %s5517_s17, %s5517_s17, %s5516_s7  }
  0xd5   : > { %p5527_p8 = scmp.ne.s32.totalorder %s5508_s13, 0 }
  0xd6   : > { %s4902_s8 = sand.u32 (!%p5527_p8), 1, %s4430_s22  }
  0xd7   : > { %455 = sbr.rel (%p5527_p8) target bundleno = 3115 (0xc2b), region = 68  ;;  %s2970_s16 = sshll.u32 (!%p5527_p8), %s4902_s8, 5 }
  0xd8   : > { %s458_s19 = scalar_lea.sflag (!%p5527_p8), [#allocation7], %s4902_s8  ;;  %s461_s25 = scalar_lea.vmem (!%p5527_p8), [#allocation6], %s2970_s16 }
  0xde   : > { %4405 = dma.done.wait (%p4834_p12), %s458_s19, 512  }
  0xdf   : > { %4407 = vsyncadd (%p4834_p12), %s458_s19, 4294966784  ;;  %p5528_p13 = scmp.ne.s32.totalorder %s5507_s30, 0 }
  0xe1   : > { %4409 = dma.done.wait (%p5528_p13), [#allocation10], 24608  }
  0xe2   : > { %4411 = vsyncadd (%p5528_p13), [#allocation10], 4294942688 }
  0xe3   : > { %4413 = dma.done.wait (%p5528_p13), [#allocation13], 24576  }
  0xe4   : > { %4415 = vsyncadd (%p5528_p13), [#allocation13], 4294942720 }
  0xe5   : > { %4417 = dma.done.wait (%p5528_p13), [#allocation16], 16384  }
  0xe6   : > { %4419 = vsyncadd (%p5528_p13), [#allocation16], 4294950912  ;;  %v4924_v0 = vld [vmem:[%s461_s25] sm:$0xff]  ;;  %v4926_v1 = vld [vmem:[%s461_s25 + $0x8] sm:$0xff]  ;;  %s2977_s13 = sshll.u32 %s4438_s24, 4  ;;  %s5009_s12 = scalar_lea.vmem [#allocation17], %s2970_s16 }
  0xe7   : > { %v4928_v2 = vld [vmem:[%s461_s25 + $0x10] sm:$0xff]  ;;  %v530_v3 = vadd.f32 %v4926_v1, %v4924_v0  ;;  %v4932_v4 = vld [vmem:[%s461_s25 + $0x18] sm:$0xff]  ;;  %v593_v11 = vld [vmem:[#allocation11] sm:$0xff]  ;;  %s4989_s7 = scalar_lea.vmem [#allocation2], %s2977_s13  ;;  %s5001_s17 = scalar_lea.vmem [#allocation3], %s2977_s13 }
  0xe8   : > { %v533_v5 = vadd.f32 %v4932_v4, %v4928_v2  ;;  %v594_v6 = vld [vmem:[#allocation11 + $0x8] sm:$0xff]  ;;  %v600_v7 = vld [vmem:[#allocation11 + $0x38] sm:$0xff]  ;;  %v599_v12 = vld [vmem:[#allocation11 + $0x30] sm:$0xff]  ;;  %p2984_p12 = scmp.le.s32.totalorder %s4438_s24, 0 }
  0xe9   : > { %531 = vadd.xlane.f32.xlu0 %v530_v3  ;;  %v596_v8 = vld [vmem:[#allocation11 + $0x18] sm:$0xff]  ;;  %v3092_v9 = vpack.c.bf16 %v600_v7, %v594_v6  ;;  %v602_v10 = vld [vmem:[#allocation11 + $0x48] sm:$0xff]  ;;  %v3094_v14 = vpack.c.bf16 %v599_v12, %v593_v11  ;;  %v595_v15 = vld [vmem:[#allocation11 + $0x10] sm:$0xff]  ;;  %s5060_s9 = smov (!%p2984_p12), 0  }
  0xea   : > { %v3156_v13 = vpack.c.bf16 %v602_v10, %v596_v8  ;;  %v601_v16 = vld [vmem:[#allocation11 + $0x40] sm:$0xff]  ;;  %v606_v17 = vld [vmem:[#allocation11 + $0x68] sm:$0xff]  ;;  %v612_v19 = vld [vmem:[#allocation11 + $0x98] sm:$0xff] }
  0xeb   : > { %3093 = vmatprep.subr.bf16.mxu0 %v3092_v9  ;;  %v3158_v18 = vpack.c.bf16 %v601_v16, %v595_v15  ;;  %v608_v20 = vld [vmem:[#allocation11 + $0x78] sm:$0xff]  ;;  %v614_v21 = vld [vmem:[#allocation11 + $0xa8] sm:$0xff]  ;;  %v3096_v22 = vpack.c.bf16 %v612_v19, %v606_v17  ;;  %v605_v24 = vld [vmem:[#allocation11 + $0x60] sm:$0xff] }
  0xec   : > { %3157 = vmatprep.subr.bf16.mxu1 %v3156_v13  ;;  %3095 = vmatpush1.bf16.msra.mxu0 %v3094_v14  ;;  %v3160_v23 = vpack.c.bf16 %v614_v21, %v608_v20  ;;  %v611_v25 = vld [vmem:[#allocation11 + $0x90] sm:$0xff]  ;;  %v613_v28 = vld [vmem:[#allocation11 + $0xa0] sm:$0xff]  ;;  %v618_v29 = vld [vmem:[#allocation11 + $0xc8] sm:$0xff] }
  0xed   : > { %534 = vadd.xlane.f32.xlu0 %v533_v5  ;;  %v607_v26 = vld [vmem:[#allocation11 + $0x70] sm:$0xff]  ;;  %3159 = vmatpush1.bf16.msra.mxu1 %v3158_v18  ;;  %v3098_v27 = vpack.c.bf16 %v611_v25, %v605_v24  ;;  %v624_v30 = vld [vmem:[#allocation11 + $0xf8] sm:$0xff]  ;;  %v626_v34 = vld [vmem:[#allocation11 + $0x108] sm:$0xff] }
  0xee   : > { %3097 = vmatprep.subr.bf16.mxu0 %v3096_v22  ;;  %3161 = vmatprep.subr.bf16.mxu1 %v3160_v23  ;;  %v3162_v31 = vpack.c.bf16 %v613_v28, %v607_v26  ;;  %v3100_v32 = vpack.c.bf16 %v624_v30, %v618_v29  ;;  %v620_v33 = vld [vmem:[#allocation11 + $0xd8] sm:$0xff]  ;;  %v617_v35 = vld [vmem:[#allocation11 + $0xc0] sm:$0xff]  ;;  %v623_v37 = vld [vmem:[#allocation11 + $0xf0] sm:$0xff] }
  0xef   : > { %v3164_v36 = vpack.c.bf16 %v626_v34, %v620_v33  ;;  %v619_v38 = vld [vmem:[#allocation11 + $0xd0] sm:$0xff]  ;;  %v625_v39 = vld [vmem:[#allocation11 + $0x100] sm:$0xff]  ;;  %v3102_v40 = vpack.c.bf16 %v623_v37, %v617_v35  ;;  %v630_v41 = vld [vmem:[#allocation11 + $0x128] sm:$0xff] }
  0xf0   : > { %3099 = vmatpush1.bf16.msra.mxu0 %v3098_v27  ;;  %v636_v42 = vld [vmem:[#allocation11 + $0x158] sm:$0xff]  ;;  %v3166_v44 = vpack.c.bf16 %v625_v39, %v619_v38  ;;  %v638_v46 = vld [vmem:[#allocation11 + $0x168] sm:$0xff]  ;;  %v629_v47 = vld [vmem:[#allocation11 + $0x120] sm:$0xff] }
  0xf1   : > { %v632_v43 = vld [vmem:[#allocation11 + $0x138] sm:$0xff]  ;;  %3163 = vmatpush1.bf16.msra.mxu1 %v3162_v31  ;;  %3101 = vmatprep.subr.bf16.mxu0 %v3100_v32  ;;  %v3104_v45 = vpack.c.bf16 %v636_v42, %v630_v41  ;;  %v635_v48 = vld [vmem:[#allocation11 + $0x150] sm:$0xff]  ;;  %v637_v51 = vld [vmem:[#allocation11 + $0x160] sm:$0xff] }
  0xf2   : > { %3165 = vmatprep.subr.bf16.mxu1 %v3164_v36  ;;  %v3168_v49 = vpack.c.bf16 %v638_v46, %v632_v43  ;;  %v631_v50 = vld [vmem:[#allocation11 + $0x130] sm:$0xff]  ;;  %v642_v52 = vld [vmem:[#allocation11 + $0x188] sm:$0xff]  ;;  %v648_v53 = vld [vmem:[#allocation11 + $0x1b8] sm:$0xff]  ;;  %v3106_v56 = vpack.c.bf16 %v635_v48, %v629_v47 }
  0xf3   : > { %v644_v54 = vld [vmem:[#allocation11 + $0x198] sm:$0xff]  ;;  %v650_v55 = vld [vmem:[#allocation11 + $0x1c8] sm:$0xff]  ;;  %v3170_v57 = vpack.c.bf16 %v637_v51, %v631_v50  ;;  %v3108_v58 = vpack.c.bf16 %v648_v53, %v642_v52  ;;  %v641_v59 = vld [vmem:[#allocation11 + $0x180] sm:$0xff] }
  0xf4   : > { %3103 = vmatpush1.bf16.msra.mxu0 %v3102_v40  ;;  %v647_v60 = vld [vmem:[#allocation11 + $0x1b0] sm:$0xff]  ;;  %v3172_v62 = vpack.c.bf16 %v650_v55, %v644_v54  ;;  %v649_v63 = vld [vmem:[#allocation11 + $0x1c0] sm:$0xff]  ;;  %v654_v3 = vld [vmem:[#allocation11 + $0x1e8] sm:$0xff] }
  0xf5   : > { %3167 = vmatpush1.bf16.msra.mxu1 %v3166_v44  ;;  %3105 = vmatprep.subr.bf16.mxu0 %v3104_v45  ;;  %v643_v61 = vld [vmem:[#allocation11 + $0x190] sm:$0xff]  ;;  %v660_v5 = vld [vmem:[#allocation11 + $0x218] sm:$0xff]  ;;  %v662_v7 = vld [vmem:[#allocation11 + $0x228] sm:$0xff]  ;;  %v3110_v8 = vpack.c.bf16 %v647_v60, %v641_v59 }
  0xf6   : > { %3169 = vmatprep.subr.bf16.mxu1 %v3168_v49  ;;  %v656_v6 = vld [vmem:[#allocation11 + $0x1f8] sm:$0xff]  ;;  %v3174_v9 = vpack.c.bf16 %v649_v63, %v643_v61  ;;  %v3112_v10 = vpack.c.bf16 %v660_v5, %v654_v3  ;;  %v653_v11 = vld [vmem:[#allocation11 + $0x1e0] sm:$0xff]  ;;  %v659_v12 = vld [vmem:[#allocation11 + $0x210] sm:$0xff] }
  0xf7   : > { %v655_v13 = vld [vmem:[#allocation11 + $0x1f0] sm:$0xff]  ;;  %v3176_v14 = vpack.c.bf16 %v662_v7, %v656_v6  ;;  %v661_v15 = vld [vmem:[#allocation11 + $0x220] sm:$0xff]  ;;  %v666_v16 = vld [vmem:[#allocation11 + $0x248] sm:$0xff]  ;;  %v3114_v20 = vpack.c.bf16 %v659_v12, %v653_v11 }
  0xf8   : > { %3107 = vmatpush1.bf16.msra.mxu0 %v3106_v56  ;;  %v672_v17 = vld [vmem:[#allocation11 + $0x278] sm:$0xff]  ;;  %v674_v19 = vld [vmem:[#allocation11 + $0x288] sm:$0xff]  ;;  %v3178_v21 = vpack.c.bf16 %v661_v15, %v655_v13  ;;  %v665_v23 = vld [vmem:[#allocation11 + $0x240] sm:$0xff] }
  0xf9   : > { %3171 = vmatpush1.bf16.msra.mxu1 %v3170_v57  ;;  %3109 = vmatprep.subr.bf16.mxu0 %v3108_v58  ;;  %v668_v18 = vld [vmem:[#allocation11 + $0x258] sm:$0xff]  ;;  %v3116_v22 = vpack.c.bf16 %v672_v17, %v666_v16  ;;  %v671_v24 = vld [vmem:[#allocation11 + $0x270] sm:$0xff]  ;;  %v673_v27 = vld [vmem:[#allocation11 + $0x280] sm:$0xff] }
  0xfa   : > { %3173 = vmatprep.subr.bf16.mxu1 %v3172_v62  ;;  %v667_v25 = vld [vmem:[#allocation11 + $0x250] sm:$0xff]  ;;  %v3180_v26 = vpack.c.bf16 %v674_v19, %v668_v18  ;;  %v678_v28 = vld [vmem:[#allocation11 + $0x2a8] sm:$0xff]  ;;  %v684_v29 = vld [vmem:[#allocation11 + $0x2d8] sm:$0xff]  ;;  %v3118_v32 = vpack.c.bf16 %v671_v24, %v665_v23 }
  0xfb   : > { %v680_v30 = vld [vmem:[#allocation11 + $0x2b8] sm:$0xff]  ;;  %v686_v31 = vld [vmem:[#allocation11 + $0x2e8] sm:$0xff]  ;;  %v3182_v33 = vpack.c.bf16 %v673_v27, %v667_v25  ;;  %v3120_v34 = vpack.c.bf16 %v684_v29, %v678_v28  ;;  %v677_v35 = vld [vmem:[#allocation11 + $0x2a0] sm:$0xff] }
  0xfc   : > { %3111 = vmatpush1.bf16.msra.mxu0 %v3110_v8  ;;  %v683_v36 = vld [vmem:[#allocation11 + $0x2d0] sm:$0xff]  ;;  %v3184_v38 = vpack.c.bf16 %v686_v31, %v680_v30  ;;  %v685_v39 = vld [vmem:[#allocation11 + $0x2e0] sm:$0xff]  ;;  %v690_v40 = vld [vmem:[#allocation11 + $0x308] sm:$0xff] }
  0xfd   : > { %3175 = vmatpush1.bf16.msra.mxu1 %v3174_v9  ;;  %3113 = vmatprep.subr.bf16.mxu0 %v3112_v10  ;;  %v679_v37 = vld [vmem:[#allocation11 + $0x2b0] sm:$0xff]  ;;  %v696_v41 = vld [vmem:[#allocation11 + $0x338] sm:$0xff]  ;;  %v698_v43 = vld [vmem:[#allocation11 + $0x348] sm:$0xff]  ;;  %v3122_v44 = vpack.c.bf16 %v683_v36, %v677_v35 }
  0xfe   : > { %3177 = vmatprep.subr.bf16.mxu1 %v3176_v14  ;;  %v692_v42 = vld [vmem:[#allocation11 + $0x318] sm:$0xff]  ;;  %v3186_v45 = vpack.c.bf16 %v685_v39, %v679_v37  ;;  %v3124_v46 = vpack.c.bf16 %v696_v41, %v690_v40  ;;  %v689_v47 = vld [vmem:[#allocation11 + $0x300] sm:$0xff]  ;;  %v695_v48 = vld [vmem:[#allocation11 + $0x330] sm:$0xff] }
  0xff   : > { %v691_v49 = vld [vmem:[#allocation11 + $0x310] sm:$0xff]  ;;  %v3188_v50 = vpack.c.bf16 %v698_v43, %v692_v42  ;;  %v697_v51 = vld [vmem:[#allocation11 + $0x340] sm:$0xff]  ;;  %v702_v52 = vld [vmem:[#allocation11 + $0x368] sm:$0xff]  ;;  %v3126_v56 = vpack.c.bf16 %v695_v48, %v689_v47 }
 0x100   : > { %3115 = vmatpush1.bf16.msra.mxu0 %v3114_v20  ;;  %v708_v53 = vld [vmem:[#allocation11 + $0x398] sm:$0xff]  ;;  %v710_v55 = vld [vmem:[#allocation11 + $0x3a8] sm:$0xff]  ;;  %v3190_v57 = vpack.c.bf16 %v697_v51, %v691_v49  ;;  %v701_v59 = vld [vmem:[#allocation11 + $0x360] sm:$0xff] }
 0x101   : > { %3179 = vmatpush1.bf16.msra.mxu1 %v3178_v21  ;;  %3117 = vmatprep.subr.bf16.mxu0 %v3116_v22  ;;  %v704_v54 = vld [vmem:[#allocation11 + $0x378] sm:$0xff]  ;;  %v3128_v58 = vpack.c.bf16 %v708_v53, %v702_v52  ;;  %v707_v60 = vld [vmem:[#allocation11 + $0x390] sm:$0xff]  ;;  %v709_v63 = vld [vmem:[#allocation11 + $0x3a0] sm:$0xff] }
 0x102   : > { %3181 = vmatprep.subr.bf16.mxu1 %v3180_v26  ;;  %v703_v61 = vld [vmem:[#allocation11 + $0x370] sm:$0xff]  ;;  %v3192_v62 = vpack.c.bf16 %v710_v55, %v704_v54  ;;  %v714_v3 = vld [vmem:[#allocation11 + $0x3c8] sm:$0xff]  ;;  %v720_v5 = vld [vmem:[#allocation11 + $0x3f8] sm:$0xff]  ;;  %v3130_v8 = vpack.c.bf16 %v707_v60, %v701_v59 }
 0x103   : > { %v716_v6 = vld [vmem:[#allocation11 + $0x3d8] sm:$0xff]  ;;  %v722_v7 = vld [vmem:[#allocation11 + $0x408] sm:$0xff]  ;;  %v3194_v9 = vpack.c.bf16 %v709_v63, %v703_v61  ;;  %v3132_v10 = vpack.c.bf16 %v720_v5, %v714_v3  ;;  %v713_v11 = vld [vmem:[#allocation11 + $0x3c0] sm:$0xff] }
 0x104   : > { %3119 = vmatpush1.bf16.msra.mxu0 %v3118_v32  ;;  %v719_v12 = vld [vmem:[#allocation11 + $0x3f0] sm:$0xff]  ;;  %v3196_v13 = vpack.c.bf16 %v722_v7, %v716_v6  ;;  %v721_v15 = vld [vmem:[#allocation11 + $0x400] sm:$0xff]  ;;  %v726_v32 = vld [vmem:[#allocation11 + $0x428] sm:$0xff] }
 0x105   : > { %3183 = vmatpush1.bf16.msra.mxu1 %v3182_v33  ;;  %3121 = vmatprep.subr.bf16.mxu0 %v3120_v34  ;;  %v715_v14 = vld [vmem:[#allocation11 + $0x3d0] sm:$0xff]  ;;  %v3134_v16 = vpack.c.bf16 %v719_v12, %v713_v11  ;;  %v732_v33 = vld [vmem:[#allocation11 + $0x458] sm:$0xff]  ;;  %v734_v36 = vld [vmem:[#allocation11 + $0x468] sm:$0xff] }
 0x106   : > { %3185 = vmatprep.subr.bf16.mxu1 %v3184_v38  ;;  %v3198_v17 = vpack.c.bf16 %v721_v15, %v715_v14  ;;  %v728_v34 = vld [vmem:[#allocation11 + $0x438] sm:$0xff]  ;;  %v3136_v35 = vpack.c.bf16 %v732_v33, %v726_v32  ;;  %v725_v37 = vld [vmem:[#allocation11 + $0x420] sm:$0xff]  ;;  %v731_v38 = vld [vmem:[#allocation11 + $0x450] sm:$0xff] }
 0x107   : > { %v3200_v39 = vpack.c.bf16 %v734_v36, %v728_v34  ;;  %v3138_v40 = vpack.c.bf16 %v731_v38, %v725_v37  ;;  %v727_v41 = vld [vmem:[#allocation11 + $0x430] sm:$0xff]  ;;  %v733_v42 = vld [vmem:[#allocation11 + $0x460] sm:$0xff]  ;;  %v746_v48 = vld [vmem:[#allocation11 + $0x4c8] sm:$0xff] }
 0x108   : > { %3123 = vmatpush1.bf16.msra.mxu0 %v3122_v44  ;;  %v3202_v43 = vpack.c.bf16 %v733_v42, %v727_v41  ;;  %v738_v44 = vld [vmem:[#allocation11 + $0x488] sm:$0xff]  ;;  %v737_v49 = vld [vmem:[#allocation11 + $0x480] sm:$0xff]  ;;  %v739_v53 = vld [vmem:[#allocation11 + $0x490] sm:$0xff]  ;;  %v564_v41 = vlaneseq }
 0x109   : > { %3187 = vmatpush1.bf16.msra.mxu1 %v3186_v45  ;;  %3125 = vmatprep.subr.bf16.mxu0 %v3124_v46  ;;  %v744_v45 = vld [vmem:[#allocation11 + $0x4b8] sm:$0xff]  ;;  %v745_v54 = vld [vmem:[#allocation11 + $0x4c0] sm:$0xff]  ;;  %v758_v60 = vld [vmem:[#allocation11 + $0x528] sm:$0xff] }
 0x10a   : > { %3189 = vmatprep.subr.bf16.mxu1 %v3188_v50  ;;  %v740_v46 = vld [vmem:[#allocation11 + $0x498] sm:$0xff]  ;;  %v3140_v47 = vpack.c.bf16 %v744_v45, %v738_v44  ;;  %v743_v50 = vld [vmem:[#allocation11 + $0x4b0] sm:$0xff]  ;;  %v3206_v55 = vpack.c.bf16 %v745_v54, %v739_v53  ;;  %v749_v61 = vld [vmem:[#allocation11 + $0x4e0] sm:$0xff]  ;;  %v4957_v45 = vshrl.u32 %v564_v41, 7 }
 0x10b   : > { %v3204_v51 = vpack.c.bf16 %v746_v48, %v740_v46  ;;  %v3142_v52 = vpack.c.bf16 %v743_v50, %v737_v49  ;;  %v751_v5 = vld [vmem:[#allocation11 + $0x4f0] sm:$0xff]  ;;  %v757_v6 = vld [vmem:[#allocation11 + $0x520] sm:$0xff]  ;;  %v762_v7 = vld [vmem:[#allocation11 + $0x548] sm:$0xff] }
 0x10c   : > { %3127 = vmatpush1.bf16.msra.mxu0 %v3126_v56  ;;  %v750_v56 = vld [vmem:[#allocation11 + $0x4e8] sm:$0xff]  ;;  %v761_v14 = vld [vmem:[#allocation11 + $0x540] sm:$0xff]  ;;  %v767_v15 = vld [vmem:[#allocation11 + $0x570] sm:$0xff]  ;;  %v4963_v48 = vsub.s32 0, %v4957_v45 }
 0x10d   : > { %3191 = vmatpush1.bf16.msra.mxu1 %v3190_v57  ;;  %3129 = vmatprep.subr.bf16.mxu0 %v3128_v58  ;;  %v756_v57 = vld [vmem:[#allocation11 + $0x518] sm:$0xff]  ;;  %v770_v11 = vld [vmem:[#allocation11 + $0x588] sm:$0xff]  ;;  %v775_v32 = vld [vmem:[#allocation11 + $0x5b0] sm:$0xff] }
 0x10e   : > { %3193 = vmatprep.subr.bf16.mxu1 %v3192_v62  ;;  %v752_v58 = vld [vmem:[#allocation11 + $0x4f8] sm:$0xff]  ;;  %v3144_v59 = vpack.c.bf16 %v756_v57, %v750_v56  ;;  %v755_v62 = vld [vmem:[#allocation11 + $0x510] sm:$0xff]  ;;  %v781_v33 = vld [vmem:[#allocation11 + $0x5e0] sm:$0xff] }
 0x10f   : > { %v3208_v63 = vpack.c.bf16 %v758_v60, %v752_v58  ;;  %v3146_v3 = vpack.c.bf16 %v755_v62, %v749_v61  ;;  %v598_v36 = vld [vmem:[#allocation11 + $0x28] sm:$0xff]  ;;  %v604_v37 = vld [vmem:[#allocation11 + $0x58] sm:$0xff]  ;;  %v597_v58 = vld [vmem:[#allocation11 + $0x20] sm:$0xff] }
 0x110   : > { %3131 = vmatpush1.bf16.msra.mxu0 %v3130_v8  ;;  %v3210_v8 = vpack.c.bf16 %v757_v6, %v751_v5  ;;  %v3220_v38 = vpack.c.bf16 %v604_v37, %v598_v36  ;;  %v528_v49 = vld [vmem:[%s5469_s1] sm:$0x3]  ;;  %v610_v62 = vld [vmem:[#allocation11 + $0x88] sm:$0xff] }
 0x111   : > { %3195 = vmatpush1.bf16.msra.mxu1 %v3194_v9  ;;  %3133 = vmatprep.subr.bf16.mxu0 %v3132_v10  ;;  %v768_v9 = vld [vmem:[#allocation11 + $0x578] sm:$0xff] }
 0x112   : > { %3197 = vmatprep.subr.bf16.mxu1 %v3196_v13  ;;  %v764_v10 = vld [vmem:[#allocation11 + $0x558] sm:$0xff]  ;;  %v3148_v12 = vpack.c.bf16 %v768_v9, %v762_v7 }
 0x113   : > { %v3212_v13 = vpack.c.bf16 %v770_v11, %v764_v10  ;;  %v529_v50 = vld [vmem:[#allocation9] sm:$0x3]  ;;  %v609_v10 = vld [vmem:[#allocation11 + $0x80] sm:$0xff] }
 0x114   : > { %3135 = vmatpush1.bf16.msra.mxu0 %v3134_v16  ;;  %v763_v16 = vld [vmem:[#allocation11 + $0x550] sm:$0xff]  ;;  %v582_v57 = vrot.slane %v529_v50, %v4963_v48  ;;  %v664_v36 = vld [vmem:[#allocation11 + $0x238] sm:$0xff] }
 0x115   : > { %3199 = vmatpush1.bf16.msra.mxu1 %v3198_v17  ;;  %3137 = vmatprep.subr.bf16.mxu0 %v3136_v35  ;;  %v3150_v17 = vpack.c.bf16 %v767_v15, %v761_v14  ;;  %v3218_v35 = vpack.c.bf16 %v781_v33, %v775_v32  ;;  %v628_v14 = vld [vmem:[#allocation11 + $0x118] sm:$0xff]  ;;  %v645_v33 = vld [vmem:[#allocation11 + $0x1a0] sm:$0xff] }
 0x116   : > { %3201 = vmatprep.subr.bf16.mxu1 %v3200_v39 }
 0x118   : > { %3139 = vmatpush1.bf16.msra.mxu0 %v3138_v40 }
 0x119   : > { %3203 = vmatpush1.bf16.msra.mxu1 %v3202_v43  ;;  %3141 = vmatprep.subr.bf16.mxu0 %v3140_v47  ;;  %v4960_v47 = vsub.s32 1, %v4957_v45 }
 0x11a   : > { %3205 = vmatprep.subr.bf16.mxu1 %v3204_v51 }
 0x11b   : > { %v571_v51 = vrot.slane %v528_v49, %v4960_v47 }
 0x11c   : > { %3143 = vmatpush1.bf16.msra.mxu0 %v3142_v52  ;;  %v567_v52 = vrot.slane %v528_v49, %v4963_v48  ;;  %v669_v49 = vld [vmem:[#allocation11 + $0x260] sm:$0xff] }
 0x11d   : > { %3207 = vmatpush1.bf16.msra.mxu1 %v3206_v55  ;;  %3145 = vmatprep.subr.bf16.mxu0 %v3144_v59  ;;  %v586_v55 = vrot.slane %v529_v50, %v4960_v47  ;;  %v603_v59 = vld [vmem:[#allocation11 + $0x50] sm:$0xff] }
 0x11e   : > { %3209 = vmatprep.subr.bf16.mxu1 %v3208_v63  ;;  %v616_v63 = vld [vmem:[#allocation11 + $0xb8] sm:$0xff]  ;;  %v3222_v5 = vpack.c.bf16 %v603_v59, %v597_v58  ;;  %v675_v50 = vld [vmem:[#allocation11 + $0x290] sm:$0xff] }
 0x11f   : > { %v3224_v9 = vpack.c.bf16 %v616_v63, %v610_v62  ;;  %v700_v58 = vld [vmem:[#allocation11 + $0x358] sm:$0xff]  ;;  %v699_v62 = vld [vmem:[#allocation11 + $0x350] sm:$0xff]  ;;  %v706_v63 = vld [vmem:[#allocation11 + $0x388] sm:$0xff] }
 0x120   : > { %3147 = vmatpush1.bf16.msra.mxu0 %v3146_v3 }
 0x121   : > { %3211 = vmatpush1.bf16.msra.mxu1 %v3210_v8  ;;  %3149 = vmatprep.subr.bf16.mxu0 %v3148_v12 }
 0x122   : > { %3213 = vmatprep.subr.bf16.mxu1 %v3212_v13  ;;  %v622_v13 = vld [vmem:[#allocation11 + $0xe8] sm:$0xff] }
 0x124   : > { %3151 = vmatpush1.bf16.msra.mxu0 %v3150_v17  ;;  %v627_v17 = vld [vmem:[#allocation11 + $0x110] sm:$0xff] }
 0x176   : > { %v532_v18 = vpop.xlane.xlu0 %531 }
 0x177   : > { %v537_v19 = vmul.f32 0.00390625, %v532_v18  ;;  %v769_v18 = vld [vmem:[#allocation11 + $0x580] sm:$0xff] }
 0x179   : > { %v4937_v20 = vsub.f32 %v4924_v0, %v537_v19  ;;  %v4940_v21 = vsub.f32 %v4926_v1, %v537_v19  ;;  %v774_v19 = vld [vmem:[#allocation11 + $0x5a8] sm:$0xff] }
 0x17a   : > { %v535_v22 = vpop.xlane.xlu0 %534 }
 0x17b   : > { %v538_v23 = vmul.f32 0.00390625, %v535_v22  ;;  %v543_v24 = vmul.f32 %v4937_v20, %v4937_v20  ;;  %v544_v25 = vmul.f32 %v4940_v21, %v4940_v21  ;;  %v780_v22 = vld [vmem:[#allocation11 + $0x5d8] sm:$0xff] }
 0x17d   : > { %v4947_v26 = vsub.f32 %v4928_v2, %v538_v23  ;;  %v4950_v27 = vsub.f32 %v4932_v4, %v538_v23  ;;  %v547_v28 = vadd.f32 %v544_v25, %v543_v24  ;;  %v3214_v23 = vpack.c.bf16 %v769_v18, %v763_v16  ;;  %v776_v25 = vld [vmem:[#allocation11 + $0x5b8] sm:$0xff] }
 0x17e   : > { %v3152_v24 = vpack.c.bf16 %v780_v22, %v774_v19  ;;  %v3228_v18 = vpack.c.bf16 %v628_v14, %v622_v13  ;;  %v634_v19 = vld [vmem:[#allocation11 + $0x148] sm:$0xff]  ;;  %v640_v22 = vld [vmem:[#allocation11 + $0x178] sm:$0xff]  ;;  %v723_v13 = vld [vmem:[#allocation11 + $0x410] sm:$0xff] }
 0x17f   : > { %548 = vadd.xlane.f32.xlu1 %v547_v28  ;;  %v545_v29 = vmul.f32 %v4947_v26, %v4947_v26  ;;  %v546_v30 = vmul.f32 %v4950_v27, %v4950_v27  ;;  %v782_v28 = vld [vmem:[#allocation11 + $0x5e8] sm:$0xff]  ;;  %3215 = vmatpush1.bf16.msra.mxu1 %v3214_v23 }
 0x180   : > { %3153 = vmatprep.subr.bf16.mxu0 %v3152_v24  ;;  %v3232_v24 = vpack.c.bf16 %v640_v22, %v634_v19  ;;  %v730_v14 = vld [vmem:[#allocation11 + $0x448] sm:$0xff]  ;;  %v748_v22 = vld [vmem:[#allocation11 + $0x4d8] sm:$0xff] }
 0x181   : > { %v550_v31 = vadd.f32 %v546_v30, %v545_v29  ;;  %v773_v29 = vld [vmem:[#allocation11 + $0x5a0] sm:$0xff]  ;;  %v3216_v30 = vpack.c.bf16 %v782_v28, %v776_v25  ;;  %v639_v28 = vld [vmem:[#allocation11 + $0x170] sm:$0xff]  ;;  %v742_v19 = vld [vmem:[#allocation11 + $0x4a8] sm:$0xff] }
 0x182   : > { %v633_v25 = vld [vmem:[#allocation11 + $0x140] sm:$0xff] }
 0x183   : > { %551 = vadd.xlane.f32.xlu1 %v550_v31  ;;  %v779_v31 = vld [vmem:[#allocation11 + $0x5d0] sm:$0xff]  ;;  %3217 = vmatprep.subr.bf16.mxu1 %v3216_v30  ;;  %v652_v30 = vld [vmem:[#allocation11 + $0x1d8] sm:$0xff] }
 0x184   : > { %v3154_v34 = vpack.c.bf16 %v779_v31, %v773_v29  ;;  %3219 = vmatpush1.bf16.msra.mxu1 %v3218_v35  ;;  %v646_v29 = vld [vmem:[#allocation11 + $0x1a8] sm:$0xff]  ;;  %v3234_v31 = vpack.c.bf16 %v639_v28, %v633_v25  ;;  %v741_v25 = vld [vmem:[#allocation11 + $0x4a0] sm:$0xff]  ;;  %v747_v28 = vld [vmem:[#allocation11 + $0x4d0] sm:$0xff] }
 0x185   : > { %3636 = vmatprep.subr.bf16.mxu1 %v3220_v38  ;;  %v3236_v32 = vpack.c.bf16 %v652_v30, %v646_v29  ;;  %v658_v35 = vld [vmem:[#allocation11 + $0x208] sm:$0xff]  ;;  %v760_v30 = vld [vmem:[#allocation11 + $0x538] sm:$0xff] }
 0x186   : > { %3155 = vmatpush1.bf16.msra.mxu0 %v3154_v34  ;;  %v651_v34 = vld [vmem:[#allocation11 + $0x1d0] sm:$0xff]  ;;  %v754_v29 = vld [vmem:[#allocation11 + $0x508] sm:$0xff] }
 0x187   : > { %3221 = vmatprep.subr.bf16.mxu0 %v3220_v38  ;;  %v3238_v37 = vpack.c.bf16 %v651_v34, %v645_v33  ;;  %v3240_v38 = vpack.c.bf16 %v664_v36, %v658_v35  ;;  %v753_v33 = vld [vmem:[#allocation11 + $0x500] sm:$0xff]  ;;  %v759_v34 = vld [vmem:[#allocation11 + $0x530] sm:$0xff]  ;;  %v766_v35 = vld [vmem:[#allocation11 + $0x568] sm:$0xff] }
 0x188   : > { %v772_v36 = vld [vmem:[#allocation11 + $0x598] sm:$0xff] }
 0x20c   : > { %v549_v39 = vpop.xlane.xlu1 %548 }
 0x20d   : > { %v553_v40 = vmul.f32 0.00390625, %v549_v39  ;;  %v657_v39 = vld [vmem:[#allocation11 + $0x200] sm:$0xff] }
 0x20f   : > { %v555_v42 = vadd.f32 1e-05, %v553_v40  ;;  %v663_v40 = vld [vmem:[#allocation11 + $0x230] sm:$0xff] }
 0x210   : > { %v552_v43 = vpop.xlane.xlu1 %551 }
 0x211   : > { %4010 = vrsqrt.f32 %v555_v42  ;;  %v554_v44 = vmul.f32 0.00390625, %v552_v43  ;;  %v670_v42 = vld [vmem:[#allocation11 + $0x268] sm:$0xff]  ;;  %v676_v43 = vld [vmem:[#allocation11 + $0x298] sm:$0xff] }
 0x213   : > { %v556_v46 = vadd.f32 1e-05, %v554_v44  ;;  %v3242_v44 = vpack.c.bf16 %v663_v40, %v657_v39  ;;  %v765_v39 = vld [vmem:[#allocation11 + $0x560] sm:$0xff]  ;;  %v771_v40 = vld [vmem:[#allocation11 + $0x590] sm:$0xff] }
 0x215   : > { %4012 = vrsqrt.f32 %v556_v46  ;;  %v3244_v46 = vpack.c.bf16 %v676_v43, %v670_v42  ;;  %v778_v42 = vld [vmem:[#allocation11 + $0x5c8] sm:$0xff]  ;;  %v784_v43 = vld [vmem:[#allocation11 + $0x5f8] sm:$0xff] }
 0x21b   : > { %v4011_v53 = vpop.eup %4010 }
 0x21c   : > { %v560_v54 = vmul.f32 %v4011_v53, %v4940_v21  ;;  %v559_v56 = vmul.f32 %v4011_v53, %v4937_v20  ;;  %v615_v20 = vld [vmem:[#allocation11 + $0xb0] sm:$0xff]  ;;  %v3246_v53 = vpack.c.bf16 %v675_v50, %v669_v49  ;;  %v777_v49 = vld [vmem:[#allocation11 + $0x5c0] sm:$0xff] }
 0x21d   : > { %v783_v50 = vld [vmem:[#allocation11 + $0x5f0] sm:$0xff] }
 0x21e   : > { %v575_v60 = vmul.f32 %v571_v51, %v560_v54  ;;  %v574_v61 = vmul.f32 %v567_v52, %v559_v56  ;;  %v687_v56 = vld [vmem:[#allocation11 + $0x2f0] sm:$0xff] }
 0x21f   : > { %v4013_v3 = vpop.eup %4012 }
 0x220   : > { %v590_v6 = vadd.f32 %v586_v55, %v575_v60  ;;  %v4974_v7 = vadd.f32 %v582_v57, %v574_v61  ;;  %v562_v8 = vmul.f32 %v4013_v3, %v4950_v27  ;;  %v561_v21 = vmul.f32 %v4013_v3, %v4947_v26  ;;  %v621_v26 = vld [vmem:[#allocation11 + $0xe0] sm:$0xff]  ;;  %v712_v3 = vld [vmem:[#allocation11 + $0x3b8] sm:$0xff] }
 0x221   : > { %v3226_v27 = vpack.c.bf16 %v615_v20, %v609_v10  ;;  %v3230_v23 = vpack.c.bf16 %v627_v17, %v621_v26  ;;  %v693_v61 = vld [vmem:[#allocation11 + $0x320] sm:$0xff]  ;;  %v724_v10 = vld [vmem:[#allocation11 + $0x418] sm:$0xff] }
 0x222   : > { %849 = vmatprep.mubr.f32.mxu0 %v590_v6  ;;  %926 = vmatprep.mubr.f32.mxu1 %v590_v6  ;;  %v577_v11 = vmul.f32 %v571_v51, %v562_v8  ;;  %v576_v12 = vmul.f32 %v567_v52, %v561_v21  ;;  %v682_v51 = vld [vmem:[#allocation11 + $0x2c8] sm:$0xff]  ;;  %v688_v52 = vld [vmem:[#allocation11 + $0x2f8] sm:$0xff]  ;;  %v705_v8 = vld [vmem:[#allocation11 + $0x380] sm:$0xff] }
 0x223   : > { %850 = vmatmul.mubr.f32.vlgmr.msra.gmra.mrb[0].mxu0 %v4974_v7  ;;  %927 = vmatmul.mubr.f32.vlgmr.msra.gmra.mrb[0].mxu1 %v4974_v7  ;;  %v3248_v54 = vpack.c.bf16 %v688_v52, %v682_v51  ;;  %v711_v21 = vld [vmem:[#allocation11 + $0x3b0] sm:$0xff]  ;;  %v729_v17 = vld [vmem:[#allocation11 + $0x440] sm:$0xff]  ;;  %v3282_v51 = vpack.c.bf16 %v783_v50, %v777_v49 }
 0x224   : > { %3223 = vmatpush1.bf16.msra.mxu0 %v3222_v5  ;;  %3652 = vmatpush1.bf16.msra.mxu1 %v3222_v5  ;;  %v592_v15 = vadd.f32 %v586_v55, %v577_v11  ;;  %v4980_v16 = vadd.f32 %v582_v57, %v576_v12  ;;  %v681_v55 = vld [vmem:[#allocation11 + $0x2c0] sm:$0xff]  ;;  %v694_v57 = vld [vmem:[#allocation11 + $0x328] sm:$0xff]  ;;  %v3254_v5 = vpack.c.bf16 %v699_v62, %v693_v61  ;;  %v5012_v62 = vmov 0.0  }
 0x225   : > { %3225 = vmatprep.subr.bf16.mxu0 %v3224_v9  ;;  %3637 = vmatprep.subr.bf16.mxu1 %v3224_v9  ;;  %v3250_v59 = vpack.c.bf16 %v687_v56, %v681_v55  ;;  %v3252_v60 = vpack.c.bf16 %v700_v58, %v694_v57  ;;  %v718_v9 = vld [vmem:[#allocation11 + $0x3e8] sm:$0xff]  ;;  %v3258_v20 = vpack.c.bf16 %v711_v21, %v705_v8  ;;  %v717_v12 = vld [vmem:[#allocation11 + $0x3e0] sm:$0xff]  ;;  %v5022_v8 = vmov 0.0  }
 0x226   : > { %855 = vmatprep.mubr.f32.mxu0 %v592_v15  ;;  %932 = vmatprep.mubr.f32.mxu1 %v592_v15  ;;  %v3260_v11 = vpack.c.bf16 %v724_v10, %v718_v9  ;;  %v5024_v21 = vmov 0.0   ;;  %v5026_v9 = vmov 0.0   ;;  %v5028_v10 = vmov -1e+30  }
 0x227   : > { %856 = vmatmul.mubr.f32.gmra.mrb[2].mxu0 %v4980_v16  ;;  %933 = vmatmul.mubr.f32.gmra.mrb[2].mxu1 %v4980_v16 }
 0x228   : > { %3227 = vmatpush1.bf16.msra.mxu0 %v3226_v27  ;;  %3653 = vmatpush1.bf16.msra.mxu1 %v3226_v27  ;;  %v3262_v27 = vpack.c.bf16 %v723_v13, %v717_v12  ;;  %v5034_v12 = vmov -1e+30   ;;  %v5036_v13 = vmov (!%p2984_p12), 0.0  }
 0x229   : > { %1003 = vmatprep.mubr.f32.mxu0 %v590_v6  ;;  %1009 = vmatprep.mubr.f32.mxu1 %v592_v15  ;;  %v3256_v6 = vpack.c.bf16 %v712_v3, %v706_v63  ;;  %v736_v15 = vld [vmem:[#allocation11 + $0x478] sm:$0xff]  ;;  %v5014_v63 = vmov 0.0   ;;  %v5016_v3 = vmov 0.0  }
 0x22a   : > { %3229 = vmatprep.subr.bf16.mxu0 %v3228_v18  ;;  %3638 = vmatprep.subr.bf16.mxu1 %v3228_v18  ;;  %v3264_v26 = vpack.c.bf16 %v736_v15, %v730_v14  ;;  %v735_v18 = vld [vmem:[#allocation11 + $0x470] sm:$0xff]  ;;  %v5038_v14 = vmov (!%p2984_p12), 0.0   ;;  %v5040_v15 = vmov (!%p2984_p12), 0.0  }
 0x22c   : > { %3231 = vmatpush1.bf16.msra.mxu0 %v3230_v23  ;;  %3654 = vmatpush1.bf16.msra.mxu1 %v3230_v23  ;;  %v3266_v23 = vpack.c.bf16 %v735_v18, %v729_v17  ;;  %v5046_v17 = vmov (!%p2984_p12), 0.0   ;;  %v5048_v18 = vmov (!%p2984_p12), 0.0  }
 0x22d   : > { %3233 = vmatprep.subr.bf16.mxu0 %v3232_v24  ;;  %3639 = vmatprep.subr.bf16.mxu1 %v3232_v24  ;;  %v3268_v24 = vpack.c.bf16 %v748_v22, %v742_v19  ;;  %v5050_v19 = vmov (!%p2984_p12), 0.0   ;;  %v5052_v22 = vmov (!%p2984_p12), -1e+30  }
 0x230   : > { %3235 = vmatpush1.bf16.msra.mxu0 %v3234_v31  ;;  %3655 = vmatpush1.bf16.msra.mxu1 %v3234_v31  ;;  %v3270_v31 = vpack.c.bf16 %v747_v28, %v741_v25  ;;  %v5058_v25 = vmov (!%p2984_p12), -1e+30  }
 0x231   : > { %3237 = vmatprep.subr.bf16.mxu0 %v3236_v32  ;;  %3640 = vmatprep.subr.bf16.mxu1 %v3236_v32  ;;  %v3272_v32 = vpack.c.bf16 %v760_v30, %v754_v29 }
 0x234   : > { %3239 = vmatpush1.bf16.msra.mxu0 %v3238_v37  ;;  %3656 = vmatpush1.bf16.msra.mxu1 %v3238_v37  ;;  %v3274_v37 = vpack.c.bf16 %v759_v34, %v753_v33 }
 0x235   : > { %3241 = vmatprep.subr.bf16.mxu0 %v3240_v38  ;;  %3641 = vmatprep.subr.bf16.mxu1 %v3240_v38  ;;  %v3276_v38 = vpack.c.bf16 %v772_v36, %v766_v35 }
 0x238   : > { %3243 = vmatpush1.bf16.msra.mxu0 %v3242_v44  ;;  %3657 = vmatpush1.bf16.msra.mxu1 %v3242_v44  ;;  %v3278_v44 = vpack.c.bf16 %v771_v40, %v765_v39 }
 0x239   : > { %3245 = vmatprep.subr.bf16.mxu0 %v3244_v46  ;;  %3642 = vmatprep.subr.bf16.mxu1 %v3244_v46  ;;  %v3280_v46 = vpack.c.bf16 %v784_v43, %v778_v42 }
 0x23c   : > { %3247 = vmatpush1.bf16.msra.mxu0 %v3246_v53  ;;  %3658 = vmatpush1.bf16.msra.mxu1 %v3246_v53 }
 0x23d   : > { %3249 = vmatprep.subr.bf16.mxu0 %v3248_v54  ;;  %3643 = vmatprep.subr.bf16.mxu1 %v3248_v54 }
 0x240   : > { %3251 = vmatpush1.bf16.msra.mxu0 %v3250_v59  ;;  %3659 = vmatpush1.bf16.msra.mxu1 %v3250_v59 }
 0x241   : > { %3253 = vmatprep.subr.bf16.mxu0 %v3252_v60  ;;  %3644 = vmatprep.subr.bf16.mxu1 %v3252_v60 }
 0x244   : > { %3255 = vmatpush1.bf16.msra.mxu0 %v3254_v5  ;;  %3660 = vmatpush1.bf16.msra.mxu1 %v3254_v5  ;;  %v5018_v5 = vmov 0.0  }
 0x245   : > { %3257 = vmatprep.subr.bf16.mxu0 %v3256_v6  ;;  %3645 = vmatprep.subr.bf16.mxu1 %v3256_v6  ;;  %v5020_v6 = vmov 0.0  }
 0x248   : > { %3259 = vmatpush1.bf16.msra.mxu0 %v3258_v20  ;;  %3661 = vmatpush1.bf16.msra.mxu1 %v3258_v20  ;;  %v5030_v20 = vmov -1e+30  }
 0x249   : > { %3261 = vmatprep.subr.bf16.mxu0 %v3260_v11  ;;  %3646 = vmatprep.subr.bf16.mxu1 %v3260_v11  ;;  %v5032_v11 = vmov -1e+30  }
 0x24c   : > { %3263 = vmatpush1.bf16.msra.mxu0 %v3262_v27  ;;  %3662 = vmatpush1.bf16.msra.mxu1 %v3262_v27  ;;  %v5042_v27 = vmov (!%p2984_p12), 0.0  }
 0x24d   : > { %3265 = vmatprep.subr.bf16.mxu0 %v3264_v26  ;;  %3647 = vmatprep.subr.bf16.mxu1 %v3264_v26  ;;  %v5044_v26 = vmov (!%p2984_p12), 0.0  }
 0x250   : > { %3267 = vmatpush1.bf16.msra.mxu0 %v3266_v23  ;;  %3663 = vmatpush1.bf16.msra.mxu1 %v3266_v23  ;;  %v5054_v23 = vmov (!%p2984_p12), -1e+30  }
 0x251   : > { %3269 = vmatprep.subr.bf16.mxu0 %v3268_v24  ;;  %3648 = vmatprep.subr.bf16.mxu1 %v3268_v24  ;;  %v5056_v24 = vmov (!%p2984_p12), -1e+30  }
 0x254   : > { %3271 = vmatpush1.bf16.msra.mxu0 %v3270_v31  ;;  %3664 = vmatpush1.bf16.msra.mxu1 %v3270_v31 }
 0x255   : > { %3273 = vmatprep.subr.bf16.mxu0 %v3272_v32  ;;  %3649 = vmatprep.subr.bf16.mxu1 %v3272_v32 }
 0x258   : > { %3275 = vmatpush1.bf16.msra.mxu0 %v3274_v37  ;;  %3665 = vmatpush1.bf16.msra.mxu1 %v3274_v37 }
 0x259   : > { %3277 = vmatprep.subr.bf16.mxu0 %v3276_v38  ;;  %3650 = vmatprep.subr.bf16.mxu1 %v3276_v38 }
 0x25c   : > { %3279 = vmatpush1.bf16.msra.mxu0 %v3278_v44  ;;  %3666 = vmatpush1.bf16.msra.mxu1 %v3278_v44 }
 0x25d   : > { %3281 = vmatprep.subr.bf16.mxu0 %v3280_v46  ;;  %3651 = vmatprep.subr.bf16.mxu1 %v3280_v46 }
 0x260   : > { %3283 = vmatpush1.bf16.msra.mxu0 %v3282_v51  ;;  %3667 = vmatpush1.bf16.msra.mxu1 %v3282_v51 }
 0x263   : > { %1004 = vmatmul.mubr.f32.vlgmr.msra.gmra.mrb[4].mxu0 %v4974_v7  ;;  %1010 = vmatmul.mubr.f32.vlgmr.msra.gmra.mrb[4].mxu1 %v4980_v16 }
 0x2f6   : > { %v4987_v52 = vpop.f32.mrb[0].mxu0  ;;  %v928_v53 = vpop.f32.mrb[0].mxu1 }
 0x2f7   : > { %1020 = vst [vmem:[%s4989_s7] sm:$0xff] %v928_v53  ;;  %v4992_v54 = vpop.f32.mrb[1].mxu0  ;;  %v930_v55 = vpop.f32.mrb[1].mxu1 }
 0x2f8   : > { %2979 = vst [vmem:[%s4989_s7 + $0x20] sm:$0xff] %v930_v55 }
 0x2fa   : > { %v4995_v56 = vpop.f32.mrb[2].mxu0  ;;  %v934_v7 = vpop.f32.mrb[2].mxu1 }
 0x2fb   : > { %1021 = vst [vmem:[%s4989_s7 + $0x8] sm:$0xff] %v934_v7  ;;  %v4998_v16 = vpop.f32.mrb[3].mxu0  ;;  %v936_v57 = vpop.f32.mrb[3].mxu1 }
 0x2fc   : > { %2980 = vst [vmem:[%s4989_s7 + $0x28] sm:$0xff] %v936_v57 }
 0x332   : > { %2848 = sbr.rel (%p2984_p12) target bundleno = 1433 (0x599), region = 145 }
 0x336   : > { %v1005_v58 = vpop.f32.mrb[4].mxu0  ;;  %v1011_v59 = vpop.f32.mrb[4].mxu1 }
 0x337   : > { %1023 = vst [vmem:[%s5001_s17] sm:$0xff] %v1005_v58  ;;  %1024 = vst [vmem:[%s5001_s17 + $0x8] sm:$0xff] %v1011_v59  ;;  %v1007_v60 = vpop.f32.mrb[5].mxu0  ;;  %v1013_v61 = vpop.f32.mrb[5].mxu1 }
 0x338   : > { %2982 = vst [vmem:[%s5001_s17 + $0x20] sm:$0xff] %v1007_v60  ;;  %2983 = vst [vmem:[%s5001_s17 + $0x28] sm:$0xff] %v1013_v61 }
 0x339 LB: >> { %3040 = vmatprep.mubr.f32.mxu0 %v4987_v52  ;;  %3047 = vmatprep.mubr.f32.mxu1 %v4992_v54  ;;  %s2985_s3 = sshll.u32 %s4506_s9, 4  ;;  %vm1218_vm0 = vcmask 130048   ;;  %s1042_s9 = sadd.s32 1, %s4506_s9   ;;  %s4506_s9 = sphi %s5060_s9, %s1042_s9   ;;  %v4502_v25 = vphi %v5058_v25, %v5543_v25   ;;  %v4498_v24 = vphi %v5056_v24, %v5542_v24   ;;  %v4494_v23 = vphi %v5054_v23, %v5541_v23   ;;  %v4490_v22 = vphi %v5052_v22, %v5540_v22   ;;  %v4486_v19 = vphi %v5050_v19, %v5539_v19   ;;  %v4482_v18 = vphi %v5048_v18, %v5538_v18   ;;  %v4478_v17 = vphi %v5046_v17, %v5537_v17   ;;  %v4474_v26 = vphi %v5044_v26, %v5536_v26   ;;  %v4470_v27 = vphi %v5042_v27, %v5535_v27   ;;  %v4466_v15 = vphi %v5040_v15, %v5534_v15   ;;  %v4462_v14 = vphi %v5038_v14, %v5533_v14   ;;  %v4458_v13 = vphi %v5036_v13, %v5532_v13  }
 0x33a   : >> { %s1058_s14 = scalar_lea.vmem [#allocation2], %s2985_s3  ;;  %s1063_s21 = scalar_lea.vmem [#allocation3], %s2985_s3 }
 0x33b   : >> { %v1059_v28 = vld [vmem:[%s1058_s14] sm:$0xff]  ;;  %v1060_v29 = vld [vmem:[%s1058_s14 + $0x8] sm:$0xff]  ;;  %p5152_p0 = scmp.ge.s32.totalorder %s1042_s9, %s4438_s24 }
 0x33c   : >> { %v1061_v30 = vld [vmem:[%s1058_s14 + $0x20] sm:$0xff]  ;;  %v3284_v31 = vpack.c.bf16 %v1060_v29, %v1059_v28  ;;  %v1062_v32 = vld [vmem:[%s1058_s14 + $0x28] sm:$0xff] }
 0x33d   : >> { %v3288_v33 = vpack.c.bf16 %v1062_v32, %v1061_v30 }
 0x33e   : >> { %3285 = vmatprep.subr.bf16.mxu0 %v3284_v31 }
 0x33f   : >> { %3287 = vmatpush3.bf16.xpose.msra.mxu0 %v3284_v31  ;;  %3289 = vmatprep.subr.bf16.mxu1 %v3288_v33  ;;  %v1064_v43 = vld [vmem:[%s1063_s21] sm:$0xff]  ;;  %v1065_v44 = vld [vmem:[%s1063_s21 + $0x8] sm:$0xff] }
 0x340   : >> { %3291 = vmatpush3.bf16.xpose.msra.mxu1 %v3288_v33  ;;  %v3292_v46 = vpack.c.bf16 %v1065_v44, %v1064_v43  ;;  %v1066_v49 = vld [vmem:[%s1063_s21 + $0x20] sm:$0xff]  ;;  %v1067_v50 = vld [vmem:[%s1063_s21 + $0x28] sm:$0xff] }
 0x341   : >> { %v3296_v51 = vpack.c.bf16 %v1067_v50, %v1066_v49 }
 0x342   : >> { %3293 = vmatprep.subr.bf16.mxu0 %v3292_v46 }
 0x343   : >> { %3297 = vmatprep.subr.bf16.mxu1 %v3296_v51 }
 0x346   : >> { %3041 = vmatmul.mubr.f32.vlgmr.msra.gmra.mrb[0].mxu0 %v4995_v56 }
 0x347   : >> { %3048 = vmatmul.mubr.f32.vlgmr.msra.gmra.mrb[0].mxu1 %v4998_v16  ;;  %3295 = vmatpush3.bf16.msra.mxu0 %v3292_v46 }
 0x348   : >> { %3299 = vmatpush3.bf16.msra.mxu1 %v3296_v51 }
 0x419   : >> { %v3042_v34 = vpop.f32.mrb[0].mxu0 }
 0x41a   : >> { %v1134_v35 = vpop.f32.mrb[1].mxu0  ;;  %v1222_v36 = vsel %vm1218_vm0, %v3042_v34, -inf  ;;  %v3049_v37 = vpop.f32.mrb[0].mxu1 }
 0x41b   : >> { %1223 = vmax.xlane.f32.xlu1 %v1222_v36  ;;  %v1219_v38 = vsel %vm1218_vm0, %v1134_v35, -inf  ;;  %v1209_v39 = vpop.f32.mrb[1].mxu1  ;;  %v1228_v40 = vsel %vm1218_vm0, %v3049_v37, -inf }
 0x41c   : >> { %1220 = vmax.xlane.f32.xlu0 %v1219_v38  ;;  %v1225_v42 = vsel %vm1218_vm0, %v1209_v39, -inf }
 0x41f   : >> { %1229 = vmax.xlane.f32.xlu1 %v1228_v40 }
 0x420   : >> { %1226 = vmax.xlane.f32.xlu0 %v1225_v42 }
 0x4a8   : >> { %v1224_v53 = vpop.xlane.xlu1 %1223 }
 0x4a9   : >> { %v5111_v55 = vmax.f32 %v4498_v24, %v1224_v53   ;;  %v1221_v7 = vpop.xlane.xlu0 %1220 }
 0x4aa   : >> { %v5114_v57 = vmax.f32 %v4502_v25, %v1221_v7  }
 0x4ab   : >> { %v1236_v58 = vsub.f32 %v4498_v24, %v5111_v55  ;;  %v1248_v59 = vsub.f32 %v3042_v34, %v5111_v55 }
 0x4ac   : >> { %v1235_v60 = vsub.f32 %v4502_v25, %v5114_v57  ;;  %v1247_v61 = vsub.f32 %v1134_v35, %v5114_v57  ;;  %v1230_v62 = vpop.xlane.xlu1 %1229 }
 0x4ad   : >> { %v1253_v63 = vmul.f32 1.442695, %v1248_v59  ;;  %v5123_v3 = vmax.f32 %v4490_v22, %v1230_v62   ;;  %v1227_v5 = vpop.xlane.xlu0 %1226  ;;  %v1241_v34 = vmul.f32 1.442695, %v1236_v58 }
 0x4ae   : >> { %v1251_v6 = vmul.f32 1.442695, %v1247_v61  ;;  %v5126_v8 = vmax.f32 %v4494_v23, %v1227_v5   ;;  %v1239_v35 = vmul.f32 1.442695, %v1235_v60 }
 0x4af   : >> { %v5529_v10 = vmov %v5123_v3  ;;  %4014 = vpow2.f32 %v1253_v63 }
 0x4b0   : >> { %v5530_v20 = vmov %v5126_v8  ;;  %v1238_v21 = vsub.f32 %v4490_v22, %v5529_v10  ;;  %v1250_v9 = vsub.f32 %v3049_v37, %v5529_v10  ;;  %4016 = vpow2.f32 %v1251_v6 }
 0x4b1   : >> { %v1237_v11 = vsub.f32 %v4494_v23, %v5530_v20  ;;  %v1249_v12 = vsub.f32 %v1209_v39, %v5530_v20 }
 0x4b2   : >> { %v1257_v24 = vmul.f32 1.442695, %v1250_v9  ;;  %v1245_v36 = vmul.f32 1.442695, %v1238_v21 }
 0x4b3   : >> { %v1255_v25 = vmul.f32 1.442695, %v1249_v12  ;;  %v1243_v37 = vmul.f32 1.442695, %v1237_v11  ;;  %v5552_v12 = vmov (%p5152_p0), %v5114_v57 }
 0x4b4   : >> { %4018 = vpow2.f32 %v1257_v24  ;;  %v5542_v24 = vmov %v5111_v55 }
 0x4b5   : >> { %4020 = vpow2.f32 %v1255_v25  ;;  %v5543_v25 = vmov %v5114_v57 }
 0x4b6   : >> { %4022 = vpow2.f32 %v1241_v34 }
 0x4b7   : >> { %4024 = vpow2.f32 %v1239_v35 }
 0x4b8   : >> { %4026 = vpow2.f32 %v1245_v36 }
 0x4b9   : >> { %v4015_v28 = vpop.eup %4014  ;;  %4028 = vpow2.f32 %v1243_v37 }
 0x4ba   : >> { %v1266_v29 = vsel %vm1218_vm0, %v4015_v28, 0.0  ;;  %v4017_v30 = vpop.eup %4016 }
 0x4bb   : >> { %1267 = vadd.xlane.f32.xlu1 %v1266_v29  ;;  %3054 = vmatprep.mubr.msk.f32.mxu0 %vm1218_vm0, %v4017_v30  ;;  %v1263_v22 = vsel %vm1218_vm0, %v4017_v30, 0.0 }
 0x4bc   : >> { %1264 = vadd.xlane.f32.xlu0 %v1263_v22  ;;  %3055 = vmatmul.mubr.msk.f32.vlgmr.msra.gmra.mrb[2].mxu0 %vm1218_vm0, %v4015_v28  ;;  %v5540_v22 = vmov %v5529_v10 }
 0x4be   : >> { %v4019_v31 = vpop.eup %4018 }
 0x4bf   : >> { %v1272_v23 = vsel %vm1218_vm0, %v4019_v31, 0.0  ;;  %v4021_v32 = vpop.eup %4020 }
 0x4c0   : >> { %1273 = vadd.xlane.f32.xlu1 %v1272_v23  ;;  %3061 = vmatprep.mubr.msk.f32.mxu1 %vm1218_vm0, %v4021_v32  ;;  %v1269_v33 = vsel %vm1218_vm0, %v4021_v32, 0.0  ;;  %v4023_v38 = vpop.eup %4022  ;;  %v5541_v23 = vmov %v5530_v20 }
 0x4c1   : >> { %1270 = vadd.xlane.f32.xlu0 %v1269_v33  ;;  %3062 = vmatmul.mubr.msk.f32.vlgmr.msra.gmra.mrb[2].mxu1 %vm1218_vm0, %v4019_v31  ;;  %v4025_v39 = vpop.eup %4024  ;;  %v1260_v40 = vmul.f32 %v4482_v18, %v4023_v38  ;;  %v1280_v62 = vmul.f32 %v4466_v15, %v4023_v38 }
 0x4c2   : >> { %v4027_v42 = vpop.eup %4026  ;;  %v1259_v46 = vmul.f32 %v4486_v19, %v4025_v39  ;;  %v1279_v18 = vmul.f32 %v4470_v27, %v4025_v39 }
 0x4c3   : >> { %v4029_v49 = vpop.eup %4028  ;;  %v1262_v53 = vmul.f32 %v4474_v26, %v4027_v42  ;;  %v1282_v19 = vmul.f32 %v4458_v13, %v4027_v42 }
 0x4c4   : >> { %v1261_v59 = vmul.f32 %v4478_v17, %v4029_v49  ;;  %v1281_v21 = vmul.f32 %v4462_v14, %v4029_v49 }
 0x548   : >> { %v1268_v43 = vpop.xlane.xlu1 %1267 }
 0x549   : >> { %v1276_v44 = vadd.f32 %v1268_v43, %v1260_v40   ;;  %v1265_v50 = vpop.xlane.xlu0 %1264 }
 0x54a   : >> { %v1275_v51 = vadd.f32 %v1265_v50, %v1259_v46  }
 0x54d   : >> { %v1274_v7 = vpop.xlane.xlu1 %1273 }
 0x54e   : >> { %v1278_v58 = vadd.f32 %v1274_v7, %v1262_v53   ;;  %v1271_v60 = vpop.xlane.xlu0 %1270 }
 0x54f   : >> { %v1277_v61 = vadd.f32 %v1271_v60, %v1261_v59  }
 0x551   : >> { %v5537_v17 = vmov %v1277_v61 }
 0x58f   : >> { %v3056_v63 = vpop.f32.mrb[2].mxu0 }
 0x590   : >> { %v1446_v3 = vadd.f32 %v3056_v63, %v1280_v62   ;;  %v1355_v5 = vpop.f32.mrb[3].mxu0 }
 0x591   : >> { %v1445_v6 = vadd.f32 %v1355_v5, %v1279_v18   ;;  %v5538_v18 = vmov %v1276_v44 }
 0x592   : >> { %v5534_v15 = vmov %v1446_v3  ;;  %1044 = sbr.rel (!%p5152_p0) target bundleno = 825 (0x339), region = 151 }
 0x593   : >> { %v5535_v27 = vmov %v1445_v6  ;;  %v5546_v5 = vmov (%p5152_p0), %v1445_v6  ;;  %v5547_v6 = vmov (%p5152_p0), %v1278_v58 }
 0x594   : >> { %v3063_v8 = vpop.f32.mrb[2].mxu1 }
 0x595   : >> { %v1448_v9 = vadd.f32 %v3063_v8, %v1282_v19   ;;  %v1436_v26 = vpop.f32.mrb[3].mxu1  ;;  %v5539_v19 = vmov %v1275_v51  ;;  %v5548_v8 = vmov (%p5152_p0), %v1277_v61 }
 0x596   : >> { %v1447_v11 = vadd.f32 %v1436_v26, %v1281_v21   ;;  %v5536_v26 = vmov %v1278_v58  ;;  %v5549_v21 = vmov (%p5152_p0), %v1276_v44 }
 0x597   : >> { %v5532_v13 = vmov %v1448_v9  ;;  %v5544_v62 = vmov (%p5152_p0), %v1448_v9  ;;  %v5550_v9 = vmov (%p5152_p0), %v1275_v51 }
 0x598   : >> { %v5533_v14 = vmov %v1447_v11  ;;  %v5545_v63 = vmov (%p5152_p0), %v1447_v11  ;;  %v5551_v11 = vmov (%p5152_p0), %v5111_v55 }
 0x599 PF: > { %v1449_v13 = vld [vmem:[%s4989_s7] sm:$0xff]  ;;  %v1450_v14 = vld [vmem:[%s4989_s7 + $0x8] sm:$0xff]  ;;  %3068 = vmatprep.mubr.f32.mxu0 %v4987_v52  ;;  %v1461_v57 = vand.u32 127, %v564_v41  ;;  %v1459_v24 = vadd.s32 8, %v4957_v45  ;;  %v4568_v52 = vmov -1e+30   ;;  %v4554_v12 = vphi %v5034_v12, %v5552_v12   ;;  %v4550_v11 = vphi %v5032_v11, %v5551_v11   ;;  %v4546_v20 = vphi %v5030_v20, %v5530_v20   ;;  %v4542_v10 = vphi %v5028_v10, %v5529_v10   ;;  %v4538_v9 = vphi %v5026_v9, %v5550_v9   ;;  %v4534_v21 = vphi %v5024_v21, %v5549_v21   ;;  %v4530_v8 = vphi %v5022_v8, %v5548_v8   ;;  %v4526_v6 = vphi %v5020_v6, %v5547_v6   ;;  %v4522_v5 = vphi %v5018_v5, %v5546_v5   ;;  %v4518_v3 = vphi %v5016_v3, %v1446_v3   ;;  %v4514_v63 = vphi %v5014_v63, %v5545_v63   ;;  %v4510_v62 = vphi %v5012_v62, %v5544_v62  }
 0x59a   : > { %v1451_v15 = vld [vmem:[%s4989_s7 + $0x20] sm:$0xff]  ;;  %v3300_v27 = vpack.c.bf16 %v1450_v14, %v1449_v13  ;;  %v1452_v17 = vld [vmem:[%s4989_s7 + $0x28] sm:$0xff]  ;;  %vm1616_vm3 = vcmask 130048   ;;  %s5553_s16 = sld [smem:[#allocation30_spill]]  ;;  %s5554_s10 = sld [smem:[#allocation31_spill]] }
 0x59b   : > { %v3304_v55 = vpack.c.bf16 %v1452_v17, %v1451_v15  ;;  %vm1462_vm1 = vcmp.ge.s32.totalorder %v4957_v45, %v1461_v57  ;;  %vm1463_vm2 = vcmp.ge.s32.totalorder %v1459_v24, %v1461_v57  ;;  %v1864_v24 = vld [vmem:[#allocation12 + $0x8] sm:$0xff]  ;;  %s5555_s7 = sld [smem:[#allocation33_spill]]  ;;  %s5556_s3 = sld [smem:[#allocation24_spill]] }
 0x59c   : > { %3301 = vmatprep.subr.bf16.mxu0 %v3300_v27  ;;  %v1464_v25 = vsel %vm1462_vm1, 0.0, %v4568_v52  ;;  %v1465_v29 = vsel %vm1463_vm2, 0.0, %v4568_v52  ;;  %v1866_v52 = vld [vmem:[#allocation12 + $0x18] sm:$0xff]  ;;  %s5557_s6 = sld [smem:[#allocation35_spill]]  ;;  %s3003_s4 = sshll.u32 %s4438_s24, 2 }
 0x59d   : > { %3303 = vmatpush3.bf16.xpose.msra.mxu0 %v3300_v27  ;;  %s5558_s25 = sld [smem:[#allocation36_spill]]  ;;  %s2745_s13 = scalar_lea.sflag [#allocation8], %s4902_s8 }
 0x59e   : > { %3305 = vmatprep.subr.bf16.mxu0 %v3304_v55  ;;  %v1453_v34 = vld [vmem:[%s5001_s17] sm:$0xff]  ;;  %v1454_v35 = vld [vmem:[%s5001_s17 + $0x8] sm:$0xff]  ;;  %p5560_p5 = scmp.ne.s32.totalorder %s5524_s15, 0  ;;  %s4569_s9 = smov [#allocation17]  }
 0x59f   : > { %v3308_v36 = vpack.c.bf16 %v1454_v35, %v1453_v34  ;;  %v1455_v37 = vld [vmem:[%s5001_s17 + $0x20] sm:$0xff]  ;;  %v1456_v38 = vld [vmem:[%s5001_s17 + $0x28] sm:$0xff]  ;;  %v1873_v34 = vld [vmem:[#allocation12 + $0x50] sm:$0xff] }
 0x5a0   : > { %v3312_v39 = vpack.c.bf16 %v1456_v38, %v1455_v37  ;;  %v1876_v35 = vld [vmem:[#allocation12 + $0x68] sm:$0xff] }
 0x5a1   : > { %s2998_s2 = sshll.u32 %s5556_s3, 3  ;;  %s4248_s3 = sshll.u32 %s4569_s9, 4  ;;  %s4249_s3 = int_to_ptr.vmem [resolvable:$false] %s4248_s3 }
 0x5a2   : > { %s2758_s29 = sadd.s32 %s3003_s4, %s2998_s2  ;;  %s4250_s14 = scalar_lea.vmem %s4249_s3, 1024 }
 0x5a3   : > { %s2999_s11 = sshll.u32 %s2758_s29, 7 }
 0x5a4   : > { %3069 = vmatmul.mubr.f32.vlgmr.msra.gmra.mrb[0].mxu0 %v4995_v56  ;;  %s5409_s30 = scalar_lea.hbm %s5558_s25, %s2999_s11 }
 0x5a5   : > { %3307 = vmatpush3.bf16.xpose.msra.mxu0 %v3304_v55  ;;  %3075 = vmatprep.mubr.f32.mxu0 %v4992_v54 }
 0x5a6   : > { %3309 = vmatprep.subr.bf16.mxu0 %v3308_v36 }
 0x5ac   : > { %3076 = vmatmul.mubr.f32.vlgmr.msra.gmra.mrb[2].mxu0 %v4998_v16 }
 0x5ad   : > { %3311 = vmatpush3.bf16.msra.mxu0 %v3308_v36  ;;  %v1878_v36 = vld [vmem:[#allocation12 + $0x78] sm:$0xff] }
 0x5ae   : > { %3313 = vmatprep.subr.bf16.mxu0 %v3312_v39  ;;  %v3328_v38 = vpack.c.bf16 %v1878_v36, %v1876_v35  ;;  %v1904_v35 = vld [vmem:[#allocation12 + $0x148] sm:$0xff]  ;;  %v1906_v36 = vld [vmem:[#allocation12 + $0x158] sm:$0xff] }
 0x677   : > { %v3070_v28 = vpop.f32.mrb[0].mxu0 }
 0x678   : > { %v1532_v30 = vpop.f32.mrb[1].mxu0  ;;  %v1538_v22 = vadd.f32 %v3070_v28, %v1465_v29  ;;  %v3316_v28 = vpack.c.bf16 %v1866_v52, %v1864_v24  ;;  %v1894_v24 = vld [vmem:[#allocation12 + $0xf8] sm:$0xff] }
 0x679   : > { %v1533_v56 = vadd.f32 %v1532_v30, %v1464_v25  ;;  %v1868_v30 = vld [vmem:[#allocation12 + $0x28] sm:$0xff] }
 0x67a   : > { %v1620_v16 = vsel %vm1616_vm3, %v1538_v22, -inf }
 0x67b   : > { %v1617_v54 = vsel %vm1616_vm3, %v1533_v56, -inf }
 0x67c   : > { %1618 = vmax.xlane.f32.xlu0 %v1617_v54 }
 0x67f   : > { %v3077_v41 = vpop.f32.mrb[2].mxu0 }
 0x680   : > { %v1607_v45 = vpop.f32.mrb[3].mxu0  ;;  %1621 = vmax.xlane.f32.xlu0 %v1620_v16  ;;  %v1613_v23 = vadd.f32 %v3077_v41, %v1465_v29  ;;  %v1865_v29 = vld [vmem:[#allocation12 + $0x10] sm:$0xff]  ;;  %v1867_v41 = vld [vmem:[#allocation12 + $0x20] sm:$0xff] }
 0x681   : > { %v1608_v31 = vadd.f32 %v1607_v45, %v1464_v25  ;;  %v1863_v25 = vld [vmem:[#allocation12] sm:$0xff]  ;;  %v1869_v16 = vld [vmem:[#allocation12 + $0x30] sm:$0xff]  ;;  %v1872_v45 = vld [vmem:[#allocation12 + $0x48] sm:$0xff] }
 0x682   : > { %v1626_v33 = vsel %vm1616_vm3, %v1613_v23, -inf }
 0x683   : > { %v1623_v32 = vsel %vm1616_vm3, %v1608_v31, -inf }
 0x684   : > { %1624 = vmax.xlane.f32.xlu1 %v1623_v32 }
 0x688   : > { %1627 = vmax.xlane.f32.xlu1 %v1626_v33  ;;  %v1871_v33 = vld [vmem:[#allocation12 + $0x40] sm:$0xff] }
 0x689   : > { %v3326_v37 = vpack.c.bf16 %v1873_v34, %v1871_v33  ;;  %v1899_v33 = vld [vmem:[#allocation12 + $0x120] sm:$0xff]  ;;  %v1901_v34 = vld [vmem:[#allocation12 + $0x130] sm:$0xff] }
 0x709   : > { %v1619_v40 = vpop.xlane.xlu0 %1618 }
 0x70a   : > { %v5272_v42 = vmax.f32 %v4554_v12, %v1619_v40  ;;  %v1877_v40 = vld [vmem:[#allocation12 + $0x70] sm:$0xff] }
 0x70c   : > { %v1645_v43 = vsub.f32 %v1533_v56, %v5272_v42  ;;  %v1870_v56 = vld [vmem:[#allocation12 + $0x38] sm:$0xff] }
 0x70d   : > { %v1622_v44 = vpop.xlane.xlu0 %1621  ;;  %v3320_v54 = vpack.c.bf16 %v1870_v56, %v1868_v30  ;;  %v1896_v30 = vld [vmem:[#allocation12 + $0x108] sm:$0xff]  ;;  %v1898_v56 = vld [vmem:[#allocation12 + $0x118] sm:$0xff] }
 0x70e   : > { %v1649_v46 = vmul.f32 1.442695, %v1645_v43  ;;  %v5276_v49 = vmax.f32 %v4550_v11, %v1622_v44  ;;  %v1880_v43 = vld [vmem:[#allocation12 + $0x88] sm:$0xff]  ;;  %v1882_v44 = vld [vmem:[#allocation12 + $0x98] sm:$0xff] }
 0x710   : > { %v1646_v50 = vsub.f32 %v1538_v22, %v5276_v49  ;;  %4030 = vpow2.f32 %v1649_v46  ;;  %v3318_v22 = vpack.c.bf16 %v1865_v29, %v1863_v25  ;;  %v1893_v29 = vld [vmem:[#allocation12 + $0xf0] sm:$0xff] }
 0x711   : > { %v1625_v51 = vpop.xlane.xlu1 %1624 }
 0x712   : > { %v1651_v53 = vmul.f32 1.442695, %v1646_v50  ;;  %v5280_v7 = vmax.f32 %v4546_v20, %v1625_v51  ;;  %v3332_v50 = vpack.c.bf16 %v1882_v44, %v1880_v43  ;;  %v1879_v51 = vld [vmem:[#allocation12 + $0x80] sm:$0xff]  ;;  %v1908_v43 = vld [vmem:[#allocation12 + $0x168] sm:$0xff]  ;;  %v1910_v44 = vld [vmem:[#allocation12 + $0x178] sm:$0xff] }
 0x714   : > { %v1647_v58 = vsub.f32 %v1608_v31, %v5280_v7  ;;  %4032 = vpow2.f32 %v1651_v53  ;;  %v1874_v31 = vld [vmem:[#allocation12 + $0x58] sm:$0xff]  ;;  %v1881_v53 = vld [vmem:[#allocation12 + $0x90] sm:$0xff] }
 0x715   : > { %v1628_v59 = vpop.xlane.xlu1 %1627  ;;  %v3324_v32 = vpack.c.bf16 %v1874_v31, %v1872_v45  ;;  %v1900_v45 = vld [vmem:[#allocation12 + $0x128] sm:$0xff]  ;;  %v1902_v31 = vld [vmem:[#allocation12 + $0x138] sm:$0xff] }
 0x716   : > { %v1653_v60 = vmul.f32 1.442695, %v1647_v58  ;;  %v5284_v61 = vmax.f32 %v4542_v10, %v1628_v59  ;;  %v1884_v58 = vld [vmem:[#allocation12 + $0xa8] sm:$0xff]  ;;  %v1886_v59 = vld [vmem:[#allocation12 + $0xb8] sm:$0xff] }
 0x718   : > { %v1648_v18 = vsub.f32 %v1613_v23, %v5284_v61  ;;  %4034 = vpow2.f32 %v1653_v60  ;;  %v3322_v23 = vpack.c.bf16 %v1869_v16, %v1867_v41  ;;  %v3334_v60 = vpack.c.bf16 %v1881_v53, %v1879_v51  ;;  %v1895_v41 = vld [vmem:[#allocation12 + $0x100] sm:$0xff]  ;;  %v1897_v16 = vld [vmem:[#allocation12 + $0x110] sm:$0xff] }
 0x719   : > { %v1907_v51 = vld [vmem:[#allocation12 + $0x160] sm:$0xff]  ;;  %v1909_v53 = vld [vmem:[#allocation12 + $0x170] sm:$0xff] }
 0x71a   : > { %v1655_v19 = vmul.f32 1.442695, %v1648_v18  ;;  %v4031_v26 = vpop.eup %4030  ;;  %v3336_v18 = vpack.c.bf16 %v1886_v59, %v1884_v58  ;;  %v1912_v58 = vld [vmem:[#allocation12 + $0x188] sm:$0xff]  ;;  %v1914_v59 = vld [vmem:[#allocation12 + $0x198] sm:$0xff] }
 0x71b   : > { %3082 = vmatprep.mubr.msk.f32.mxu0 %vm1616_vm3, %v4031_v26  ;;  %v1661_v13 = vsel %vm1616_vm3, %v4031_v26, 0.0  ;;  %v1885_v26 = vld [vmem:[#allocation12 + $0xb0] sm:$0xff] }
 0x71c   : > { %4036 = vpow2.f32 %v1655_v19  ;;  %1662 = vadd.xlane.f32.xlu1 %v1661_v13  ;;  %v1883_v19 = vld [vmem:[#allocation12 + $0xa0] sm:$0xff]  ;;  %v1888_v13 = vld [vmem:[#allocation12 + $0xc8] sm:$0xff] }
 0x71e   : > { %v4033_v14 = vpop.eup %4032 }
 0x71f   : > { %3083 = vmatmul.mubr.msk.f32.vlgmr.msra.gmra.mrb[4].mxu0 %vm1616_vm3, %v4033_v14  ;;  %v1664_v15 = vsel %vm1616_vm3, %v4033_v14, 0.0  ;;  %v1890_v14 = vld [vmem:[#allocation12 + $0xd8] sm:$0xff] }
 0x720   : > { %1665 = vadd.xlane.f32.xlu1 %v1664_v15  ;;  %3315 = vmatpush3.bf16.msra.mxu0 %v3312_v39  ;;  %v1875_v39 = vld [vmem:[#allocation12 + $0x60] sm:$0xff]  ;;  %v3338_v15 = vpack.c.bf16 %v1885_v26, %v1883_v19  ;;  %v1913_v26 = vld [vmem:[#allocation12 + $0x190] sm:$0xff] }
 0x721   : > { %3317 = vmatprep.subr.bf16.mxu0 %v3316_v28  ;;  %v3330_v46 = vpack.c.bf16 %v1877_v40, %v1875_v39  ;;  %v1891_v28 = vld [vmem:[#allocation12 + $0xe0] sm:$0xff]  ;;  %v1905_v40 = vld [vmem:[#allocation12 + $0x150] sm:$0xff] }
 0x722   : > { %v4035_v27 = vpop.eup %4034  ;;  %v1903_v39 = vld [vmem:[#allocation12 + $0x140] sm:$0xff] }
 0x723   : > { %3089 = vmatprep.mubr.msk.f32.mxu0 %vm1616_vm3, %v4035_v27  ;;  %v1667_v17 = vsel %vm1616_vm3, %v4035_v27, 0.0  ;;  %v3340_v27 = vpack.c.bf16 %v1890_v14, %v1888_v13  ;;  %v1911_v19 = vld [vmem:[#allocation12 + $0x180] sm:$0xff]  ;;  %v1916_v14 = vld [vmem:[#allocation12 + $0x1a8] sm:$0xff] }
 0x724   : > { %1668 = vadd.xlane.f32.xlu0 %v1667_v17  ;;  %v1887_v17 = vld [vmem:[#allocation12 + $0xc0] sm:$0xff]  ;;  %v3366_v13 = vpack.c.bf16 %v1913_v26, %v1911_v19 }
 0x726   : > { %v4037_v55 = vpop.eup %4036 }
 0x727   : > { %3090 = vmatmul.mubr.msk.f32.vlgmr.msra.gmra.mrb[6].mxu0 %vm1616_vm3, %v4037_v55  ;;  %v1670_v57 = vsel %vm1616_vm3, %v4037_v55, 0.0  ;;  %v1889_v55 = vld [vmem:[#allocation12 + $0xd0] sm:$0xff] }
 0x728   : > { %1671 = vadd.xlane.f32.xlu0 %v1670_v57  ;;  %3319 = vmatpush1.bf16.msra.mxu0 %v3318_v22  ;;  %v1892_v57 = vld [vmem:[#allocation12 + $0xe8] sm:$0xff]  ;;  %v3342_v52 = vpack.c.bf16 %v1889_v55, %v1887_v17  ;;  %v3346_v22 = vpack.c.bf16 %v1893_v29, %v1891_v28  ;;  %v1915_v17 = vld [vmem:[#allocation12 + $0x1a0] sm:$0xff]  ;;  %v1917_v55 = vld [vmem:[#allocation12 + $0x1b0] sm:$0xff] }
 0x729   : > { %3321 = vmatprep.subr.bf16.mxu0 %v3320_v54  ;;  %v3344_v25 = vpack.c.bf16 %v1894_v24, %v1892_v57  ;;  %v3348_v54 = vpack.c.bf16 %v1898_v56, %v1896_v30  ;;  %v3370_v57 = vpack.c.bf16 %v1917_v55, %v1915_v17  ;;  %v1920_v24 = vld [vmem:[#allocation12 + $0x1c8] sm:$0xff]  ;;  %v1919_v28 = vld [vmem:[#allocation12 + $0x1c0] sm:$0xff]  ;;  %v1921_v29 = vld [vmem:[#allocation12 + $0x1d0] sm:$0xff] }
 0x72a   : > { %v3374_v30 = vpack.c.bf16 %v1921_v29, %v1919_v28  ;;  %v1924_v56 = vld [vmem:[#allocation12 + $0x1e8] sm:$0xff] }
 0x72c   : > { %3323 = vmatpush1.bf16.msra.mxu0 %v3322_v23  ;;  %v3350_v23 = vpack.c.bf16 %v1897_v16, %v1895_v41  ;;  %v1923_v41 = vld [vmem:[#allocation12 + $0x1e0] sm:$0xff]  ;;  %v1925_v16 = vld [vmem:[#allocation12 + $0x1f0] sm:$0xff] }
 0x72d   : > { %3325 = vmatprep.subr.bf16.mxu0 %v3324_v32  ;;  %v3352_v32 = vpack.c.bf16 %v1902_v31, %v1900_v45  ;;  %v3378_v45 = vpack.c.bf16 %v1925_v16, %v1923_v41  ;;  %v1634_v31 = vsub.f32 %v4550_v11, %v5276_v49 }
 0x730   : > { %3327 = vmatpush1.bf16.msra.mxu0 %v3326_v37  ;;  %v3354_v37 = vpack.c.bf16 %v1901_v34, %v1899_v33  ;;  %v1636_v34 = vsub.f32 %v4542_v10, %v5284_v61 }
 0x731   : > { %3329 = vmatprep.subr.bf16.mxu0 %v3328_v38  ;;  %v3356_v38 = vpack.c.bf16 %v1906_v36, %v1904_v35  ;;  %v1635_v35 = vsub.f32 %v4546_v20, %v5280_v7 }
 0x732   : > { %v1643_v36 = vmul.f32 1.442695, %v1636_v34 }
 0x734   : > { %3331 = vmatpush1.bf16.msra.mxu0 %v3330_v46  ;;  %v3358_v46 = vpack.c.bf16 %v1905_v40, %v1903_v39 }
 0x735   : > { %3333 = vmatprep.subr.bf16.mxu0 %v3332_v50  ;;  %v3360_v50 = vpack.c.bf16 %v1910_v44, %v1908_v43 }
 0x738   : > { %3335 = vmatpush1.bf16.msra.mxu0 %v3334_v60  ;;  %v3362_v60 = vpack.c.bf16 %v1909_v53, %v1907_v51 }
 0x739   : > { %3337 = vmatprep.subr.bf16.mxu0 %v3336_v18  ;;  %v3364_v18 = vpack.c.bf16 %v1914_v59, %v1912_v58 }
 0x73c   : > { %3339 = vmatpush1.bf16.msra.mxu0 %v3338_v15  ;;  %v1918_v15 = vld [vmem:[#allocation12 + $0x1b8] sm:$0xff] }
 0x73d   : > { %3341 = vmatprep.subr.bf16.mxu0 %v3340_v27  ;;  %v3368_v27 = vpack.c.bf16 %v1918_v15, %v1916_v14 }
 0x740   : > { %3343 = vmatpush1.bf16.msra.mxu0 %v3342_v52  ;;  %v1922_v52 = vld [vmem:[#allocation12 + $0x1d8] sm:$0xff] }
 0x741   : > { %3345 = vmatprep.subr.bf16.mxu0 %v3344_v25  ;;  %v3372_v25 = vpack.c.bf16 %v1922_v52, %v1920_v24  ;;  %v1927_v24 = vld [vmem:[%s5473_s5] sm:$0x3] }
 0x742   : > { %v1936_v52 = vrot.slane %v1927_v24, %v4960_v47 }
 0x744   : > { %3347 = vmatpush1.bf16.msra.mxu0 %v3346_v22  ;;  %v1926_v22 = vld [vmem:[#allocation12 + $0x1f8] sm:$0xff] }
 0x745   : > { %3349 = vmatprep.subr.bf16.mxu0 %v3348_v54  ;;  %v3376_v54 = vpack.c.bf16 %v1926_v22, %v1924_v56 }
 0x748   : > { %3351 = vmatpush1.bf16.msra.mxu0 %v3350_v23  ;;  %v1633_v23 = vsub.f32 %v4554_v12, %v5272_v42 }
 0x749   : > { %3353 = vmatprep.subr.bf16.mxu0 %v3352_v32  ;;  %v1639_v32 = vmul.f32 1.442695, %v1634_v31 }
 0x74a   : > { %v1637_v33 = vmul.f32 1.442695, %v1633_v23 }
 0x74b   : > { %4038 = vpow2.f32 %v1639_v32  ;;  %v2087_v32 = vld [vmem:[#allocation14 + $0x28] sm:$0xff] }
 0x74c   : > { %3355 = vmatpush1.bf16.msra.mxu0 %v3354_v37  ;;  %4040 = vpow2.f32 %v1637_v33  ;;  %v1641_v37 = vmul.f32 1.442695, %v1635_v35  ;;  %v2326_v33 = vld [vmem:[#allocation14 + $0x18] sm:$0xff] }
 0x74d   : > { %3357 = vmatprep.subr.bf16.mxu0 %v3356_v38  ;;  %4042 = vpow2.f32 %v1643_v36  ;;  %v2328_v35 = vld [vmem:[#allocation14 + $0x38] sm:$0xff]  ;;  %v2084_v36 = vld [vmem:[#allocation14] sm:$0xff] }
 0x74e   : > { %4044 = vpow2.f32 %v1641_v37  ;;  %v2086_v37 = vld [vmem:[#allocation14 + $0x20] sm:$0xff] }
 0x750   : > { %3359 = vmatpush1.bf16.msra.mxu0 %v3358_v46 }
 0x751   : > { %3361 = vmatprep.subr.bf16.mxu0 %v3360_v50 }
 0x754   : > { %3363 = vmatpush1.bf16.msra.mxu0 %v3362_v60 }
 0x755   : > { %3365 = vmatprep.subr.bf16.mxu0 %v3364_v18  ;;  %v4039_v39 = vpop.eup %4038 }
 0x756   : > { %v4041_v11 = vpop.eup %4040  ;;  %v1658_v12 = vmul.f32 %v4534_v21, %v4039_v39  ;;  %v1678_v53 = vmul.f32 %v4518_v3, %v4039_v39  ;;  %v3382_v39 = vpack.c.bf16 %v2086_v37, %v2084_v36 }
 0x757   : > { %v1657_v42 = vmul.f32 %v4538_v9, %v4041_v11  ;;  %v4043_v10 = vpop.eup %4042  ;;  %v1677_v9 = vmul.f32 %v4522_v5, %v4041_v11  ;;  %v2325_v11 = vld [vmem:[#allocation14 + $0x10] sm:$0xff] }
 0x758   : > { %3367 = vmatpush1.bf16.msra.mxu0 %v3366_v13  ;;  %v4045_v61 = vpop.eup %4044  ;;  %v1660_v7 = vmul.f32 %v4526_v6, %v4043_v10  ;;  %v1680_v6 = vmul.f32 %v4510_v62, %v4043_v10  ;;  %v1932_v62 = vrot.slane %v1927_v24, %v4963_v48  ;;  %v2088_v10 = vld [vmem:[#allocation14 + $0x40] sm:$0xff]  ;;  %v2339_v24 = vld [vmem:[#allocation14 + $0xf0] sm:$0xff] }
 0x759   : > { %3369 = vmatprep.subr.bf16.mxu0 %v3368_v27  ;;  %v1659_v46 = vmul.f32 %v4530_v8, %v4045_v61  ;;  %v1679_v8 = vmul.f32 %v4514_v63, %v4045_v61  ;;  %v2090_v61 = vld [vmem:[#allocation14 + $0x60] sm:$0xff] }
 0x75c   : > { %3371 = vmatpush1.bf16.msra.mxu0 %v3370_v57 }
 0x75d   : > { %3373 = vmatprep.subr.bf16.mxu0 %v3372_v25 }
 0x760   : > { %3375 = vmatpush1.bf16.msra.mxu0 %v3374_v30 }
 0x761   : > { %3377 = vmatprep.subr.bf16.mxu0 %v3376_v54 }
 0x764   : > { %3379 = vmatpush1.bf16.msra.mxu0 %v3378_v45 }
 0x7a9   : > { %v1663_v38 = vpop.xlane.xlu1 %1662 }
 0x7aa   : > { %v1673_v44 = vadd.f32 %v1663_v38, %v1657_v42  ;;  %v3444_v38 = vpack.c.bf16 %v2328_v35, %v2326_v33  ;;  %v2330_v42 = vld [vmem:[#allocation14 + $0x58] sm:$0xff] }
 0x7ab   : > { %v2346_v33 = vld [vmem:[#allocation14 + $0x158] sm:$0xff] }
 0x7ac   : > { %3445 = vmatprep.subr.bf16.mxu0 %v3444_v38  ;;  %v2104_v38 = vld [vmem:[#allocation14 + $0x140] sm:$0xff] }
 0x7ad   : > { %v1666_v49 = vpop.xlane.xlu1 %1665 }
 0x7ae   : > { %v1674_v43 = vadd.f32 %v1666_v49, %v1658_v12  ;;  %v2089_v49 = vld [vmem:[#allocation14 + $0x48] sm:$0xff] }
 0x7af   : > { %v2091_v12 = vld [vmem:[#allocation14 + $0x68] sm:$0xff] }
 0x7b0   : > { %4046 = vrcp.f32 %v1674_v43  ;;  %v3384_v43 = vpack.c.bf16 %v2091_v12, %v2089_v49  ;;  %v2347_v49 = vld [vmem:[#allocation14 + $0x170] sm:$0xff]  ;;  %v2111_v12 = vld [vmem:[#allocation14 + $0x1a8] sm:$0xff] }
 0x7b1   : > { %v1669_v40 = vpop.xlane.xlu0 %1668  ;;  %4048 = vrcp.f32 %v1673_v44 }
 0x7b2   : > { %v1675_v51 = vadd.f32 %v1669_v40, %v1659_v46  ;;  %v2332_v40 = vld [vmem:[#allocation14 + $0x78] sm:$0xff]  ;;  %v2331_v46 = vld [vmem:[#allocation14 + $0x70] sm:$0xff] }
 0x7b3   : > { %v3448_v44 = vpack.c.bf16 %v2332_v40, %v2330_v42  ;;  %v2350_v42 = vld [vmem:[#allocation14 + $0x198] sm:$0xff] }
 0x7b4   : > { %v2352_v40 = vld [vmem:[#allocation14 + $0x1b8] sm:$0xff] }
 0x7b5   : > { %v1672_v20 = vpop.xlane.xlu0 %1671 }
 0x7b6   : > { %v1676_v50 = vadd.f32 %v1672_v20, %v1660_v7  ;;  %v2329_v20 = vld [vmem:[#allocation14 + $0x50] sm:$0xff]  ;;  %v3386_v7 = vpack.c.bf16 %v2090_v61, %v2088_v10  ;;  %v2108_v61 = vld [vmem:[#allocation14 + $0x180] sm:$0xff] }
 0x7b8   : > { %4050 = vrcp.f32 %v1676_v50  ;;  %v2093_v50 = vld [vmem:[#allocation14 + $0x88] sm:$0xff] }
 0x7b9   : > { %4052 = vrcp.f32 %v1675_v51  ;;  %v2095_v51 = vld [vmem:[#allocation14 + $0xa8] sm:$0xff] }
 0x7ba   : > { %v4047_v60 = vpop.eup %4046 }
 0x7bb   : > { %v4049_v19 = vpop.eup %4048 }
 0x7c2   : > { %v4051_v3 = vpop.eup %4050 }
 0x7c3   : > { %v4053_v55 = vpop.eup %4052 }
 0x7f2   : > { %v3084_v21 = vpop.f32.mrb[4].mxu0 }
 0x7f3   : > { %v1844_v58 = vadd.f32 %v3084_v21, %v1678_v53  ;;  %v1753_v59 = vpop.f32.mrb[5].mxu0  ;;  %v3450_v53 = vpack.c.bf16 %v2331_v46, %v2329_v20  ;;  %v3388_v21 = vpack.c.bf16 %v2095_v51, %v2093_v50  ;;  %v2110_v20 = vld [vmem:[#allocation14 + $0x1a0] sm:$0xff]  ;;  %v3468_v46 = vpack.c.bf16 %v2352_v40, %v2350_v42  ;;  %v2351_v50 = vld [vmem:[#allocation14 + $0x1b0] sm:$0xff]  ;;  %v2113_v51 = vld [vmem:[#allocation14 + $0x1c8] sm:$0xff] }
 0x7f4   : > { %v1843_v18 = vadd.f32 %v1753_v59, %v1677_v9  ;;  %v2334_v9 = vld [vmem:[#allocation14 + $0x98] sm:$0xff]  ;;  %v2092_v59 = vld [vmem:[#allocation14 + $0x80] sm:$0xff] }
 0x7f5   : > { %v1850_v26 = vmul.f32 %v4047_v60, %v1844_v58  ;;  %v2336_v58 = vld [vmem:[#allocation14 + $0xb8] sm:$0xff] }
 0x7f6   : > { %v1848_v13 = vmul.f32 %v4049_v19, %v1843_v18  ;;  %v3452_v60 = vpack.c.bf16 %v2336_v58, %v2334_v9  ;;  %v2094_v18 = vld [vmem:[#allocation14 + $0xa0] sm:$0xff]  ;;  %v2333_v19 = vld [vmem:[#allocation14 + $0x90] sm:$0xff]  ;;  %v2356_v9 = vld [vmem:[#allocation14 + $0x1f8] sm:$0xff]  ;;  %v3406_v58 = vpack.c.bf16 %v2110_v20, %v2108_v61 }
 0x7fa   : > { %v3091_v14 = vpop.f32.mrb[6].mxu0 }
 0x7fb   : > { %v1846_v15 = vadd.f32 %v3091_v14, %v1680_v6  ;;  %v1834_v27 = vpop.f32.mrb[7].mxu0  ;;  %v2097_v6 = vld [vmem:[#allocation14 + $0xc8] sm:$0xff] }
 0x7fc   : > { %v1845_v17 = vadd.f32 %v1834_v27, %v1679_v8  ;;  %v2099_v14 = vld [vmem:[#allocation14 + $0xe8] sm:$0xff]  ;;  %v2338_v8 = vld [vmem:[#allocation14 + $0xd8] sm:$0xff] }
 0x7fd   : > { %v1854_v57 = vmul.f32 %v4051_v3, %v1846_v15  ;;  %v3392_v27 = vpack.c.bf16 %v2099_v14, %v2097_v6  ;;  %v2340_v3 = vld [vmem:[#allocation14 + $0xf8] sm:$0xff]  ;;  %v2355_v6 = vld [vmem:[#allocation14 + $0x1f0] sm:$0xff]  ;;  %v2117_v14 = vld [vmem:[#allocation14 + $0x208] sm:$0xff] }
 0x7fe   : > { %v1852_v5 = vmul.f32 %v4053_v55, %v1845_v17  ;;  %v2096_v17 = vld [vmem:[#allocation14 + $0xc0] sm:$0xff] }
 0x7ff   : > { %v2098_v55 = vld [vmem:[#allocation14 + $0xe0] sm:$0xff] }
 0x800   : > { %2003 = vmatprep.mubr.f32.mxu0 %v1852_v5  ;;  %v2337_v5 = vld [vmem:[#allocation14 + $0xd0] sm:$0xff] }
 0x801   : > { %2004 = vmatmul.mubr.f32.vlgmr.msra.gmra.mrb[8].mxu0 %v1848_v13  ;;  %v3390_v13 = vpack.c.bf16 %v2094_v18, %v2092_v59  ;;  %v2112_v18 = vld [vmem:[#allocation14 + $0x1c0] sm:$0xff] }
 0x802   : > { %2009 = vmatprep.mubr.f32.mxu0 %v1854_v57  ;;  %v3456_v57 = vpack.c.bf16 %v2340_v3, %v2338_v8  ;;  %v2119_v8 = vld [vmem:[#allocation14 + $0x228] sm:$0xff] }
 0x805   : > { %2010 = vmatmul.mubr.f32.gmra.mrb[10].mxu0 %v1850_v26  ;;  %v2335_v26 = vld [vmem:[#allocation14 + $0xb0] sm:$0xff] }
 0x806   : > { %v3454_v15 = vpack.c.bf16 %v2335_v26, %v2333_v19  ;;  %v2114_v19 = vld [vmem:[#allocation14 + $0x1e0] sm:$0xff]  ;;  %v2353_v26 = vld [vmem:[#allocation14 + $0x1d0] sm:$0xff] }
 0x807   : > { %v3410_v3 = vpack.c.bf16 %v2114_v19, %v2112_v18  ;;  %v2131_v18 = vld [vmem:[#allocation14 + $0x2e8] sm:$0xff]  ;;  %v2370_v19 = vld [vmem:[#allocation14 + $0x2d8] sm:$0xff] }
 0x8d4   : > { %v2005_v63 = vpop.f32.mrb[8].mxu0 }
 0x8d5   : > { %v2006_v25 = vadd.f32 %v2005_v63, %v1932_v62  ;;  %v2007_v28 = vpop.f32.mrb[9].mxu0  ;;  %v2342_v63 = vld [vmem:[#allocation14 + $0x118] sm:$0xff] }
 0x8d6   : > { %v2008_v29 = vadd.f32 %v2007_v28, %v1936_v52  ;;  %v3394_v28 = vpack.c.bf16 %v2098_v55, %v2096_v17  ;;  %v3474_v17 = vpack.c.bf16 %v2355_v6, %v2353_v26  ;;  %v3412_v55 = vpack.c.bf16 %v2119_v8, %v2117_v14  ;;  %v2128_v6 = vld [vmem:[#allocation14 + $0x2c0] sm:$0xff] }
 0x8d7   : > { %v5317_v30 = vadd.f32 %v2006_v25, %v4924_v0  ;;  %v2344_v25 = vld [vmem:[#allocation14 + $0x138] sm:$0xff]  ;;  %v2130_v14 = vld [vmem:[#allocation14 + $0x2e0] sm:$0xff] }
 0x8d8   : > { %v5320_v56 = vadd.f32 %v2008_v29, %v4926_v1  ;;  %v2011_v22 = vpop.f32.mrb[10].mxu0  ;;  %v2085_v1 = vld [vmem:[#allocation14 + $0x8] sm:$0xff]  ;;  %v3458_v29 = vpack.c.bf16 %v2339_v24, %v2337_v5  ;;  %v2118_v5 = vld [vmem:[#allocation14 + $0x220] sm:$0xff]  ;;  %v2357_v24 = vld [vmem:[#allocation14 + $0x210] sm:$0xff] }
 0x8d9   : > { %v2012_v54 = vadd.f32 %v2011_v22, %v1932_v62  ;;  %v2013_v41 = vpop.f32.mrb[11].mxu0  ;;  %v3380_v34 = vpack.c.bf16 %v2087_v32, %v2085_v1  ;;  %v2101_v62 = vld [vmem:[#allocation14 + $0x108] sm:$0xff] }
 0x8da   : > { %v2014_v16 = vadd.f32 %v2013_v41, %v1936_v52  ;;  %v2022_v45 = vadd.f32 %v5320_v56, %v5317_v30  ;;  %v2103_v52 = vld [vmem:[#allocation14 + $0x128] sm:$0xff]  ;;  %v2102_v41 = vld [vmem:[#allocation14 + $0x120] sm:$0xff] }
 0x8db   : > { %v5325_v31 = vadd.f32 %v2012_v54, %v4928_v2  ;;  %v2327_v2 = vld [vmem:[#allocation14 + $0x30] sm:$0xff]  ;;  %3381 = vmatprep.subr.bf16.mxu1 %v3380_v34  ;;  %v3396_v22 = vpack.c.bf16 %v2103_v52, %v2101_v62  ;;  %v2100_v54 = vld [vmem:[#allocation14 + $0x100] sm:$0xff]  ;;  %v2105_v1 = vld [vmem:[#allocation14 + $0x148] sm:$0xff] }
 0x8dc   : > { %v5328_v23 = vadd.f32 %v2014_v16, %v4932_v4  ;;  %2023 = vadd.xlane.f32.xlu0 %v2022_v45  ;;  %v3446_v4 = vpack.c.bf16 %v2327_v2, %v2325_v11  ;;  %3383 = vmatpush1.bf16.msra.mxu1 %v3382_v39  ;;  %v2341_v16 = vld [vmem:[#allocation14 + $0x110] sm:$0xff]  ;;  %v3460_v45 = vpack.c.bf16 %v2344_v25, %v2342_v63  ;;  %v2107_v32 = vld [vmem:[#allocation14 + $0x168] sm:$0xff]  ;;  %v2348_v34 = vld [vmem:[#allocation14 + $0x178] sm:$0xff] }
 0x8dd   : > { %3385 = vmatprep.subr.bf16.mxu1 %v3384_v43  ;;  %v3398_v35 = vpack.c.bf16 %v2102_v41, %v2100_v54  ;;  %v3400_v37 = vpack.c.bf16 %v2107_v32, %v2105_v1  ;;  %v2106_v39 = vld [vmem:[#allocation14 + $0x160] sm:$0xff]  ;;  %v2345_v11 = vld [vmem:[#allocation14 + $0x150] sm:$0xff]  ;;  %v3464_v2 = vpack.c.bf16 %v2348_v34, %v2346_v33  ;;  %v2121_v63 = vld [vmem:[#allocation14 + $0x248] sm:$0xff] }
 0x8de   : > { %v2025_v0 = vadd.f32 %v5328_v23, %v5325_v31  ;;  %3447 = vmatpush1.bf16.msra.mxu0 %v3446_v4  ;;  %v2109_v4 = vld [vmem:[#allocation14 + $0x188] sm:$0xff]  ;;  %v3402_v43 = vpack.c.bf16 %v2106_v39, %v2104_v38  ;;  %v2359_v52 = vld [vmem:[#allocation14 + $0x230] sm:$0xff] }
 0x8df   : > { %3449 = vmatprep.subr.bf16.mxu0 %v3448_v44  ;;  %v3466_v44 = vpack.c.bf16 %v2347_v49, %v2345_v11  ;;  %v3404_v10 = vpack.c.bf16 %v2111_v12, %v2109_v4  ;;  %v2123_v25 = vld [vmem:[#allocation14 + $0x268] sm:$0xff]  ;;  %v3478_v54 = vpack.c.bf16 %v2359_v52, %v2357_v24  ;;  %v2363_v32 = vld [vmem:[#allocation14 + $0x270] sm:$0xff]  ;;  %v2124_v11 = vld [vmem:[#allocation14 + $0x280] sm:$0xff] }
 0x8e0   : > { %2026 = vadd.xlane.f32.xlu1 %v2025_v0  ;;  %3387 = vmatpush1.bf16.msra.mxu1 %v3386_v7  ;;  %v2343_v0 = vld [vmem:[#allocation14 + $0x130] sm:$0xff]  ;;  %v3416_v41 = vpack.c.bf16 %v2123_v25, %v2121_v63  ;;  %v2125_v33 = vld [vmem:[#allocation14 + $0x288] sm:$0xff]  ;;  %v2132_v52 = vld [vmem:[#allocation14 + $0x300] sm:$0xff] }
 0x8e1   : > { %3389 = vmatprep.subr.bf16.mxu1 %v3388_v21  ;;  %v3462_v36 = vpack.c.bf16 %v2343_v0, %v2341_v16  ;;  %v2349_v7 = vld [vmem:[#allocation14 + $0x190] sm:$0xff]  ;;  %v2354_v21 = vld [vmem:[#allocation14 + $0x1d8] sm:$0xff]  ;;  %v2120_v16 = vld [vmem:[#allocation14 + $0x240] sm:$0xff] }
 0x8e2   : > { %3451 = vmatpush1.bf16.msra.mxu0 %v3450_v53  ;;  %v2115_v53 = vld [vmem:[#allocation14 + $0x1e8] sm:$0xff]  ;;  %v3470_v59 = vpack.c.bf16 %v2351_v50, %v2349_v7  ;;  %v2361_v0 = vld [vmem:[#allocation14 + $0x250] sm:$0xff]  ;;  %v2134_v63 = vld [vmem:[#allocation14 + $0x320] sm:$0xff] }
 0x8e3   : > { %3453 = vmatprep.subr.bf16.mxu0 %v3452_v60  ;;  %v3408_v60 = vpack.c.bf16 %v2115_v53, %v2113_v51  ;;  %v2127_v34 = vld [vmem:[#allocation14 + $0x2a8] sm:$0xff]  ;;  %v3482_v38 = vpack.c.bf16 %v2363_v32, %v2361_v0  ;;  %v2365_v4 = vld [vmem:[#allocation14 + $0x290] sm:$0xff]  ;;  %v2136_v32 = vld [vmem:[#allocation14 + $0x340] sm:$0xff] }
 0x8e4   : > { %3391 = vmatpush1.bf16.msra.mxu1 %v3390_v13  ;;  %v3472_v13 = vpack.c.bf16 %v2356_v9, %v2354_v21  ;;  %v3420_v39 = vpack.c.bf16 %v2127_v34, %v2125_v33  ;;  %v2367_v12 = vld [vmem:[#allocation14 + $0x2b0] sm:$0xff]  ;;  %v2138_v33 = vld [vmem:[#allocation14 + $0x360] sm:$0xff] }
 0x8e5   : > { %3393 = vmatprep.subr.bf16.mxu1 %v3392_v27  ;;  %v2360_v27 = vld [vmem:[#allocation14 + $0x238] sm:$0xff]  ;;  %v3486_v40 = vpack.c.bf16 %v2367_v12, %v2365_v4 }
 0x8e6   : > { %3455 = vmatpush1.bf16.msra.mxu0 %v3454_v15  ;;  %v2358_v15 = vld [vmem:[#allocation14 + $0x218] sm:$0xff] }
 0x8e7   : > { %3457 = vmatprep.subr.bf16.mxu0 %v3456_v57  ;;  %v2116_v57 = vld [vmem:[#allocation14 + $0x200] sm:$0xff]  ;;  %v3476_v62 = vpack.c.bf16 %v2360_v27, %v2358_v15  ;;  %v3426_v15 = vpack.c.bf16 %v2130_v14, %v2128_v6  ;;  %v2369_v27 = vld [vmem:[#allocation14 + $0x2d0] sm:$0xff]  ;;  %v2503_v14 = vld [vmem:[#allocation15 + $0x208] sm:$0xff] }
 0x8e8   : > { %3395 = vmatpush1.bf16.msra.mxu1 %v3394_v28  ;;  %v2362_v28 = vld [vmem:[#allocation14 + $0x258] sm:$0xff] }
 0x8e9   : > { %3397 = vmatprep.subr.bf16.mxu1 %v3396_v22  ;;  %v3414_v22 = vpack.c.bf16 %v2118_v5, %v2116_v57  ;;  %v2135_v57 = vld [vmem:[#allocation14 + $0x328] sm:$0xff]  ;;  %v2374_v5 = vld [vmem:[#allocation14 + $0x318] sm:$0xff] }
 0x8ea   : > { %3459 = vmatpush1.bf16.msra.mxu0 %v3458_v29  ;;  %v2364_v29 = vld [vmem:[#allocation14 + $0x278] sm:$0xff] }
 0x8eb   : > { %3461 = vmatprep.subr.bf16.mxu0 %v3460_v45  ;;  %v2122_v45 = vld [vmem:[#allocation14 + $0x260] sm:$0xff]  ;;  %v3480_v1 = vpack.c.bf16 %v2364_v29, %v2362_v28  ;;  %v3430_v28 = vpack.c.bf16 %v2134_v63, %v2132_v52  ;;  %v2373_v29 = vld [vmem:[#allocation14 + $0x310] sm:$0xff] }
 0x8ec   : > { %3399 = vmatpush1.bf16.msra.mxu1 %v3398_v35  ;;  %v2366_v35 = vld [vmem:[#allocation14 + $0x298] sm:$0xff] }
 0x8ed   : > { %3401 = vmatprep.subr.bf16.mxu1 %v3400_v37  ;;  %v3418_v37 = vpack.c.bf16 %v2122_v45, %v2120_v16  ;;  %v2139_v16 = vld [vmem:[#allocation14 + $0x368] sm:$0xff]  ;;  %v2378_v45 = vld [vmem:[#allocation14 + $0x358] sm:$0xff] }
 0x8ee   : > { %3463 = vmatpush1.bf16.msra.mxu0 %v3462_v36  ;;  %v2368_v36 = vld [vmem:[#allocation14 + $0x2b8] sm:$0xff] }
 0x8ef   : > { %3465 = vmatprep.subr.bf16.mxu0 %v3464_v2  ;;  %v2126_v2 = vld [vmem:[#allocation14 + $0x2a0] sm:$0xff]  ;;  %v3484_v49 = vpack.c.bf16 %v2368_v36, %v2366_v35  ;;  %v3434_v35 = vpack.c.bf16 %v2138_v33, %v2136_v32  ;;  %v2377_v36 = vld [vmem:[#allocation14 + $0x350] sm:$0xff]  ;;  %v2509_v32 = vld [vmem:[#allocation15 + $0x238] sm:$0xff] }
 0x8f0   : > { %3403 = vmatpush1.bf16.msra.mxu1 %v3402_v43  ;;  %v3422_v42 = vpack.c.bf16 %v2126_v2, %v2124_v11  ;;  %v2143_v11 = vld [vmem:[#allocation14 + $0x3a8] sm:$0xff]  ;;  %v2382_v2 = vld [vmem:[#allocation14 + $0x398] sm:$0xff] }
 0x8f1   : > { %3405 = vmatprep.subr.bf16.mxu1 %v3404_v10 }
 0x8f2   : > { %3467 = vmatpush1.bf16.msra.mxu0 %v3466_v44 }
 0x8f3   : > { %3469 = vmatprep.subr.bf16.mxu0 %v3468_v46 }
 0x8f4   : > { %3407 = vmatpush1.bf16.msra.mxu1 %v3406_v58 }
 0x8f5   : > { %3409 = vmatprep.subr.bf16.mxu1 %v3408_v60  ;;  %v2129_v60 = vld [vmem:[#allocation14 + $0x2c8] sm:$0xff] }
 0x8f6   : > { %3471 = vmatpush1.bf16.msra.mxu0 %v3470_v59  ;;  %v3424_v26 = vpack.c.bf16 %v2131_v18, %v2129_v60  ;;  %v2146_v18 = vld [vmem:[#allocation14 + $0x3e0] sm:$0xff] }
 0x8f7   : > { %3473 = vmatprep.subr.bf16.mxu0 %v3472_v13  ;;  %v2372_v13 = vld [vmem:[#allocation14 + $0x2f8] sm:$0xff] }
 0x8f8   : > { %3411 = vmatpush1.bf16.msra.mxu1 %v3410_v3  ;;  %v3488_v8 = vpack.c.bf16 %v2372_v13, %v2370_v19  ;;  %v2371_v3 = vld [vmem:[#allocation14 + $0x2f0] sm:$0xff] }
 0x8f9   : > { %3413 = vmatprep.subr.bf16.mxu1 %v3412_v55  ;;  %v2133_v55 = vld [vmem:[#allocation14 + $0x308] sm:$0xff]  ;;  %v2385_v19 = vld [vmem:[#allocation14 + $0x3d0] sm:$0xff] }
 0x8fa   : > { %3475 = vmatpush1.bf16.msra.mxu0 %v3474_v17  ;;  %v3490_v17 = vpack.c.bf16 %v2371_v3, %v2369_v27  ;;  %v3428_v24 = vpack.c.bf16 %v2135_v57, %v2133_v55 }
 0x8fb   : > { %3477 = vmatprep.subr.bf16.mxu0 %v3476_v62  ;;  %v2376_v62 = vld [vmem:[#allocation14 + $0x338] sm:$0xff] }
 0x8fc   : > { %3415 = vmatpush1.bf16.msra.mxu1 %v3414_v22  ;;  %v3492_v25 = vpack.c.bf16 %v2376_v62, %v2374_v5  ;;  %v2375_v22 = vld [vmem:[#allocation14 + $0x330] sm:$0xff]  ;;  %v2021_v62 = vld [vmem:[%s5554_s10] sm:$0x3]  ;;  %s5559_s10 = smov %s5558_s25 }
 0x8fd   : > { %3417 = vmatprep.subr.bf16.mxu1 %v3416_v41  ;;  %v2137_v41 = vld [vmem:[#allocation14 + $0x348] sm:$0xff] }
 0x8fe   : > { %3479 = vmatpush1.bf16.msra.mxu0 %v3478_v54  ;;  %v3494_v54 = vpack.c.bf16 %v2375_v22, %v2373_v29  ;;  %v3432_v0 = vpack.c.bf16 %v2139_v16, %v2137_v41  ;;  %v2073_v29 = vrot.slane %v2021_v62, %v4963_v48  ;;  %v2077_v22 = vrot.slane %v2021_v62, %v4960_v47  ;;  %v2502_v41 = vld [vmem:[#allocation15 + $0x200] sm:$0xff]  ;;  %v2504_v16 = vld [vmem:[#allocation15 + $0x210] sm:$0xff]  ;;  %v2533_v62 = vld [vmem:[#allocation15 + $0x2f8] sm:$0xff] }
 0x8ff   : > { %3481 = vmatprep.subr.bf16.mxu0 %v3480_v1  ;;  %v2380_v1 = vld [vmem:[#allocation14 + $0x378] sm:$0xff] }
 0x900   : > { %3419 = vmatpush1.bf16.msra.mxu1 %v3418_v37  ;;  %v3496_v34 = vpack.c.bf16 %v2380_v1, %v2378_v45  ;;  %v2379_v37 = vld [vmem:[#allocation14 + $0x370] sm:$0xff]  ;;  %v2507_v1 = vld [vmem:[#allocation15 + $0x228] sm:$0xff] }
 0x901   : > { %3421 = vmatprep.subr.bf16.mxu1 %v3420_v39  ;;  %v3498_v39 = vpack.c.bf16 %v2379_v37, %v2377_v36 }
 0x902   : > { %3483 = vmatpush1.bf16.msra.mxu0 %v3482_v38  ;;  %v2141_v38 = vld [vmem:[#allocation14 + $0x388] sm:$0xff] }
 0x903   : > { %3485 = vmatprep.subr.bf16.mxu0 %v3484_v49  ;;  %v2384_v49 = vld [vmem:[#allocation14 + $0x3b8] sm:$0xff]  ;;  %v3436_v4 = vpack.c.bf16 %v2143_v11, %v2141_v38  ;;  %v3512_v38 = vpack.c.bf16 %v2509_v32, %v2507_v1  ;;  %v2508_v11 = vld [vmem:[#allocation15 + $0x230] sm:$0xff] }
 0x904   : > { %3423 = vmatpush1.bf16.msra.mxu1 %v3422_v42  ;;  %v3500_v12 = vpack.c.bf16 %v2384_v49, %v2382_v2  ;;  %v2140_v42 = vld [vmem:[#allocation14 + $0x380] sm:$0xff]  ;;  %v2511_v49 = vld [vmem:[#allocation15 + $0x248] sm:$0xff]  ;;  %v2541_v1 = vld [vmem:[#allocation15 + $0x338] sm:$0xff] }
 0x905   : > { %3425 = vmatprep.subr.bf16.mxu1 %v3424_v26  ;;  %v2387_v26 = vld [vmem:[#allocation14 + $0x3f0] sm:$0xff] }
 0x906   : > { %3487 = vmatpush1.bf16.msra.mxu0 %v3486_v40  ;;  %v2142_v40 = vld [vmem:[#allocation14 + $0x3a0] sm:$0xff]  ;;  %v3506_v6 = vpack.c.bf16 %v2387_v26, %v2385_v19  ;;  %v2520_v19 = vld [vmem:[#allocation15 + $0x290] sm:$0xff]  ;;  %v2523_v26 = vld [vmem:[#allocation15 + $0x2a8] sm:$0xff] }
 0x907   : > { %3489 = vmatprep.subr.bf16.mxu0 %v3488_v8  ;;  %v2505_v8 = vld [vmem:[#allocation15 + $0x218] sm:$0xff] }
 0x908   : > { %3427 = vmatpush1.bf16.msra.mxu1 %v3426_v15  ;;  %v3508_v15 = vpack.c.bf16 %v2505_v8, %v2503_v14  ;;  %v2522_v8 = vld [vmem:[#allocation15 + $0x2a0] sm:$0xff] }
 0x909   : > { %3429 = vmatprep.subr.bf16.mxu1 %v3428_v24  ;;  %v2020_v24 = vld [vmem:[%s5553_s16] sm:$0x3]  ;;  %s2761_s16 = sshll.u32 %s5009_s12, 4  ;;  %s5411_s16 = int_to_ptr.vmem [resolvable:$true] %s2761_s16 }
 0x90a   : > { %3491 = vmatpush1.bf16.msra.mxu0 %v3490_v17  ;;  %v2058_v52 = vrot.slane %v2020_v24, %v4963_v48  ;;  %v2062_v63 = vrot.slane %v2020_v24, %v4960_v47  ;;  %v2531_v24 = vld [vmem:[#allocation15 + $0x2e8] sm:$0xff]  ;;  %s4244_s17 = scalar_lea.vmem %s5411_s16, 512  ;;  %p4251_p4 = scmp.lt.s32.totalorder %s5411_s16, %s4249_s3 }
 0x90b   : > { %3493 = vmatprep.subr.bf16.mxu0 %v3492_v25  ;;  %p4245_p7 = scmp.ne.s32.totalorder %s5411_s16, %s4244_s17  ;;  %p4252_p6 = scmp.lt.s32.totalorder %s4250_s14, %s4244_s17 }
 0x90c   : > { %3431 = vmatpush1.bf16.msra.mxu1 %v3430_v28 }
 0x90d   : > { %3433 = vmatprep.subr.bf16.mxu1 %v3432_v0  ;;  %p4246_p11 = pnand %p4245_p7, %p5560_p5  ;;  %p4253_p9 = por %p4252_p6, %p4251_p4 }
 0x90e   : > { %3495 = vmatpush1.bf16.msra.mxu0 %v3494_v54 }
 0x90f   : > { %3497 = vmatprep.subr.bf16.mxu0 %v3496_v34  ;;  %v3510_v34 = vpack.c.bf16 %v2504_v16, %v2502_v41  ;;  %v2534_v16 = vld [vmem:[#allocation15 + $0x300] sm:$0xff]  ;;  %p4247_p2 = pneg %p4246_p11 }
 0x910   : > { %3435 = vmatpush1.bf16.msra.mxu1 %v3434_v35 }
 0x911   : > { %3437 = vmatprep.subr.bf16.mxu1 %v3436_v4  ;;  %v2513_v4 = vld [vmem:[#allocation15 + $0x258] sm:$0xff]  ;;  %p4254_p1 = pnand %p4253_p9, %p4247_p2 }
 0x912   : > { %3499 = vmatpush1.bf16.msra.mxu0 %v3498_v39  ;;  %v2506_v39 = vld [vmem:[#allocation15 + $0x220] sm:$0xff] }
 0x913   : > { %3501 = vmatprep.subr.bf16.mxu0 %v3500_v12 }
 0x969   : > { %v2024_v43 = vpop.xlane.xlu0 %2023 }
 0x96a   : > { %v2028_v44 = vmul.f32 0.00390625, %v2024_v43  ;;  %v2381_v43 = vld [vmem:[#allocation14 + $0x390] sm:$0xff] }
 0x96c   : > { %v5333_v10 = vsub.f32 %v5317_v30, %v2028_v44  ;;  %v5336_v61 = vsub.f32 %v5320_v56, %v2028_v44  ;;  %v3438_v44 = vpack.c.bf16 %v2142_v40, %v2140_v42  ;;  %v3514_v40 = vpack.c.bf16 %v2508_v11, %v2506_v39  ;;  %v2542_v39 = vld [vmem:[#allocation15 + $0x340] sm:$0xff]  ;;  %v2544_v11 = vld [vmem:[#allocation15 + $0x350] sm:$0xff] }
 0x96d   : > { %v2027_v20 = vpop.xlane.xlu1 %2026 }
 0x96e   : > { %v2029_v7 = vmul.f32 0.00390625, %v2027_v20  ;;  %v2034_v46 = vmul.f32 %v5333_v10, %v5333_v10  ;;  %v2035_v50 = vmul.f32 %v5336_v61, %v5336_v61  ;;  %v2383_v20 = vld [vmem:[#allocation14 + $0x3b0] sm:$0xff]  ;;  %3439 = vmatpush1.bf16.msra.mxu1 %v3438_v44 }
 0x96f   : > { %v2512_v44 = vld [vmem:[#allocation15 + $0x250] sm:$0xff] }
 0x970   : > { %v5343_v51 = vsub.f32 %v5325_v31, %v2029_v7  ;;  %v5346_v53 = vsub.f32 %v5328_v23, %v2029_v7  ;;  %v2038_v21 = vadd.f32 %v2035_v50, %v2034_v46  ;;  %v2145_v7 = vld [vmem:[#allocation14 + $0x3c8] sm:$0xff]  ;;  %v3502_v50 = vpack.c.bf16 %v2383_v20, %v2381_v43  ;;  %v2517_v20 = vld [vmem:[#allocation15 + $0x278] sm:$0xff] }
 0x971   : > { %v2147_v46 = vld [vmem:[#allocation14 + $0x3e8] sm:$0xff]  ;;  %v3516_v43 = vpack.c.bf16 %v2513_v4, %v2511_v49  ;;  %v2549_v49 = vld [vmem:[#allocation15 + $0x378] sm:$0xff] }
 0x972   : > { %2039 = vadd.xlane.f32.xlu0 %v2038_v21  ;;  %v2036_v9 = vmul.f32 %v5343_v51, %v5343_v51  ;;  %v2037_v58 = vmul.f32 %v5346_v53, %v5346_v53  ;;  %v3440_v21 = vpack.c.bf16 %v2147_v46, %v2145_v7  ;;  %3503 = vmatpush1.bf16.msra.mxu0 %v3502_v50  ;;  %v2514_v50 = vld [vmem:[#allocation15 + $0x260] sm:$0xff] }
 0x974   : > { %v2041_v59 = vadd.f32 %v2037_v58, %v2036_v9  ;;  %v2386_v9 = vld [vmem:[#allocation14 + $0x3d8] sm:$0xff]  ;;  %3441 = vmatprep.subr.bf16.mxu1 %v3440_v21  ;;  %v2516_v21 = vld [vmem:[#allocation15 + $0x270] sm:$0xff] }
 0x975   : > { %v2388_v58 = vld [vmem:[#allocation14 + $0x3f8] sm:$0xff] }
 0x976   : > { %2042 = vadd.xlane.f32.xlu1 %v2041_v59  ;;  %v2144_v59 = vld [vmem:[#allocation14 + $0x3c0] sm:$0xff]  ;;  %v3504_v60 = vpack.c.bf16 %v2388_v58, %v2386_v9  ;;  %v2519_v9 = vld [vmem:[#allocation15 + $0x288] sm:$0xff]  ;;  %v2521_v58 = vld [vmem:[#allocation15 + $0x298] sm:$0xff] }
 0x977   : > { %v3442_v13 = vpack.c.bf16 %v2146_v18, %v2144_v59  ;;  %v3522_v59 = vpack.c.bf16 %v2516_v21, %v2514_v50  ;;  %v2518_v18 = vld [vmem:[#allocation15 + $0x280] sm:$0xff]  ;;  %v2557_v50 = vld [vmem:[#allocation15 + $0x3b8] sm:$0xff] }
 0x978   : > { %3505 = vmatprep.subr.bf16.mxu0 %v3504_v60  ;;  %v3524_v60 = vpack.c.bf16 %v2521_v58, %v2519_v9  ;;  %v2554_v9 = vld [vmem:[#allocation15 + $0x3a0] sm:$0xff]  ;;  %v2556_v58 = vld [vmem:[#allocation15 + $0x3b0] sm:$0xff] }
 0x979   : > { %3443 = vmatpush1.bf16.msra.mxu1 %v3442_v13  ;;  %3507 = vmatpush1.bf16.msra.mxu0 %v3506_v6  ;;  %v2525_v13 = vld [vmem:[#allocation15 + $0x2b8] sm:$0xff]  ;;  %v3526_v6 = vpack.c.bf16 %v2520_v19, %v2518_v18 }
 0x97a   : > { %3509 = vmatprep.subr.bf16.mxu1 %v3508_v15  ;;  %v3528_v14 = vpack.c.bf16 %v2525_v13, %v2523_v26  ;;  %v2524_v15 = vld [vmem:[#allocation15 + $0x2b0] sm:$0xff]  ;;  %v2561_v18 = vld [vmem:[#allocation15 + $0x3d8] sm:$0xff]  ;;  %v2558_v26 = vld [vmem:[#allocation15 + $0x3c0] sm:$0xff] }
 0x97b   : > { %v2560_v13 = vld [vmem:[#allocation15 + $0x3d0] sm:$0xff] }
 0x9ff   : > { %v2040_v27 = vpop.xlane.xlu0 %2039 }
 0xa00   : > { %v2044_v3 = vmul.f32 0.00390625, %v2040_v27  ;;  %v2527_v27 = vld [vmem:[#allocation15 + $0x2c8] sm:$0xff] }
 0xa02   : > { %v2046_v17 = vadd.f32 1e-05, %v2044_v3  ;;  %v2529_v3 = vld [vmem:[#allocation15 + $0x2d8] sm:$0xff] }
 0xa03   : > { %v2043_v55 = vpop.xlane.xlu1 %2042 }
 0xa04   : > { %4054 = vrsqrt.f32 %v2046_v17  ;;  %v2045_v57 = vmul.f32 0.00390625, %v2043_v55  ;;  %v3530_v17 = vpack.c.bf16 %v2524_v15, %v2522_v8  ;;  %v3532_v55 = vpack.c.bf16 %v2529_v3, %v2527_v27  ;;  %v2565_v8 = vld [vmem:[#allocation15 + $0x3f8] sm:$0xff]  ;;  %v2562_v27 = vld [vmem:[#allocation15 + $0x3e0] sm:$0xff]  ;;  %v2564_v3 = vld [vmem:[#allocation15 + $0x3f0] sm:$0xff] }
 0xa06   : > { %v2047_v5 = vadd.f32 1e-05, %v2045_v57  ;;  %v2526_v57 = vld [vmem:[#allocation15 + $0x2c0] sm:$0xff] }
 0xa08   : > { %4056 = vrsqrt.f32 %v2047_v5  ;;  %v2528_v5 = vld [vmem:[#allocation15 + $0x2d0] sm:$0xff] }
 0xa0e   : > { %v4055_v25 = vpop.eup %4054 }
 0xa0f   : > { %v2051_v28 = vmul.f32 %v4055_v25, %v5336_v61  ;;  %v2050_v54 = vmul.f32 %v4055_v25, %v5333_v10  ;;  %v2530_v25 = vld [vmem:[#allocation15 + $0x2e0] sm:$0xff] }
 0xa11   : > { %v2066_v45 = vmul.f32 %v2062_v63, %v2051_v28  ;;  %v2065_v0 = vmul.f32 %v2058_v52, %v2050_v54  ;;  %v2532_v28 = vld [vmem:[#allocation15 + $0x2f0] sm:$0xff] }
 0xa12   : > { %v4057_v33 = vpop.eup %4056  ;;  %v3538_v54 = vpack.c.bf16 %v2532_v28, %v2530_v25 }
 0xa13   : > { %v2081_v35 = vadd.f32 %v2077_v22, %v2066_v45  ;;  %v2080_v36 = vadd.f32 %v2073_v29, %v2065_v0  ;;  %v2053_v37 = vmul.f32 %v4057_v33, %v5346_v53  ;;  %v2052_v61 = vmul.f32 %v4057_v33, %v5343_v51  ;;  %v2510_v53 = vld [vmem:[#allocation15 + $0x240] sm:$0xff]  ;;  %v2515_v51 = vld [vmem:[#allocation15 + $0x268] sm:$0xff]  ;;  %v2536_v45 = vld [vmem:[#allocation15 + $0x310] sm:$0xff] }
 0xa14   : > { %v3518_v7 = vpack.c.bf16 %v2512_v44, %v2510_v53  ;;  %v3520_v46 = vpack.c.bf16 %v2517_v20, %v2515_v51  ;;  %v2539_v0 = vld [vmem:[#allocation15 + $0x328] sm:$0xff]  ;;  %v3542_v32 = vpack.c.bf16 %v2536_v45, %v2534_v16  ;;  %v2553_v53 = vld [vmem:[#allocation15 + $0x398] sm:$0xff]  ;;  %v2550_v51 = vld [vmem:[#allocation15 + $0x380] sm:$0xff] }
 0xa15   : > { %2224 = vmatprep.mubr.f32.mxu1 %v2081_v35  ;;  %2466 = vmatprep.mubr.f32.mxu0 %v2081_v35  ;;  %v2068_v10 = vmul.f32 %v2062_v63, %v2053_v37  ;;  %v2067_v2 = vmul.f32 %v2058_v52, %v2052_v61  ;;  %v3534_v52 = vpack.c.bf16 %v2528_v5, %v2526_v57  ;;  %v2540_v35 = vld [vmem:[#allocation15 + $0x330] sm:$0xff]  ;;  %v2545_v37 = vld [vmem:[#allocation15 + $0x358] sm:$0xff] }
 0xa16   : > { %2225 = vmatmul.mubr.f32.vlgmr.msra.gmra.mrb[0].mxu1 %v2080_v36  ;;  %2467 = vmatmul.mubr.f32.vlgmr.msra.gmra.mrb[12].mxu0 %v2080_v36  ;;  %v3536_v63 = vpack.c.bf16 %v2533_v62, %v2531_v24  ;;  %v3544_v33 = vpack.c.bf16 %v2541_v1, %v2539_v0  ;;  %v2543_v36 = vld [vmem:[#allocation15 + $0x348] sm:$0xff]  ;;  %v2552_v20 = vld [vmem:[#allocation15 + $0x390] sm:$0xff]  ;;  %v2263_v57 = vld [vmem:[#allocation15 + $0x18] sm:$0xff] }
 0xa17   : > { %v2083_v12 = vadd.f32 %v2077_v22, %v2068_v10  ;;  %v2082_v42 = vadd.f32 %v2073_v29, %v2067_v2  ;;  %3511 = vmatpush1.bf16.msra.mxu1 %v3510_v34  ;;  %v2535_v29 = vld [vmem:[#allocation15 + $0x308] sm:$0xff]  ;;  %v2537_v22 = vld [vmem:[#allocation15 + $0x318] sm:$0xff]  ;;  %v2538_v34 = vld [vmem:[#allocation15 + $0x320] sm:$0xff]  ;;  %v3550_v10 = vpack.c.bf16 %v2544_v11, %v2542_v39 }
 0xa18   : > { %3513 = vmatprep.subr.bf16.mxu1 %v3512_v38  ;;  %v3540_v41 = vpack.c.bf16 %v2537_v22, %v2535_v29  ;;  %v3546_v61 = vpack.c.bf16 %v2540_v35, %v2538_v34  ;;  %v3548_v38 = vpack.c.bf16 %v2545_v37, %v2543_v36  ;;  %v2547_v2 = vld [vmem:[#allocation15 + $0x368] sm:$0xff]  ;;  %v2994_v24 = vld [vmem:[%s5555_s7 + $0x2] sm:$0x3]  ;;  %v5372_v62 = vld [vmem:[%s5555_s7] sm:$0x3] }
 0xa19   : > { %2230 = vmatprep.mubr.f32.mxu1 %v2083_v12  ;;  %2472 = vmatprep.mubr.f32.mxu0 %v2083_v12  ;;  %v3552_v4 = vpack.c.bf16 %v2549_v49, %v2547_v2  ;;  %v2546_v12 = vld [vmem:[#allocation15 + $0x360] sm:$0xff]  ;;  %v2399_v25 = vrot.slane %v2994_v24, %v4960_v47 }
 0xa1a   : > { %2231 = vmatmul.mubr.f32.gmra.mrb[2].mxu1 %v2082_v42  ;;  %2473 = vmatmul.mubr.f32.gmra.mrb[14].mxu0 %v2082_v42  ;;  %v2548_v42 = vld [vmem:[#allocation15 + $0x370] sm:$0xff]  ;;  %v2260_v49 = vld [vmem:[#allocation15] sm:$0xff] }
 0xa1b   : > { %3515 = vmatpush1.bf16.msra.mxu1 %v3514_v40  ;;  %v3554_v40 = vpack.c.bf16 %v2548_v42, %v2546_v12 }
 0xa1c   : > { %3517 = vmatprep.subr.bf16.mxu1 %v3516_v43  ;;  %v2551_v43 = vld [vmem:[#allocation15 + $0x388] sm:$0xff] }
 0xa1d   : > { %v3556_v44 = vpack.c.bf16 %v2553_v53, %v2551_v43  ;;  %v2267_v43 = vld [vmem:[#allocation15 + $0x38] sm:$0xff] }
 0xa1f   : > { %3519 = vmatpush1.bf16.msra.mxu1 %v3518_v7  ;;  %v3558_v7 = vpack.c.bf16 %v2552_v20, %v2550_v51 }
 0xa20   : > { %3521 = vmatprep.subr.bf16.mxu1 %v3520_v46  ;;  %v2555_v46 = vld [vmem:[#allocation15 + $0x3a8] sm:$0xff] }
 0xa21   : > { %v3560_v21 = vpack.c.bf16 %v2557_v50, %v2555_v46 }
 0xa23   : > { %3523 = vmatpush1.bf16.msra.mxu1 %v3522_v59  ;;  %v3562_v59 = vpack.c.bf16 %v2556_v58, %v2554_v9  ;;  %v2264_v58 = vld [vmem:[#allocation15 + $0x20] sm:$0xff] }
 0xa24   : > { %3525 = vmatprep.subr.bf16.mxu1 %v3524_v60  ;;  %v2559_v60 = vld [vmem:[#allocation15 + $0x3c8] sm:$0xff] }
 0xa25   : > { %v3564_v19 = vpack.c.bf16 %v2561_v18, %v2559_v60 }
 0xa27   : > { %3527 = vmatpush1.bf16.msra.mxu1 %v3526_v6  ;;  %v3566_v6 = vpack.c.bf16 %v2560_v13, %v2558_v26  ;;  %v2269_v26 = vld [vmem:[#allocation15 + $0x48] sm:$0xff]  ;;  %v2271_v13 = vld [vmem:[#allocation15 + $0x58] sm:$0xff] }
 0xa28   : > { %3529 = vmatprep.subr.bf16.mxu1 %v3528_v14  ;;  %v2563_v14 = vld [vmem:[#allocation15 + $0x3e8] sm:$0xff] }
 0xa29   : > { %v3568_v15 = vpack.c.bf16 %v2565_v8, %v2563_v14 }
 0xa2b   : > { %3531 = vmatpush1.bf16.msra.mxu1 %v3530_v17  ;;  %v3570_v17 = vpack.c.bf16 %v2564_v3, %v2562_v27  ;;  %v3580_v3 = vpack.c.bf16 %v2271_v13, %v2269_v26  ;;  %v2301_v26 = vld [vmem:[#allocation15 + $0x148] sm:$0xff]  ;;  %v2303_v13 = vld [vmem:[#allocation15 + $0x158] sm:$0xff] }
 0xa2c   : > { %3533 = vmatprep.subr.bf16.mxu1 %v3532_v55  ;;  %v2261_v55 = vld [vmem:[#allocation15 + $0x8] sm:$0xff] }
 0xa2d   : > { %v3572_v5 = vpack.c.bf16 %v2263_v57, %v2261_v55  ;;  %v2270_v55 = vld [vmem:[#allocation15 + $0x50] sm:$0xff] }
 0xa2f   : > { %3535 = vmatpush1.bf16.msra.mxu1 %v3534_v52  ;;  %v2395_v52 = vrot.slane %v2994_v24, %v4963_v48  ;;  %v2275_v24 = vld [vmem:[#allocation15 + $0x78] sm:$0xff] }
 0xa30   : > { %3537 = vmatprep.subr.bf16.mxu1 %v3536_v63  ;;  %v5377_v63 = vrot.slane %v5372_v62, %v4960_v47 }
 0xa33   : > { %3539 = vmatpush1.bf16.msra.mxu1 %v3538_v54 }
 0xa34   : > { %3541 = vmatprep.subr.bf16.mxu1 %v3540_v41 }
 0xa37   : > { %3543 = vmatpush1.bf16.msra.mxu1 %v3542_v32 }
 0xa38   : > { %3545 = vmatprep.subr.bf16.mxu1 %v3544_v33 }
 0xa3b   : > { %3547 = vmatpush1.bf16.msra.mxu1 %v3546_v61 }
 0xa3c   : > { %3549 = vmatprep.subr.bf16.mxu1 %v3548_v38 }
 0xa3f   : > { %3551 = vmatpush1.bf16.msra.mxu1 %v3550_v10 }
 0xa40   : > { %3553 = vmatprep.subr.bf16.mxu1 %v3552_v4  ;;  %v2262_v4 = vld [vmem:[#allocation15 + $0x10] sm:$0xff] }
 0xa43   : > { %3555 = vmatpush1.bf16.msra.mxu1 %v3554_v40  ;;  %v2265_v40 = vld [vmem:[#allocation15 + $0x28] sm:$0xff] }
 0xa44   : > { %3557 = vmatprep.subr.bf16.mxu1 %v3556_v44  ;;  %v3576_v50 = vpack.c.bf16 %v2267_v43, %v2265_v40 }
 0xa47   : > { %3559 = vmatpush1.bf16.msra.mxu1 %v3558_v7  ;;  %v3574_v7 = vpack.c.bf16 %v2262_v4, %v2260_v49  ;;  %v2284_v49 = vld [vmem:[#allocation15 + $0xc0] sm:$0xff]  ;;  %v2286_v4 = vld [vmem:[#allocation15 + $0xd0] sm:$0xff] }
 0xa48   : > { %3561 = vmatprep.subr.bf16.mxu1 %v3560_v21  ;;  %v3598_v40 = vpack.c.bf16 %v2286_v4, %v2284_v49  ;;  %v2323_v49 = vld [vmem:[#allocation15 + $0x1f8] sm:$0xff] }
 0xa4b   : > { %3563 = vmatpush1.bf16.msra.mxu1 %v3562_v59  ;;  %v2266_v59 = vld [vmem:[#allocation15 + $0x30] sm:$0xff] }
 0xa4c   : > { %3565 = vmatprep.subr.bf16.mxu1 %v3564_v19 }
 0xa4f   : > { %3567 = vmatpush1.bf16.msra.mxu1 %v3566_v6 }
 0xa50   : > { %3569 = vmatprep.subr.bf16.mxu1 %v3568_v15  ;;  %v3578_v15 = vpack.c.bf16 %v2266_v59, %v2264_v58  ;;  %v2299_v58 = vld [vmem:[#allocation15 + $0x138] sm:$0xff] }
 0xa53   : > { %3571 = vmatpush1.bf16.msra.mxu1 %v3570_v17  ;;  %v2268_v17 = vld [vmem:[#allocation15 + $0x40] sm:$0xff] }
 0xa54   : > { %3573 = vmatprep.subr.bf16.mxu1 %v3572_v5  ;;  %v2273_v5 = vld [vmem:[#allocation15 + $0x68] sm:$0xff] }
 0xae9   : > { %v5380_v28 = vpop.f32.mrb[0].mxu1  ;;  %v2468_v29 = vpop.f32.mrb[12].mxu0 }
 0xaea   : > { %v2469_v22 = vadd.f32 %v2468_v29, %v2395_v52  ;;  %v2228_v54 = vpop.f32.mrb[1].mxu1  ;;  %v2470_v41 = vpop.f32.mrb[13].mxu0  ;;  %v2272_v29 = vld [vmem:[#allocation15 + $0x60] sm:$0xff] }
 0xaeb   : > { %v2229_v16 = vadd.f32 %v2228_v54, %v5377_v63  ;;  %v2471_v45 = vadd.f32 %v2470_v41, %v2399_v25  ;;  %v2277_v54 = vld [vmem:[#allocation15 + $0x88] sm:$0xff]  ;;  %v2279_v41 = vld [vmem:[#allocation15 + $0x98] sm:$0xff] }
 0xaec   : > { %v2483_v0 = vmul.f32 0.70710677, %v2469_v22  ;;  %v2479_v44 = vmul.f32 0.5, %v2469_v22  ;;  %v2274_v22 = vld [vmem:[#allocation15 + $0x70] sm:$0xff] }
 0xaed   : > { %v2484_v1 = vmul.f32 0.70710677, %v2471_v45  ;;  %v5383_v32 = vpop.f32.mrb[2].mxu1  ;;  %v2474_v33 = vpop.f32.mrb[14].mxu0  ;;  %v2242_v34 = vmul.f32 0.70710677, %v2229_v16 }
 0xaee   : > { %4058 = verf.f32 %v2483_v0  ;;  %v2475_v35 = vadd.f32 %v2474_v33, %v2395_v52  ;;  %v5385_v36 = vpop.f32.mrb[3].mxu1  ;;  %v2476_v37 = vpop.f32.mrb[15].mxu0  ;;  %v2480_v12 = vmul.f32 0.5, %v2471_v45  ;;  %v2238_v14 = vmul.f32 0.5, %v2229_v16  ;;  %v2276_v0 = vld [vmem:[#allocation15 + $0x80] sm:$0xff]  ;;  %v2281_v33 = vld [vmem:[#allocation15 + $0xa8] sm:$0xff] }
 0xaef   : > { %v2477_v61 = vadd.f32 %v2476_v37, %v2399_v25  ;;  %4060 = verf.f32 %v2484_v1  ;;  %v3582_v52 = vpack.c.bf16 %v2270_v55, %v2268_v17  ;;  %v3584_v25 = vpack.c.bf16 %v2275_v24, %v2273_v5  ;;  %v2278_v1 = vld [vmem:[#allocation15 + $0x90] sm:$0xff]  ;;  %v2307_v17 = vld [vmem:[#allocation15 + $0x178] sm:$0xff] }
 0xaf0   : > { %v2485_v38 = vmul.f32 0.70710677, %v2475_v35  ;;  %4062 = verf.f32 %v2242_v34  ;;  %v2481_v6 = vmul.f32 0.5, %v2475_v35  ;;  %v3586_v16 = vpack.c.bf16 %v2274_v22, %v2272_v29  ;;  %v2283_v34 = vld [vmem:[#allocation15 + $0xb8] sm:$0xff] }
 0xaf1   : > { %v2486_v39 = vmul.f32 0.70710677, %v2477_v61  ;;  %v2482_v18 = vmul.f32 0.5, %v2477_v61  ;;  %v3588_v45 = vpack.c.bf16 %v2279_v41, %v2277_v54  ;;  %v3590_v35 = vpack.c.bf16 %v2278_v1, %v2276_v0  ;;  %v2280_v61 = vld [vmem:[#allocation15 + $0xa0] sm:$0xff]  ;;  %v2311_v29 = vld [vmem:[#allocation15 + $0x198] sm:$0xff]  ;;  %v2310_v0 = vld [vmem:[#allocation15 + $0x190] sm:$0xff] }
 0xaf2   : > { %4064 = verf.f32 %v2485_v38  ;;  %v3592_v37 = vpack.c.bf16 %v2283_v34, %v2281_v33  ;;  %v2282_v38 = vld [vmem:[#allocation15 + $0xb0] sm:$0xff]  ;;  %v2235_v5 = vadd.f32 %v5385_v36, %v5377_v63  ;;  %v2313_v1 = vld [vmem:[#allocation15 + $0x1a8] sm:$0xff]  ;;  %v2315_v33 = vld [vmem:[#allocation15 + $0x1b8] sm:$0xff] }
 0xaf3   : > { %4066 = verf.f32 %v2486_v39  ;;  %v2285_v39 = vld [vmem:[#allocation15 + $0xc8] sm:$0xff]  ;;  %v3624_v34 = vpack.c.bf16 %v2315_v33, %v2313_v1 }
 0xaf8   : > { %v4059_v11 = vpop.eup %4058 }
 0xaf9   : > { %v4061_v10 = vpop.eup %4060  ;;  %v2491_v2 = vadd.f32 1.0, %v4059_v11  ;;  %v2287_v11 = vld [vmem:[#allocation15 + $0xd8] sm:$0xff] }
 0xafa   : > { %v2492_v42 = vadd.f32 1.0, %v4061_v10  ;;  %v4063_v53 = vpop.eup %4062  ;;  %v3594_v10 = vpack.c.bf16 %v2282_v38, %v2280_v61  ;;  %v2317_v61 = vld [vmem:[#allocation15 + $0x1c8] sm:$0xff] }
 0xafb   : > { %v2495_v46 = vmul.f32 %v2491_v2, %v2479_v44  ;;  %v2250_v60 = vadd.f32 1.0, %v4063_v53  ;;  %v3596_v2 = vpack.c.bf16 %v2287_v11, %v2285_v39  ;;  %v2288_v53 = vld [vmem:[#allocation15 + $0xe0] sm:$0xff]  ;;  %v2290_v44 = vld [vmem:[#allocation15 + $0xf0] sm:$0xff] }
 0xafc   : > { %v4065_v51 = vpop.eup %4064  ;;  %v2496_v20 = vmul.f32 %v2492_v42, %v2480_v12  ;;  %v2289_v12 = vld [vmem:[#allocation15 + $0xe8] sm:$0xff]  ;;  %v2291_v42 = vld [vmem:[#allocation15 + $0xf8] sm:$0xff]  ;;  %v2316_v11 = vld [vmem:[#allocation15 + $0x1c0] sm:$0xff] }
 0xafd   : > { %v4067_v21 = vpop.eup %4066  ;;  %v2493_v9 = vadd.f32 1.0, %v4065_v51  ;;  %v2254_v57 = vmul.f32 %v2250_v60, %v2238_v14  ;;  %v3600_v43 = vpack.c.bf16 %v2291_v42, %v2289_v12  ;;  %v2293_v51 = vld [vmem:[#allocation15 + $0x108] sm:$0xff]  ;;  %v2320_v42 = vld [vmem:[#allocation15 + $0x1e0] sm:$0xff] }
 0xafe   : > { %2630 = vmatprep.mubr.f32.mxu1 %v2496_v20  ;;  %v2494_v19 = vadd.f32 1.0, %v4067_v21  ;;  %v2295_v20 = vld [vmem:[#allocation15 + $0x118] sm:$0xff]  ;;  %v2294_v21 = vld [vmem:[#allocation15 + $0x110] sm:$0xff] }
 0xaff   : > { %2631 = vmatmul.mubr.f32.vlgmr.msra.gmra.mrb[4].mxu1 %v2495_v46  ;;  %v2497_v27 = vmul.f32 %v2493_v9, %v2481_v6  ;;  %v3604_v46 = vpack.c.bf16 %v2295_v20, %v2293_v51  ;;  %v2297_v9 = vld [vmem:[#allocation15 + $0x128] sm:$0xff]  ;;  %v2153_v6 = vrot.slane %v5372_v62, %v4963_v48 }
 0xb00   : > { %3575 = vmatpush1.bf16.msra.mxu1 %v3574_v7  ;;  %v2498_v8 = vmul.f32 %v2494_v19, %v2482_v18  ;;  %v3602_v7 = vpack.c.bf16 %v2290_v44, %v2288_v53  ;;  %v3608_v60 = vpack.c.bf16 %v2299_v58, %v2297_v9  ;;  %v2296_v18 = vld [vmem:[#allocation15 + $0x120] sm:$0xff]  ;;  %v2298_v19 = vld [vmem:[#allocation15 + $0x130] sm:$0xff]  ;;  %v2309_v62 = vld [vmem:[#allocation15 + $0x188] sm:$0xff] }
 0xb01   : > { %3577 = vmatprep.subr.bf16.mxu1 %v3576_v50  ;;  %v2292_v50 = vld [vmem:[#allocation15 + $0x100] sm:$0xff]  ;;  %v3610_v14 = vpack.c.bf16 %v2298_v19, %v2296_v18  ;;  %v2227_v55 = vadd.f32 %v5380_v28, %v2153_v6  ;;  %v2233_v54 = vadd.f32 %v5383_v32, %v2153_v6  ;;  %v2319_v32 = vld [vmem:[#allocation15 + $0x1d8] sm:$0xff] }
 0xb02   : > { %2636 = vmatprep.mubr.f32.mxu1 %v2498_v8  ;;  %v3606_v59 = vpack.c.bf16 %v2294_v21, %v2292_v50  ;;  %v3612_v8 = vpack.c.bf16 %v2303_v13, %v2301_v26  ;;  %v2308_v28 = vld [vmem:[#allocation15 + $0x180] sm:$0xff]  ;;  %v3628_v39 = vpack.c.bf16 %v2319_v32, %v2317_v61  ;;  %v2240_v50 = vmul.f32 0.5, %v2235_v5  ;;  %v2720_v18 = vld [vmem:[%s5557_s6] sm:$0x3] }
 0xb03   : > { %2637 = vmatmul.mubr.f32.gmra.mrb[6].mxu1 %v2497_v27  ;;  %v2302_v27 = vld [vmem:[#allocation15 + $0x150] sm:$0xff]  ;;  %v2241_v22 = vmul.f32 0.70710677, %v2227_v55  ;;  %v2243_v63 = vmul.f32 0.70710677, %v2233_v54  ;;  %v3622_v36 = vpack.c.bf16 %v2310_v0, %v2308_v28  ;;  %v2725_v19 = vrot.slane %v2720_v18, %v4963_v48 }
 0xb04   : > { %3579 = vmatpush1.bf16.msra.mxu1 %v3578_v15  ;;  %2707 = vmatprep.mubr.f32.mxu1 %v2254_v57  ;;  %v2300_v15 = vld [vmem:[#allocation15 + $0x140] sm:$0xff]  ;;  %v2729_v26 = vrot.slane %v2720_v18, %v4960_v47 }
 0xb05   : > { %3581 = vmatprep.subr.bf16.mxu1 %v3580_v3  ;;  %v2305_v3 = vld [vmem:[#allocation15 + $0x168] sm:$0xff]  ;;  %v3614_v57 = vpack.c.bf16 %v2302_v27, %v2300_v15  ;;  %4068 = verf.f32 %v2241_v22 }
 0xb06   : > { %v3616_v24 = vpack.c.bf16 %v2307_v17, %v2305_v3 }
 0xb08   : > { %3583 = vmatpush1.bf16.msra.mxu1 %v3582_v52  ;;  %v2304_v52 = vld [vmem:[#allocation15 + $0x160] sm:$0xff] }
 0xb09   : > { %3585 = vmatprep.subr.bf16.mxu1 %v3584_v25  ;;  %v2306_v25 = vld [vmem:[#allocation15 + $0x170] sm:$0xff] }
 0xb0a   : > { %v3618_v41 = vpack.c.bf16 %v2306_v25, %v2304_v52 }
 0xb0c   : > { %3587 = vmatpush1.bf16.msra.mxu1 %v3586_v16  ;;  %v2244_v16 = vmul.f32 0.70710677, %v2235_v5 }
 0xb0d   : > { %3589 = vmatprep.subr.bf16.mxu1 %v3588_v45  ;;  %v3620_v45 = vpack.c.bf16 %v2311_v29, %v2309_v62 }
 0xb0e   : > { %4070 = verf.f32 %v2244_v16 }
 0xb0f   : > { %4072 = verf.f32 %v2243_v63 }
 0xb10   : > { %3591 = vmatpush1.bf16.msra.mxu1 %v3590_v35  ;;  %v2312_v35 = vld [vmem:[#allocation15 + $0x1a0] sm:$0xff] }
 0xb11   : > { %3593 = vmatprep.subr.bf16.mxu1 %v3592_v37  ;;  %v2314_v37 = vld [vmem:[#allocation15 + $0x1b0] sm:$0xff] }
 0xb12   : > { %v3626_v38 = vpack.c.bf16 %v2314_v37, %v2312_v35 }
 0xb14   : > { %3595 = vmatpush1.bf16.msra.mxu1 %v3594_v10  ;;  %v2318_v10 = vld [vmem:[#allocation15 + $0x1d0] sm:$0xff] }
 0xb15   : > { %3597 = vmatprep.subr.bf16.mxu1 %v3596_v2  ;;  %v2321_v2 = vld [vmem:[#allocation15 + $0x1e8] sm:$0xff]  ;;  %v3630_v4 = vpack.c.bf16 %v2318_v10, %v2316_v11 }
 0xb16   : > { %v3632_v12 = vpack.c.bf16 %v2323_v49, %v2321_v2 }
 0xb18   : > { %3599 = vmatpush1.bf16.msra.mxu1 %v3598_v40  ;;  %v2322_v40 = vld [vmem:[#allocation15 + $0x1f0] sm:$0xff] }
 0xb19   : > { %3601 = vmatprep.subr.bf16.mxu1 %v3600_v43  ;;  %v4069_v43 = vpop.eup %4068  ;;  %v3634_v44 = vpack.c.bf16 %v2322_v40, %v2320_v42 }
 0xb1a   : > { %v4071_v53 = vpop.eup %4070  ;;  %v2249_v51 = vadd.f32 1.0, %v4069_v43 }
 0xb1b   : > { %v4073_v20 = vpop.eup %4072 }
 0xb1c   : > { %3603 = vmatpush1.bf16.msra.mxu1 %v3602_v7  ;;  %v2252_v7 = vadd.f32 1.0, %v4071_v53  ;;  %v2251_v9 = vadd.f32 1.0, %v4073_v20 }
 0xb1d   : > { %3605 = vmatprep.subr.bf16.mxu1 %v3604_v46  ;;  %v2237_v46 = vmul.f32 0.5, %v2227_v55 }
 0xb1e   : > { %v2256_v58 = vmul.f32 %v2252_v7, %v2240_v50 }
 0xb1f   : > { %v2253_v21 = vmul.f32 %v2249_v51, %v2237_v46 }
 0xb20   : > { %3607 = vmatpush1.bf16.msra.mxu1 %v3606_v59  ;;  %v2239_v59 = vmul.f32 0.5, %v2233_v54 }
 0xb21   : > { %3609 = vmatprep.subr.bf16.mxu1 %v3608_v60 }
 0xb22   : > { %v2255_v60 = vmul.f32 %v2251_v9, %v2239_v59 }
 0xb24   : > { %3611 = vmatpush1.bf16.msra.mxu1 %v3610_v14 }
 0xb25   : > { %3613 = vmatprep.subr.bf16.mxu1 %v3612_v8 }
 0xb28   : > { %3615 = vmatpush1.bf16.msra.mxu1 %v3614_v57 }
 0xb29   : > { %3617 = vmatprep.subr.bf16.mxu1 %v3616_v24 }
 0xb2c   : > { %3619 = vmatpush1.bf16.msra.mxu1 %v3618_v41 }
 0xb2d   : > { %3621 = vmatprep.subr.bf16.mxu1 %v3620_v45 }
 0xb30   : > { %3623 = vmatpush1.bf16.msra.mxu1 %v3622_v36 }
 0xb31   : > { %3625 = vmatprep.subr.bf16.mxu1 %v3624_v34 }
 0xb34   : > { %3627 = vmatpush1.bf16.msra.mxu1 %v3626_v38 }
 0xb35   : > { %3629 = vmatprep.subr.bf16.mxu1 %v3628_v39 }
 0xb38   : > { %3631 = vmatpush1.bf16.msra.mxu1 %v3630_v4 }
 0xb39   : > { %3633 = vmatprep.subr.bf16.mxu1 %v3632_v12 }
 0xb3c   : > { %3635 = vmatpush1.bf16.msra.mxu1 %v3634_v44 }
 0xb3f   : > { %2708 = vmatmul.mubr.f32.vlgmr.msra.gmra.mrb[4].mxu1 %v2253_v21 }
 0xb40   : > { %2713 = vmatprep.mubr.f32.mxu1 %v2256_v58 }
 0xb43   : > { %2714 = vmatmul.mubr.f32.gmra.mrb[6].mxu1 %v2255_v60 }
 0xc12   : > { %v2709_v13 = vpop.f32.mrb[4].mxu1 }
 0xc13   : > { %v2732_v6 = vadd.f32 %v2725_v19, %v2709_v13  ;;  %v2711_v14 = vpop.f32.mrb[5].mxu1 }
 0xc14   : > { %v2733_v8 = vadd.f32 %v2729_v26, %v2711_v14 }
 0xc15   : > { %v2736_v15 = vadd.f32 %v2732_v6, %v5317_v30 }
 0xc16   : > { %v2737_v27 = vadd.f32 %v2733_v8, %v5320_v56  ;;  %v2715_v3 = vpop.f32.mrb[6].mxu1 }
 0xc17   : > { %2740 = vst [vmem:[%s5009_s12] sm:$0xff] %v2736_v15  ;;  %v2734_v47 = vadd.f32 %v2725_v19, %v2715_v3  ;;  %v2717_v48 = vpop.f32.mrb[7].mxu1 }
 0xc18   : > { %2741 = vst [vmem:[%s5009_s12 + $0x8] sm:$0xff] %v2737_v27  ;;  %v2735_v17 = vadd.f32 %v2729_v26, %v2717_v48 }
 0xc19   : > { %v2738_v55 = vadd.f32 %v2734_v47, %v5325_v31 }
 0xc1a   : > { %v2739_v30 = vadd.f32 %v2735_v17, %v5328_v23 }
 0xc1b   : > { %2742 = vst [vmem:[%s5009_s12 + $0x10] sm:$0xff] %v2738_v55 }
 0xc1c   : > { %2743 = vst [vmem:[%s5009_s12 + $0x18] sm:$0xff] %v2739_v30 }
 0xc1d   : > { %4257 = shalt.err (!%p4254_p1)
}
 0xc1e   : > { %s4258_s12 = scalar_lea.hbm %s5409_s30, 512  ;;  %s4262_s4 = scalar_lea.hbm %s5559_s10, 2048 }
 0xc1f   : > { %p4259_p3 = scmp.ne.s32.totalorder %s5409_s30, %s4258_s12  ;;  %p4263_p13 = scmp.lt.u32.totalorder %s5409_s30, %s5559_s10 }
 0xc20   : > { %p4264_p12 = scmp.lt.u32.totalorder %s4262_s4, %s4258_s12  ;;  %p4266_p7 = scmp.lt.u32.totalorder %s4258_s12, %s5409_s30 }
 0xc21   : > { %p4260_p10 = pnand %p4259_p3, %p5560_p5 }
 0xc22   : > { %p4265_p0 = por %p4264_p12, %p4263_p13 }
 0xc23   : > { %p4261_p8 = pneg %p4260_p10 }
 0xc24   : > { %p4267_p11 = por %p4266_p7, %p4265_p0 }
 0xc26   : > { %p4268_p2 = pnand %p4267_p11, %p4261_p8 }
 0xc28   : > { %4271 = shalt.err (!%p4268_p2)
}
 0xc29   : > { %s4570_s11 = smov 256   ;;  %s4571_s24 = smov 16  }
 0xc2a   : > { %3694 = dma.vmem_to_hbm [thread:$0]  (%p5560_p5), %s5411_s16, 512, %s5409_s30, %s2745_s13, %s4570_s11, %s4570_s11, %s4571_s24  }
 0xc2b PF: > { %s5561_s19 = sld [smem:[#allocation23_spill]]  ;;  %p3731_p4 = scmp.ge.s32.totalorder %s4454_s28, 2 }
 0xc2c   : > { %p5562_p6 = scmp.ne.s32.totalorder %s5525_s20, 0 }
 0xc2e   : > { %p3717_p9 = pnand %p3731_p4, %p5562_p6 }
 0xc31   : > { %s2776_s25 = sand.u32 1, %s5561_s19  }
 0xc32   : > { %s2777_s17 = scalar_lea.sflag [#allocation8], %s2776_s25 }
 0xc33   : > { %4421 = dma.done.wait (!%p3717_p9), %s2777_s17, 512  }
 0xc34   : > { %4423 = vsyncadd (!%p3717_p9), %s2777_s17, 4294966784  ;;  %s31_s28 = sadd.s32 1, %s4454_s28   ;;  %s5563_s15 = sld [smem:[#allocation25_spill]] }
 0xc35   : > { %p28_p1 = scmp.ge.s32.totalorder %s31_s28, 6   ;;  %s5564_s8 = sld [smem:[#allocation26_spill]] }
 0xc36   : > { %s5565_s21 = smov %s4430_s22  ;;  %s5566_s22 = smov %s4434_s23 }
 0xc37   : > { %s5567_s23 = smov %s4851_s18  ;;  %s5568_s24 = smov %s4446_s26 }
 0xc38   : > { %s5569_s25 = smov %s4450_s27  ;;  %30 = sbr.rel (!%p28_p1) target bundleno = 21 (0x15), region = 162 }
 0xc3a   : > { %s5570_s26 = smov %s5563_s15 }
 0xc3b   : > { %s5571_s27 = smov %s5564_s8 }
 0xc3f   :  { %2782 = vsyncpa [#allocation7], 1 }
 0xc40   :  { %2784 = vsyncpa [#allocation7 + $0x1], 1 }
 0xc41   :  { %2785 = vsyncpa [#allocation10], 1 }
 0xc42   :  { %2786 = vsyncpa [#allocation13], 1 }
 0xc43   :  { %2787 = vsyncpa [#allocation16], 1 }
 0xc44   :  { %2788 = vsyncpa [#allocation8], 1 }
 0xc45   :  { %2790 = vsyncpa [#allocation8 + $0x1], 1 }

</bundles_post_ra>
